<compile_context>
chip_gen: v7x
topology: tpu7x:2x2x1
jax: 0.10.0
libtpu: 0.0.40
codegen_flags: <defaults>
</compile_context>

<pallas_src>
import math

import jax
import jax.numpy as jnp
from jax import lax
from jax.experimental import pallas as pl
from jax.experimental.pallas import tpu as pltpu

_INV_SQRT2 = 0.7071067811865476
_EPS = 1e-5
_HIGHEST = lax.Precision.HIGHEST


def _erf(v):
    """Abramowitz & Stegun 7.1.26 erf approximation, |abs err| <= 1.5e-7.

    Built only from exp/abs/mul/add/where so it always lowers in Mosaic."""
    p = 0.3275911
    a1, a2, a3, a4, a5 = (0.254829592, -0.284496736, 1.421413741,
                          -1.453152027, 1.061405429)
    sgn = jnp.where(v < 0.0, -1.0, 1.0)
    av = jnp.abs(v)
    t = 1.0 / (1.0 + p * av)
    poly = ((((a5 * t + a4) * t + a3) * t + a2) * t + a1) * t
    return sgn * (1.0 - poly * jnp.exp(-av * av))


def _gate_mlp(g, w1t_ref, b1_ref, w2t_ref, b2_ref):
    """Linear(C->R) -> exact GELU -> Linear(R->C) -> sigmoid.  g: (Bt, C)."""
    h = jnp.dot(g, w1t_ref[...], precision=_HIGHEST,
                preferred_element_type=jnp.float32) + b1_ref[...]
    h = 0.5 * h * (1.0 + _erf(h * _INV_SQRT2))          # exact erf-GELU
    c = jnp.dot(h, w2t_ref[...], precision=_HIGHEST,
                preferred_element_type=jnp.float32) + b2_ref[...]
    return jax.nn.sigmoid(c)                             # (Bt, C)


# ---------------------------------------------------------------------------
# Lane-dense kernel: x viewed as (Bt, Rb, 128), Rb = N*C/128.
# Requires 128 % C == 0 (so C is a power of two) and Rb % 8 == 0 (so the
# in-kernel (Bt, Rb, 128) <-> (Bt*Rb, 128) reshapes never cross (8,128) tiles).
# ---------------------------------------------------------------------------
def _make_flat_kernel(N, C, Rb, block_b):
    K = 128 // C            # tokens per 128-lane row
    M = block_b * Rb        # lane rows per grid step
    inv_c = 1.0 / C
    inv_n = 1.0 / N

    def kernel(x_ref, lnw_ref, lnb_ref, w1t_ref, b1_ref, w2t_ref, b2_ref,
               o_ref):
        xf = x_ref[...].astype(jnp.float32).reshape(M, 128)   # lane-dense tile

        # Tiny 0/1 pattern matrices (iota + compare; C is a power of two).
        lane = lax.broadcasted_iota(jnp.int32, (128, K), 0)
        slot = lax.broadcasted_iota(jnp.int32, (128, K), 1)
        seg = ((lane >= slot * C) & (lane < slot * C + C)).astype(jnp.float32)
        slot_t = lax.broadcasted_iota(jnp.int32, (K, 128), 0)
        lane_t = lax.broadcasted_iota(jnp.int32, (K, 128), 1)
        expand = ((lane_t >= slot_t * C)
                  & (lane_t < slot_t * C + C)).astype(jnp.float32)
        lane_f = lax.broadcasted_iota(jnp.int32, (128, C), 0)
        chan_f = lax.broadcasted_iota(jnp.int32, (128, C), 1)
        fold = ((lane_f & (C - 1)) == chan_f).astype(jnp.float32)
        chan_s = lax.broadcasted_iota(jnp.int32, (C, 128), 0)
        lane_s = lax.broadcasted_iota(jnp.int32, (C, 128), 1)
        spread = ((lane_s & (C - 1)) == chan_s).astype(jnp.float32)
        row_b = lax.broadcasted_iota(jnp.int32, (block_b, M), 1)
        bat_b = lax.broadcasted_iota(jnp.int32, (block_b, M), 0)
        bsel = ((row_b >= bat_b * Rb)
                & (row_b < bat_b * Rb + Rb)).astype(jnp.float32)
        row_r = lax.broadcasted_iota(jnp.int32, (M, block_b), 0)
        bat_r = lax.broadcasted_iota(jnp.int32, (M, block_b), 1)
        bsel_t = ((row_r >= bat_r * Rb)
                  & (row_r < bat_r * Rb + Rb)).astype(jnp.float32)

        # --- fused per-token LayerNorm statistics (segment sums along lanes) -
        s1 = jnp.dot(xf, seg, precision=_HIGHEST,
                     preferred_element_type=jnp.float32)          # (M, K)
        s2 = jnp.dot(xf * xf, seg, precision=_HIGHEST,
                     preferred_element_type=jnp.float32)          # (M, K)
        mu = s1 * inv_c
        rstd = lax.rsqrt(s2 * inv_c - mu * mu + _EPS)             # (M, K)
        mu_l = jnp.dot(mu, expand, precision=_HIGHEST,
                       preferred_element_type=jnp.float32)        # (M, 128)
        rstd_l = jnp.dot(rstd, expand, precision=_HIGHEST,
                         preferred_element_type=jnp.float32)      # (M, 128)
        xn = (xf - mu_l) * rstd_l          # LayerNorm w/o affine (folded below)

        # --- g = per-batch token mean of LayerNorm(x) (affine applied on mean)
        gsum_l = jnp.dot(bsel, xn, precision=_HIGHEST,
                         preferred_element_type=jnp.float32)      # (Bt, 128)
        gsum = jnp.dot(gsum_l, fold, precision=_HIGHEST,
                       preferred_element_type=jnp.float32)        # (Bt, C)
        g = lnw_ref[...] * (gsum * inv_n) + lnb_ref[...]          # (Bt, C)

        attn = _gate_mlp(g, w1t_ref, b1_ref, w2t_ref, b2_ref)     # (Bt, C)

        # --- lane-dense gated store; x re-read fresh (short live range) ------
        attn_l = jnp.dot(attn, spread, precision=_HIGHEST,
                         preferred_element_type=jnp.float32)      # (Bt, 128)
        attn_rows = jnp.dot(bsel_t, attn_l, precision=_HIGHEST,
                            preferred_element_type=jnp.float32)   # (M, 128)
        out = x_ref[...].astype(jnp.float32).reshape(M, 128) * attn_rows
        o_ref[...] = out.reshape(block_b, Rb, 128).astype(o_ref.dtype)

    return kernel


# ---------------------------------------------------------------------------
# Fallback kernel: natural (Bt, N, C) tiling (lane-dense whenever C % 128 == 0).
# ---------------------------------------------------------------------------
def _token_kernel(x_ref, lnw_ref, lnb_ref, w1t_ref, b1_ref, w2t_ref, b2_ref,
                  o_ref):
    bt, _, c = x_ref.shape
    xf = x_ref[...].astype(jnp.float32)                     # (Bt, N, C)
    mu = jnp.mean(xf, axis=-1, keepdims=True)               # fused LN stats
    m2 = jnp.mean(xf * xf, axis=-1, keepdims=True)
    rstd = lax.rsqrt(m2 - mu * mu + _EPS)
    xn = (xf - mu) * rstd                                    # LN w/o affine
    g = lnw_ref[...] * jnp.mean(xn, axis=1) + lnb_ref[...]   # (Bt, C)
    attn = _gate_mlp(g, w1t_ref, b1_ref, w2t_ref, b2_ref)    # (Bt, C)
    o_ref[...] = (x_ref[...].astype(jnp.float32)
                  * attn.reshape(bt, 1, c)).astype(o_ref.dtype)


def _pick_block_b(B, N, C, itemsize, target_bytes=1 << 20):
    """Largest divisor of B with <= ~1 MiB of x per step, keeping >= 2 grid
    steps when B >= 2 so both v7x TensorCores get work."""
    per_batch = max(1, N * C * itemsize)
    tgt = max(1, target_bytes // per_batch)
    cap = B if B == 1 else max(1, B // 2)
    best = 1
    for d in range(1, B + 1):
        if B % d == 0 and d <= min(tgt, cap):
            best = d
    return best


def biattn_forward(x, params, *, block_b=None):
    """x: (B, N, C).  params: ln_w/ln_b (C,), w1 (R,C), b1 (R,), w2 (C,R), b2 (C,)."""
    B, N, C = x.shape
    R = params['w1'].shape[0]

    # Host-side, grid-invariant layout prep: pre-transposed Linear weights and
    # 2-D lane-dense small operands (no in-kernel relayouts).
    w1t = jnp.transpose(params['w1']).astype(jnp.float32)    # (C, R)
    w2t = jnp.transpose(params['w2']).astype(jnp.float32)    # (R, C)
    lnw = params['ln_w'].reshape(1, C).astype(jnp.float32)
    lnb = params['ln_b'].reshape(1, C).astype(jnp.float32)
    b1 = params['b1'].reshape(1, R).astype(jnp.float32)
    b2 = params['b2'].reshape(1, C).astype(jnp.float32)

    if block_b is None:
        block_b = _pick_block_b(B, N, C, x.dtype.itemsize)
    grid = (B // block_b,)

    # Explicit VMEM budget: ~2x-in + 2x-out pipeline buffers plus a handful of
    # full-tile f32 temporaries.  48 MiB cap keeps headroom on v7x (64 MiB
    # physical); the explicit value also lifts v5e's 16 MiB default scope.
    tile_bytes = block_b * N * C * 4
    vmem_limit = int(min(48 * 1024 * 1024,
                         max(32 * 1024 * 1024, 14 * tile_bytes)))
    cparams = pltpu.CompilerParams(dimension_semantics=("parallel",),
                                   vmem_limit_bytes=vmem_limit)

    const2 = lambda b: (0, 0)
    w_specs = [
        pl.BlockSpec((1, C), const2),       # LN weight
        pl.BlockSpec((1, C), const2),       # LN bias
        pl.BlockSpec((C, R), const2),       # W1^T
        pl.BlockSpec((1, R), const2),       # b1
        pl.BlockSpec((R, C), const2),       # W2^T
        pl.BlockSpec((1, C), const2),       # b2
    ]

    # Lane-dense flat path for narrow channel counts.
    use_flat = (C < 128) and (128 % C == 0) and ((N * C) % 1024 == 0)

    if use_flat:
        Rb = (N * C) // 128
        x_lane = x.reshape(B, Rb, 128)                       # free row-major view
        out = pl.pallas_call(
            _make_flat_kernel(N=N, C=C, Rb=Rb, block_b=block_b),
            out_shape=jax.ShapeDtypeStruct((B, Rb, 128), x.dtype),
            grid=grid,
            in_specs=[pl.BlockSpec((block_b, Rb, 128), lambda b: (b, 0, 0))]
                     + w_specs,
            out_specs=pl.BlockSpec((block_b, Rb, 128), lambda b: (b, 0, 0)),
            compiler_params=cparams,
        )(x_lane, lnw, lnb, w1t, b1, w2t, b2)
        return out.reshape(B, N, C)

    return pl.pallas_call(
        _token_kernel,
        out_shape=jax.ShapeDtypeStruct((B, N, C), x.dtype),
        grid=grid,
        in_specs=[pl.BlockSpec((block_b, N, C), lambda b: (b, 0, 0))] + w_specs,
        out_specs=pl.BlockSpec((block_b, N, C), lambda b: (b, 0, 0)),
        compiler_params=cparams,
    )(x, lnw, lnb, w1t, b1, w2t, b2)


# ---------------------------------------------------------------------------
# Pure-JAX reference (mirrors the PyTorch module) for correctness checking.
# ---------------------------------------------------------------------------
def _biattn_ref(x, params):
    xf = x.astype(jnp.float32)
    mu = jnp.mean(xf, axis=-1, keepdims=True)
    var = jnp.mean((xf - mu) ** 2, axis=-1, keepdims=True)
    xn = (xf - mu) / jnp.sqrt(var + _EPS)
    xn = xn * params['ln_w'] + params['ln_b']
    g = jnp.mean(xn, axis=1, keepdims=True)                           # (B,1,C)
    h = jnp.einsum('bic,rc->bir', g, params['w1'],
                   precision=_HIGHEST) + params['b1']
    h = jax.nn.gelu(h, approximate=False)                             # exact GELU
    c = jnp.einsum('bir,cr->bic', h, params['w2'],
                   precision=_HIGHEST) + params['b2']
    return (xf * jax.nn.sigmoid(c)).astype(x.dtype)


# ---------------------------------------------------------------------------
def _run_case(key, B, N, C, act_ratio=0.125, tol=5e-3):
    # tol leaves room for MXU multi-pass f32 rounding in the tiny gate matmuls;
    # structural errors (wrong formula / broadcast / lane mapping) are >= 1e-1.
    R = max(1, int(C * act_ratio))
    kx, kw1, kb1, kw2, kb2, kg, kb = jax.random.split(key, 7)
    bnd1 = 1.0 / math.sqrt(C)
    bnd2 = 1.0 / math.sqrt(R)
    params = dict(
        ln_w=(1.0 + 0.1 * jax.random.normal(kg, (C,))).astype(jnp.float32),
        ln_b=(0.1 * jax.random.normal(kb, (C,))).astype(jnp.float32),
        w1=jax.random.uniform(kw1, (R, C), jnp.float32, -bnd1, bnd1),
        b1=jax.random.uniform(kb1, (R,), jnp.float32, -bnd1, bnd1),
        w2=jax.random.uniform(kw2, (C, R), jnp.float32, -bnd2, bnd2),
        b2=jax.random.uniform(kb2, (C,), jnp.float32, -bnd2, bnd2),
    )
    x = jax.random.normal(kx, (B, N, C), jnp.float32)

    out = jax.block_until_ready(
        jax.jit(lambda xx: biattn_forward(xx, params))(x))
    assert out.shape == (B, N, C) and out.dtype == x.dtype
    ref = jax.block_until_ready(_biattn_ref(x, params))
    err = float(jnp.max(jnp.abs(out - ref)))
    assert err < tol, f"(B={B},N={N},C={C}) max |out - ref| = {err}"


if __name__ == "__main__":
    root = jax.random.PRNGKey(0)
    k1, k2 = jax.random.split(root)
    # Primary: lane-dense flat path (C=32 divides 128); Bt=4, grid=(2,).
    _run_case(k1, B=8, N=64, C=32)
    # Fallback path: C=48 does not divide 128 -> (Bt, N, C) kernel; Bt=2.
    _run_case(k2, B=4, N=16, C=48)
    print("KERNEL_OK")
</pallas_src>

<mosaic_0001>
module attributes {stable_mosaic.version = 11 : i64} {
  func.func @kernel(%arg0: i32, %arg1: memref<4x16x128xf32, #tpu.memory_space<vmem>>, %arg2: memref<1x32xf32, #tpu.memory_space<vmem>>, %arg3: memref<1x32xf32, #tpu.memory_space<vmem>>, %arg4: memref<32x4xf32, #tpu.memory_space<vmem>>, %arg5: memref<1x4xf32, #tpu.memory_space<vmem>>, %arg6: memref<4x32xf32, #tpu.memory_space<vmem>>, %arg7: memref<1x32xf32, #tpu.memory_space<vmem>>, %arg8: memref<4x16x128xf32, #tpu.memory_space<vmem>>) attributes {dimension_semantics = [#tpu.dimension_semantics<parallel>], iteration_bounds = array<i64: 2>, scalar_prefetch = 0 : i64, scratch_operands = 0 : i64, tpu.core_type = #tpu.core_type<tc>, window_params = [{transform_indices = @transform_0, window_bounds = array<i64: 4, 16, 128>}, {pipeline_mode = #tpu.pipeline_mode<synchronous>, transform_indices = @transform_1, window_bounds = array<i64: 1, 32>}, {pipeline_mode = #tpu.pipeline_mode<synchronous>, transform_indices = @transform_2, window_bounds = array<i64: 1, 32>}, {pipeline_mode = #tpu.pipeline_mode<synchronous>, transform_indices = @transform_3, window_bounds = array<i64: 32, 4>}, {pipeline_mode = #tpu.pipeline_mode<synchronous>, transform_indices = @transform_4, window_bounds = array<i64: 1, 4>}, {pipeline_mode = #tpu.pipeline_mode<synchronous>, transform_indices = @transform_5, window_bounds = array<i64: 4, 32>}, {pipeline_mode = #tpu.pipeline_mode<synchronous>, transform_indices = @transform_6, window_bounds = array<i64: 1, 32>}, {transform_indices = @transform_7, window_bounds = array<i64: 4, 16, 128>}]} {
    %c0 = arith.constant 0 : index
    %c0_0 = arith.constant 0 : index
    %c0_1 = arith.constant 0 : index
    %0 = vector.load %arg1[%c0, %c0_0, %c0_1] : memref<4x16x128xf32, #tpu.memory_space<vmem>>, vector<4x16x128xf32>
    %1 = vector.shape_cast %0 : vector<4x16x128xf32> to vector<64x128xf32>
    %2 = tpu.iota {dimensions = array<i32: 0>} : vector<128x4xi32>
    %3 = tpu.iota {dimensions = array<i32: 1>} : vector<128x4xi32>
    %c32_i32 = arith.constant 32 : i32
    %4 = vector.broadcast %c32_i32 : i32 to vector<128x4xi32>
    %5 = arith.muli %3, %4 : vector<128x4xi32>
    %6 = arith.cmpi sge, %2, %5 : vector<128x4xi32>
    %c32_i32_2 = arith.constant 32 : i32
    %7 = vector.broadcast %c32_i32_2 : i32 to vector<128x4xi32>
    %8 = arith.muli %3, %7 : vector<128x4xi32>
    %c32_i32_3 = arith.constant 32 : i32
    %9 = vector.broadcast %c32_i32_3 : i32 to vector<128x4xi32>
    %10 = arith.addi %8, %9 : vector<128x4xi32>
    %11 = arith.cmpi slt, %2, %10 : vector<128x4xi32>
    %12 = arith.andi %6, %11 : vector<128x4xi1>
    %13 = arith.extui %12 : vector<128x4xi1> to vector<128x4xi32>
    %14 = arith.sitofp %13 : vector<128x4xi32> to vector<128x4xf32>
    %15 = tpu.iota {dimensions = array<i32: 0>} : vector<4x128xi32>
    %16 = tpu.iota {dimensions = array<i32: 1>} : vector<4x128xi32>
    %c32_i32_4 = arith.constant 32 : i32
    %17 = vector.broadcast %c32_i32_4 : i32 to vector<4x128xi32>
    %18 = arith.muli %15, %17 : vector<4x128xi32>
    %19 = arith.cmpi sge, %16, %18 : vector<4x128xi32>
    %c32_i32_5 = arith.constant 32 : i32
    %20 = vector.broadcast %c32_i32_5 : i32 to vector<4x128xi32>
    %21 = arith.muli %15, %20 : vector<4x128xi32>
    %c32_i32_6 = arith.constant 32 : i32
    %22 = vector.broadcast %c32_i32_6 : i32 to vector<4x128xi32>
    %23 = arith.addi %21, %22 : vector<4x128xi32>
    %24 = arith.cmpi slt, %16, %23 : vector<4x128xi32>
    %25 = arith.andi %19, %24 : vector<4x128xi1>
    %26 = arith.extui %25 : vector<4x128xi1> to vector<4x128xi32>
    %27 = arith.sitofp %26 : vector<4x128xi32> to vector<4x128xf32>
    %28 = tpu.iota {dimensions = array<i32: 0>} : vector<128x32xi32>
    %29 = tpu.iota {dimensions = array<i32: 1>} : vector<128x32xi32>
    %c31_i32 = arith.constant 31 : i32
    %30 = vector.broadcast %c31_i32 : i32 to vector<128x32xi32>
    %31 = arith.andi %28, %30 : vector<128x32xi32>
    %32 = arith.cmpi eq, %31, %29 : vector<128x32xi32>
    %33 = arith.extui %32 : vector<128x32xi1> to vector<128x32xi32>
    %34 = arith.sitofp %33 : vector<128x32xi32> to vector<128x32xf32>
    %35 = tpu.iota {dimensions = array<i32: 0>} : vector<32x128xi32>
    %36 = tpu.iota {dimensions = array<i32: 1>} : vector<32x128xi32>
    %c31_i32_7 = arith.constant 31 : i32
    %37 = vector.broadcast %c31_i32_7 : i32 to vector<32x128xi32>
    %38 = arith.andi %36, %37 : vector<32x128xi32>
    %39 = arith.cmpi eq, %38, %35 : vector<32x128xi32>
    %40 = arith.extui %39 : vector<32x128xi1> to vector<32x128xi32>
    %41 = arith.sitofp %40 : vector<32x128xi32> to vector<32x128xf32>
    %42 = tpu.iota {dimensions = array<i32: 1>} : vector<4x64xi32>
    %43 = tpu.iota {dimensions = array<i32: 0>} : vector<4x64xi32>
    %c16_i32 = arith.constant 16 : i32
    %44 = vector.broadcast %c16_i32 : i32 to vector<4x64xi32>
    %45 = arith.muli %43, %44 : vector<4x64xi32>
    %46 = arith.cmpi sge, %42, %45 : vector<4x64xi32>
    %c16_i32_8 = arith.constant 16 : i32
    %47 = vector.broadcast %c16_i32_8 : i32 to vector<4x64xi32>
    %48 = arith.muli %43, %47 : vector<4x64xi32>
    %c16_i32_9 = arith.constant 16 : i32
    %49 = vector.broadcast %c16_i32_9 : i32 to vector<4x64xi32>
    %50 = arith.addi %48, %49 : vector<4x64xi32>
    %51 = arith.cmpi slt, %42, %50 : vector<4x64xi32>
    %52 = arith.andi %46, %51 : vector<4x64xi1>
    %53 = arith.extui %52 : vector<4x64xi1> to vector<4x64xi32>
    %54 = arith.sitofp %53 : vector<4x64xi32> to vector<4x64xf32>
    %55 = tpu.iota {dimensions = array<i32: 0>} : vector<64x4xi32>
    %56 = tpu.iota {dimensions = array<i32: 1>} : vector<64x4xi32>
    %c16_i32_10 = arith.constant 16 : i32
    %57 = vector.broadcast %c16_i32_10 : i32 to vector<64x4xi32>
    %58 = arith.muli %56, %57 : vector<64x4xi32>
    %59 = arith.cmpi sge, %55, %58 : vector<64x4xi32>
    %c16_i32_11 = arith.constant 16 : i32
    %60 = vector.broadcast %c16_i32_11 : i32 to vector<64x4xi32>
    %61 = arith.muli %56, %60 : vector<64x4xi32>
    %c16_i32_12 = arith.constant 16 : i32
    %62 = vector.broadcast %c16_i32_12 : i32 to vector<64x4xi32>
    %63 = arith.addi %61, %62 : vector<64x4xi32>
    %64 = arith.cmpi slt, %55, %63 : vector<64x4xi32>
    %65 = arith.andi %59, %64 : vector<64x4xi1>
    %66 = arith.extui %65 : vector<64x4xi1> to vector<64x4xi32>
    %67 = arith.sitofp %66 : vector<64x4xi32> to vector<64x4xf32>
    %cst = arith.constant dense<0.000000e+00> : vector<64x4xf32>
    %68 = tpu.matmul %1, %14, %cst {dimension_numbers = #tpu.dot_dimension_numbers<[1], [0], [0], [1], [0, 0, 1, 1], [], []>, precision = #tpu.contract_precision<fp32>} : vector<64x128xf32>, vector<128x4xf32>, vector<64x4xf32> -> vector<64x4xf32>
    %69 = arith.mulf %1, %1 : vector<64x128xf32>
    %cst_13 = arith.constant dense<0.000000e+00> : vector<64x4xf32>
    %70 = tpu.matmul %69, %14, %cst_13 {dimension_numbers = #tpu.dot_dimension_numbers<[1], [0], [0], [1], [0, 0, 1, 1], [], []>, precision = #tpu.contract_precision<fp32>} : vector<64x128xf32>, vector<128x4xf32>, vector<64x4xf32> -> vector<64x4xf32>
    %cst_14 = arith.constant 3.125000e-02 : f32
    %71 = vector.broadcast %cst_14 : f32 to vector<64x4xf32>
    %72 = arith.mulf %68, %71 : vector<64x4xf32>
    %cst_15 = arith.constant 3.125000e-02 : f32
    %73 = vector.broadcast %cst_15 : f32 to vector<64x4xf32>
    %74 = arith.mulf %70, %73 : vector<64x4xf32>
    %75 = arith.mulf %72, %72 : vector<64x4xf32>
    %76 = arith.subf %74, %75 : vector<64x4xf32>
    %cst_16 = arith.constant 9.99999974E-6 : f32
    %77 = vector.broadcast %cst_16 : f32 to vector<64x4xf32>
    %78 = arith.addf %76, %77 : vector<64x4xf32>
    %79 = math.rsqrt %78 : vector<64x4xf32>
    %cst_17 = arith.constant dense<0.000000e+00> : vector<64x128xf32>
    %80 = tpu.matmul %72, %27, %cst_17 {dimension_numbers = #tpu.dot_dimension_numbers<[1], [0], [0], [1], [0, 0, 1, 1], [], []>, precision = #tpu.contract_precision<fp32>} : vector<64x4xf32>, vector<4x128xf32>, vector<64x128xf32> -> vector<64x128xf32>
    %cst_18 = arith.constant dense<0.000000e+00> : vector<64x128xf32>
    %81 = tpu.matmul %79, %27, %cst_18 {dimension_numbers = #tpu.dot_dimension_numbers<[1], [0], [0], [1], [0, 0, 1, 1], [], []>, precision = #tpu.contract_precision<fp32>} : vector<64x4xf32>, vector<4x128xf32>, vector<64x128xf32> -> vector<64x128xf32>
    %82 = arith.subf %1, %80 : vector<64x128xf32>
    %83 = arith.mulf %82, %81 : vector<64x128xf32>
    %cst_19 = arith.constant dense<0.000000e+00> : vector<4x128xf32>
    %84 = tpu.matmul %54, %83, %cst_19 {dimension_numbers = #tpu.dot_dimension_numbers<[1], [0], [0], [1], [0, 0, 1, 1], [], []>, precision = #tpu.contract_precision<fp32>} : vector<4x64xf32>, vector<64x128xf32>, vector<4x128xf32> -> vector<4x128xf32>
    %cst_20 = arith.constant dense<0.000000e+00> : vector<4x32xf32>
    %85 = tpu.matmul %84, %34, %cst_20 {dimension_numbers = #tpu.dot_dimension_numbers<[1], [0], [0], [1], [0, 0, 1, 1], [], []>, precision = #tpu.contract_precision<fp32>} : vector<4x128xf32>, vector<128x32xf32>, vector<4x32xf32> -> vector<4x32xf32>
    %c0_21 = arith.constant 0 : index
    %c0_22 = arith.constant 0 : index
    %86 = vector.load %arg2[%c0_21, %c0_22] : memref<1x32xf32, #tpu.memory_space<vmem>>, vector<1x32xf32>
    %cst_23 = arith.constant 1.562500e-02 : f32
    %87 = vector.broadcast %cst_23 : f32 to vector<4x32xf32>
    %88 = arith.mulf %85, %87 : vector<4x32xf32>
    %89 = vector.broadcast %86 : vector<1x32xf32> to vector<4x32xf32>
    %90 = arith.mulf %89, %88 : vector<4x32xf32>
    %c0_24 = arith.constant 0 : index
    %c0_25 = arith.constant 0 : index
    %91 = vector.load %arg3[%c0_24, %c0_25] : memref<1x32xf32, #tpu.memory_space<vmem>>, vector<1x32xf32>
    %92 = vector.broadcast %91 : vector<1x32xf32> to vector<4x32xf32>
    %93 = arith.addf %90, %92 : vector<4x32xf32>
    %c0_26 = arith.constant 0 : index
    %c0_27 = arith.constant 0 : index
    %94 = vector.load %arg4[%c0_26, %c0_27] : memref<32x4xf32, #tpu.memory_space<vmem>>, vector<32x4xf32>
    %cst_28 = arith.constant dense<0.000000e+00> : vector<4x4xf32>
    %95 = tpu.matmul %93, %94, %cst_28 {dimension_numbers = #tpu.dot_dimension_numbers<[1], [0], [0], [1], [0, 0, 1, 1], [], []>, precision = #tpu.contract_precision<fp32>} : vector<4x32xf32>, vector<32x4xf32>, vector<4x4xf32> -> vector<4x4xf32>
    %c0_29 = arith.constant 0 : index
    %c0_30 = arith.constant 0 : index
    %96 = vector.load %arg5[%c0_29, %c0_30] : memref<1x4xf32, #tpu.memory_space<vmem>>, vector<1x4xf32>
    %97 = vector.broadcast %96 : vector<1x4xf32> to vector<4x4xf32>
    %98 = arith.addf %95, %97 : vector<4x4xf32>
    %cst_31 = arith.constant 5.000000e-01 : f32
    %99 = vector.broadcast %cst_31 : f32 to vector<4x4xf32>
    %100 = arith.mulf %99, %98 : vector<4x4xf32>
    %cst_32 = arith.constant 0.707106769 : f32
    %101 = vector.broadcast %cst_32 : f32 to vector<4x4xf32>
    %102 = arith.mulf %98, %101 : vector<4x4xf32>
    %cst_33 = arith.constant 0.000000e+00 : f32
    %103 = vector.broadcast %cst_33 : f32 to vector<4x4xf32>
    %104 = arith.cmpf olt, %102, %103 : vector<4x4xf32>
    %cst_34 = arith.constant -1.000000e+00 : f32
    %cst_35 = arith.constant 1.000000e+00 : f32
    %105 = vector.broadcast %cst_34 : f32 to vector<4x4xf32>
    %106 = vector.broadcast %cst_35 : f32 to vector<4x4xf32>
    %107 = arith.select %104, %105, %106 : vector<4x4xi1>, vector<4x4xf32>
    %108 = math.absf %102 : vector<4x4xf32>
    %cst_36 = arith.constant 0.327591091 : f32
    %109 = vector.broadcast %cst_36 : f32 to vector<4x4xf32>
    %110 = arith.mulf %109, %108 : vector<4x4xf32>
    %cst_37 = arith.constant 1.000000e+00 : f32
    %111 = vector.broadcast %cst_37 : f32 to vector<4x4xf32>
    %112 = arith.addf %111, %110 : vector<4x4xf32>
    %cst_38 = arith.constant 1.000000e+00 : f32
    %113 = vector.broadcast %cst_38 : f32 to vector<4x4xf32>
    %114 = arith.divf %113, %112 : vector<4x4xf32>
    %cst_39 = arith.constant 1.06140542 : f32
    %115 = vector.broadcast %cst_39 : f32 to vector<4x4xf32>
    %116 = arith.mulf %115, %114 : vector<4x4xf32>
    %cst_40 = arith.constant -1.45315206 : f32
    %117 = vector.broadcast %cst_40 : f32 to vector<4x4xf32>
    %118 = arith.addf %116, %117 : vector<4x4xf32>
    %119 = arith.mulf %118, %114 : vector<4x4xf32>
    %cst_41 = arith.constant 1.42141378 : f32
    %120 = vector.broadcast %cst_41 : f32 to vector<4x4xf32>
    %121 = arith.addf %119, %120 : vector<4x4xf32>
    %122 = arith.mulf %121, %114 : vector<4x4xf32>
    %cst_42 = arith.constant -0.284496725 : f32
    %123 = vector.broadcast %cst_42 : f32 to vector<4x4xf32>
    %124 = arith.addf %122, %123 : vector<4x4xf32>
    %125 = arith.mulf %124, %114 : vector<4x4xf32>
    %cst_43 = arith.constant 0.254829586 : f32
    %126 = vector.broadcast %cst_43 : f32 to vector<4x4xf32>
    %127 = arith.addf %125, %126 : vector<4x4xf32>
    %128 = arith.mulf %127, %114 : vector<4x4xf32>
    %cst_44 = arith.constant 0.000000e+00 : f32
    %129 = vector.broadcast %cst_44 : f32 to vector<4x4xf32>
    %130 = arith.subf %129, %108 : vector<4x4xf32>
    %131 = arith.mulf %130, %108 : vector<4x4xf32>
    %132 = math.exp %131 : vector<4x4xf32>
    %133 = arith.mulf %128, %132 : vector<4x4xf32>
    %cst_45 = arith.constant 1.000000e+00 : f32
    %134 = vector.broadcast %cst_45 : f32 to vector<4x4xf32>
    %135 = arith.subf %134, %133 : vector<4x4xf32>
    %136 = arith.mulf %107, %135 : vector<4x4xf32>
    %cst_46 = arith.constant 1.000000e+00 : f32
    %137 = vector.broadcast %cst_46 : f32 to vector<4x4xf32>
    %138 = arith.addf %137, %136 : vector<4x4xf32>
    %139 = arith.mulf %100, %138 : vector<4x4xf32>
    %c0_47 = arith.constant 0 : index
    %c0_48 = arith.constant 0 : index
    %140 = vector.load %arg6[%c0_47, %c0_48] : memref<4x32xf32, #tpu.memory_space<vmem>>, vector<4x32xf32>
    %cst_49 = arith.constant dense<0.000000e+00> : vector<4x32xf32>
    %141 = tpu.matmul %139, %140, %cst_49 {dimension_numbers = #tpu.dot_dimension_numbers<[1], [0], [0], [1], [0, 0, 1, 1], [], []>, precision = #tpu.contract_precision<fp32>} : vector<4x4xf32>, vector<4x32xf32>, vector<4x32xf32> -> vector<4x32xf32>
    %c0_50 = arith.constant 0 : index
    %c0_51 = arith.constant 0 : index
    %142 = vector.load %arg7[%c0_50, %c0_51] : memref<1x32xf32, #tpu.memory_space<vmem>>, vector<1x32xf32>
    %143 = vector.broadcast %142 : vector<1x32xf32> to vector<4x32xf32>
    %144 = arith.addf %141, %143 : vector<4x32xf32>
    %145 = arith.negf %144 : vector<4x32xf32>
    %146 = math.exp %145 : vector<4x32xf32>
    %cst_52 = arith.constant 1.000000e+00 : f32
    %147 = vector.broadcast %cst_52 : f32 to vector<4x32xf32>
    %148 = arith.addf %147, %146 : vector<4x32xf32>
    %149 = arith.divf %147, %148 : vector<4x32xf32>
    %cst_53 = arith.constant dense<0.000000e+00> : vector<4x128xf32>
    %150 = tpu.matmul %149, %41, %cst_53 {dimension_numbers = #tpu.dot_dimension_numbers<[1], [0], [0], [1], [0, 0, 1, 1], [], []>, precision = #tpu.contract_precision<fp32>} : vector<4x32xf32>, vector<32x128xf32>, vector<4x128xf32> -> vector<4x128xf32>
    %cst_54 = arith.constant dense<0.000000e+00> : vector<64x128xf32>
    %151 = tpu.matmul %67, %150, %cst_54 {dimension_numbers = #tpu.dot_dimension_numbers<[1], [0], [0], [1], [0, 0, 1, 1], [], []>, precision = #tpu.contract_precision<fp32>} : vector<64x4xf32>, vector<4x128xf32>, vector<64x128xf32> -> vector<64x128xf32>
    %c0_55 = arith.constant 0 : index
    %c0_56 = arith.constant 0 : index
    %c0_57 = arith.constant 0 : index
    %152 = vector.load %arg1[%c0_55, %c0_56, %c0_57] : memref<4x16x128xf32, #tpu.memory_space<vmem>>, vector<4x16x128xf32>
    %153 = vector.shape_cast %152 : vector<4x16x128xf32> to vector<64x128xf32>
    %154 = arith.mulf %153, %151 : vector<64x128xf32>
    %155 = vector.shape_cast %154 : vector<64x128xf32> to vector<4x16x128xf32>
    %c0_58 = arith.constant 0 : index
    %c0_59 = arith.constant 0 : index
    %c0_60 = arith.constant 0 : index
    %156 = vector.load %arg8[%c0_58, %c0_59, %c0_60] : memref<4x16x128xf32, #tpu.memory_space<vmem>>, vector<4x16x128xf32>
    tpu.vector_store %arg8[%c0_58, %c0_59, %c0_60], %155 {strides = array<i32>} : memref<4x16x128xf32, #tpu.memory_space<vmem>>, vector<4x16x128xf32>,
    return
  }
  func.func @transform_0(%arg0: i32) -> (i32, i32, i32) {
    %c0_i32 = arith.constant 0 : i32
    %c0_i32_0 = arith.constant 0 : i32
    %c0_i32_1 = arith.constant 0 : i32
    return %arg0, %c0_i32, %c0_i32_0 : i32, i32, i32
  }
  func.func @transform_1(%arg0: i32) -> (i32, i32) {
    %c0_i32 = arith.constant 0 : i32
    %c0_i32_0 = arith.constant 0 : i32
    %c0_i32_1 = arith.constant 0 : i32
    return %c0_i32, %c0_i32_0 : i32, i32
  }
  func.func @transform_2(%arg0: i32) -> (i32, i32) {
    %c0_i32 = arith.constant 0 : i32
    %c0_i32_0 = arith.constant 0 : i32
    %c0_i32_1 = arith.constant 0 : i32
    return %c0_i32, %c0_i32_0 : i32, i32
  }
  func.func @transform_3(%arg0: i32) -> (i32, i32) {
    %c0_i32 = arith.constant 0 : i32
    %c0_i32_0 = arith.constant 0 : i32
    %c0_i32_1 = arith.constant 0 : i32
    return %c0_i32, %c0_i32_0 : i32, i32
  }
  func.func @transform_4(%arg0: i32) -> (i32, i32) {
    %c0_i32 = arith.constant 0 : i32
    %c0_i32_0 = arith.constant 0 : i32
    %c0_i32_1 = arith.constant 0 : i32
    return %c0_i32, %c0_i32_0 : i32, i32
  }
  func.func @transform_5(%arg0: i32) -> (i32, i32) {
    %c0_i32 = arith.constant 0 : i32
    %c0_i32_0 = arith.constant 0 : i32
    %c0_i32_1 = arith.constant 0 : i32
    return %c0_i32, %c0_i32_0 : i32, i32
  }
  func.func @transform_6(%arg0: i32) -> (i32, i32) {
    %c0_i32 = arith.constant 0 : i32
    %c0_i32_0 = arith.constant 0 : i32
    %c0_i32_1 = arith.constant 0 : i32
    return %c0_i32, %c0_i32_0 : i32, i32
  }
  func.func @transform_7(%arg0: i32) -> (i32, i32, i32) {
    %c0_i32 = arith.constant 0 : i32
    %c0_i32_0 = arith.constant 0 : i32
    %c0_i32_1 = arith.constant 0 : i32
    return %arg0, %c0_i32, %c0_i32_0 : i32, i32, i32
  }
}

</mosaic_0001>

<bundles_post_ra>
// kernel: _lambda_.1
= control target key start
LH: loop header
LB: loop body
LE: loop exit
PB: predicated region body
PF: predicated region fallthrough
CT: control target
= control target key end

     0   :  { %s10791_s24 = smov 0   ;;  %s13308_s0 = inlined_call_operand.vmem [shape: f32[8,16,128], index: 0, kind: input, shape index: {}]   ;;  %s13309_s1 = inlined_call_operand.vmem [shape: f32[1,32], index: 1, kind: input, shape index: {}]   ;;  %s13310_s2 = inlined_call_operand.vmem [shape: f32[1,32], index: 2, kind: input, shape index: {}]   ;;  %s13311_s3 = inlined_call_operand.vmem [shape: f32[32,4], index: 3, kind: input, shape index: {}]   ;;  %s13312_s4 = inlined_call_operand.vmem [shape: f32[1,4], index: 4, kind: input, shape index: {}]   ;;  %s13313_s5 = inlined_call_operand.vmem [shape: f32[4,32], index: 5, kind: input, shape index: {}]   ;;  %s13314_s6 = inlined_call_operand.vmem [shape: f32[1,32], index: 6, kind: input, shape index: {}]   ;;  %s13315_s7 = inlined_call_operand.vmem [shape: f32[8,16,128], index: 7, kind: output, shape index: {}]  }
   0x1 LB: > { %s7560_s25 = sadd.s32 4294967295, %s10744_s24   ;;  %p7564_p0 = scmp.ge.s32.totalorder %s10744_s24, 1  ;;  %s10744_s24 = sphi %s10791_s24, %s17_s24  }
   0x2   : > { %p239_p1 = scmp.lt.s32.totalorder %s10744_s24, 3 }
   0x4   : > { %p240_p2 = pnand %p7564_p0, %p239_p1 }
   0x6   : > { %243 = sbr.rel (%p240_p2) target bundleno = 2663 (0xa67), region = 48 }
   0xd   : > { %v295_v0 = vlaneseq  ;;  %v13331_v12 = vmov 0.0   ;;  %s10874_s26 = sshll.u32 %s7560_s25, 2  ;;  %v13328_v21 = vmov 1.0|1.0  }
   0xe   : > { %p274_p3 = scmp.lt.s32.totalorder %s10874_s26, 7 }
   0xf   : > { %v10799_v1 = vshrl.u32 %v295_v0, 7  ;;  %v10801_v2 = vand.u32 127, %v295_v0 }
  0x10   : > { %s13632_s26 = smov (!%p274_p3, %s10874_s26), 7 }
  0x11   : > { %13401 = vst [vmem:[#allocation2_spill] sm:$0xff] %v10799_v1  ;;  %13402 = vst [vmem:[#allocation3_spill] sm:$0xff] %v10801_v2  ;;  %v10804_v3 = vadd.s32 8, %v10799_v1  ;;  %v10807_v4 = vmul.u32 32, %v10801_v2  ;;  %v10810_v5 = vadd.s32 16, %v10799_v1  ;;  %v10813_v6 = vadd.s32 24, %v10799_v1 }
  0x12   : > { %v10816_v7 = vadd.s32 32, %v10799_v1  ;;  %v10819_v8 = vadd.s32 40, %v10799_v1  ;;  %v10822_v9 = vadd.s32 48, %v10799_v1  ;;  %v10825_v10 = vadd.s32 56, %v10799_v1  ;;  %s7813_s27 = sshll.u32 %s13632_s26, 4 }
  0x13   : > { %13403 = vst [vmem:[#allocation4_spill] sm:$0xff] %v10804_v3  ;;  %13404 = vst [vmem:[#allocation5_spill] sm:$0xff] %v10810_v5  ;;  %vm315_vm0 = vcmp.ge.s32.totalorder %v10799_v1, %v10807_v4  ;;  %vm316_vm1 = vcmp.ge.s32.totalorder %v10804_v3, %v10807_v4  ;;  %v10832_v11 = vadd.s32 32, %v10807_v4  ;;  %vm317_vm2 = vcmp.ge.s32.totalorder %v10810_v5, %v10807_v4  ;;  %s11082_s30 = scalar_lea.vmem %s13308_s0, %s7813_s27  ;;  %s13287_s9 = scalar_lea.vmem %s13315_s7, %s7813_s27 }
  0x14   : > { %13405 = vst [vmem:[#allocation6_spill] sm:$0xff] %v10813_v6  ;;  %13406 = vst [vmem:[#allocation7_spill] sm:$0xff] %v10816_v7  ;;  %vm318_vm3 = vcmp.ge.s32.totalorder %v10813_v6, %v10807_v4  ;;  %vm319_vm4 = vcmp.ge.s32.totalorder %v10816_v7, %v10807_v4  ;;  %vm320_vm5 = vcmp.ge.s32.totalorder %v10819_v8, %v10807_v4  ;;  %v10867_v14 = vadd.s32 64, %v10799_v1 }
  0x15   : > { %13407 = vst [vmem:[#allocation8_spill] sm:$0xff] %v10819_v8  ;;  %13408 = vst [vmem:[#allocation9_spill] sm:$0xff] %v10822_v9  ;;  %vm332_vm7 = vcmp.lt.s32.totalorder %v10799_v1, %v10832_v11  ;;  %vm333_vm8 = vcmp.lt.s32.totalorder %v10804_v3, %v10832_v11  ;;  %vm334_vm9 = vcmp.lt.s32.totalorder %v10810_v5, %v10832_v11  ;;  %v10870_v15 = vadd.s32 72, %v10799_v1 }
  0x16   : > { %13409 = vst [vmem:[#allocation10_spill] sm:$0xff] %v10825_v10  ;;  %vm335_vm10 = vcmp.lt.s32.totalorder %v10813_v6, %v10832_v11  ;;  %vm348_vm11 = vmand %vm315_vm0, %vm332_vm7  ;;  %vm336_vm12 = vcmp.lt.s32.totalorder %v10816_v7, %v10832_v11  ;;  %vm337_vm13 = vcmp.lt.s32.totalorder %v10819_v8, %v10832_v11  ;;  %vm322_vm14 = vcmp.ge.s32.totalorder %v10825_v10, %v10807_v4 }
  0x17   : > { %vm338_vm15 = vcmp.lt.s32.totalorder %v10822_v9, %v10832_v11  ;;  %vm349_vm6 = vmand %vm316_vm1, %vm333_vm8  ;;  %v7571_v13 = vsel %vm348_vm11, 1.0, %v13331_v12  ;;  %vm339_vm0 = vcmp.lt.s32.totalorder %v10825_v10, %v10832_v11  ;;  %13410 = vst [vmem:[#allocation11_spill] sm:$0xff] %v10867_v14  ;;  %v10884_v19 = vadd.s32 80, %v10799_v1 }
  0x18   : > { %13411 = vst [vmem:[#allocation12_spill] sm:$0xff] %v10870_v15  ;;  %vm10876_vm7 = vmpackc.low %vm349_vm6, %vm348_vm11  ;;  %v7572_v17 = vsel %vm349_vm6, 1.0, %v13331_v12  ;;  %v10881_v18 = vsub.f32 %v7571_v13, %v7571_v13  ;;  %v10887_v20 = vadd.s32 88, %v10799_v1  ;;  %vm340_vm11 = vcmp.lt.s32.totalorder %v10867_v14, %v10832_v11 }
  0x19   : > { %13414 = vst [vmem:[#allocation13_spill] sm:$0xff] %v10884_v19  ;;  %9760 = vmatprep.subr.msk.bf16.mxu0 %vm10876_vm7, %v13328_v21  ;;  %vm350_vm1 = vmand %vm317_vm2, %vm334_vm9  ;;  %v10898_v22 = vsub.f32 %v7572_v17, %v7572_v17  ;;  %vm341_vm9 = vcmp.lt.s32.totalorder %v10870_v15, %v10832_v11  ;;  %vm325_vm8 = vcmp.ge.s32.totalorder %v10884_v19, %v10807_v4  ;;  %v10962_v34 = vadd.s32 96, %v10799_v1 }
  0x1a   : > { %13415 = vst [vmem:[#allocation14_spill] sm:$0xff] %v10887_v20  ;;  %9762 = vmatpush3.bf16.msk.msra.mxu0 %vm10876_vm7, %v13328_v21  ;;  %vm351_vm2 = vmand %vm318_vm3, %vm335_vm10  ;;  %v13327_v23 = vand.u32 4294901760, %v10881_v18  ;;  %v7573_v24 = vsel %vm350_vm1, 1.0, %v13331_v12  ;;  %vm326_vm3 = vcmp.ge.s32.totalorder %v10887_v20, %v10807_v4  ;;  %v10995_v43 = vadd.s32 104, %v10799_v1 }
  0x1b   : > { %vm10922_vm6 = vmpackc.low %vm351_vm2, %vm350_vm1  ;;  %v13326_v26 = vand.u32 4294901760, %v10898_v22  ;;  %v7574_v27 = vsel %vm351_vm2, 1.0, %v13331_v12  ;;  %v10928_v28 = vsub.f32 %v7573_v24, %v7573_v24  ;;  %vm342_vm1 = vcmp.lt.s32.totalorder %v10884_v19, %v10832_v11  ;;  %13418 = vst [vmem:[#allocation15_spill] sm:$0xff] %v10962_v34 }
  0x1c   : > { %9764 = vmatprep.subr.msk.bf16.mxu0 %vm10922_vm6, %v13328_v21  ;;  %vm352_vm10 = vmand %vm319_vm4, %vm336_vm12  ;;  %v694_v29 = vsub.f32 %v10881_v18, %v13327_v23  ;;  %v10944_v30 = vsub.f32 %v7574_v27, %v7574_v27  ;;  %vm343_vm2 = vcmp.lt.s32.totalorder %v10887_v20, %v10832_v11  ;;  %13422 = vst [vmem:[#allocation16_spill] sm:$0xff] %v10995_v43  ;;  %v290_v20 = vld [vmem:[%s11082_s30 + $0x18] sm:$0xff] }
  0x1d   : > { %vm353_vm4 = vmand %vm320_vm5, %vm337_vm13  ;;  %v701_v31 = vsub.f32 %v10898_v22, %v13326_v26  ;;  %v13324_v32 = vand.u32 4294901760, %v10928_v28  ;;  %v7575_v33 = vsel %vm352_vm10, 1.0, %v13331_v12  ;;  %vm13421_vm5 = vcmp.ge.s32.totalorder %v10822_v9, %v10807_v4 }
  0x1e   : > { %9766 = vmatpush3.bf16.msk.msra.mxu0 %vm10922_vm6, %v13328_v21  ;;  %vm10967_vm12 = vmpackc.low %vm353_vm4, %vm352_vm10  ;;  %v695_v36 = vand.u32 4294901760, %v694_v29  ;;  %v13322_v37 = vand.u32 4294901760, %v10944_v30  ;;  %v7576_v38 = vsel %vm353_vm4, 1.0, %v13331_v12  ;;  %v10973_v39 = vsub.f32 %v7575_v33, %v7575_v33 }
  0x1f   : > { %9768 = vmatprep.subr.msk.bf16.mxu0 %vm10967_vm12, %v13328_v21  ;;  %v702_v40 = vand.u32 4294901760, %v701_v31  ;;  %vm354_vm13 = vmand %vm13421_vm5, %vm338_vm15  ;;  %v708_v41 = vsub.f32 %v10928_v28, %v13324_v32  ;;  %v10992_v42 = vsub.f32 %v7576_v38, %v7576_v38  ;;  %vm327_vm15 = vcmp.ge.s32.totalorder %v10962_v34, %v10807_v4  ;;  %v13497_v38 = vld [vmem:[#allocation2_spill] sm:$0xff] }
  0x20   : > { %vm355_vm10 = vmand %vm322_vm14, %vm339_vm0  ;;  %v715_v44 = vsub.f32 %v10944_v30, %v13322_v37  ;;  %v13321_v45 = vand.u32 4294901760, %v10973_v39  ;;  %v7577_v46 = vsel %vm354_vm13, 1.0, %v13331_v12  ;;  %vm13425_vm14 = vcmp.ge.s32.totalorder %v10867_v14, %v10807_v4  ;;  %v11331_v14 = vld [vmem:[%s11082_s30 + $0x38] sm:$0xff] }
  0x21   : > { %v11010_v47 = vpack.c.bf16 %v702_v40, %v695_v36  ;;  %vm11012_vm4 = vmpackc.low %vm355_vm10, %vm354_vm13  ;;  %v709_v49 = vand.u32 4294901760, %v708_v41  ;;  %v13320_v50 = vand.u32 4294901760, %v10992_v42  ;;  %v7578_v51 = vsel %vm355_vm10, 1.0, %v13331_v12 }
  0x22   : > { %9770 = vmatpush3.bf16.msk.msra.mxu0 %vm10967_vm12, %v13328_v21  ;;  %v716_v52 = vand.u32 4294901760, %v715_v44  ;;  %vm356_vm0 = vmand %vm13425_vm14, %vm340_vm11  ;;  %v722_v53 = vsub.f32 %v10973_v39, %v13321_v45  ;;  %v11030_v54 = vsub.f32 %v7577_v46, %v7577_v46  ;;  %v11032_v55 = vsub.f32 %v7578_v51, %v7578_v51 }
  0x23   : > { %9984 = vmatprep.subr.bf16.mxu1 %v11010_v47  ;;  %9772 = vmatprep.subr.msk.bf16.mxu0 %vm11012_vm4, %v13328_v21  ;;  %vm13426_vm11 = vcmp.ge.s32.totalorder %v10870_v15, %v10807_v4  ;;  %v729_v56 = vsub.f32 %v10992_v42, %v13320_v50  ;;  %vm328_vm13 = vcmp.ge.s32.totalorder %v10995_v43, %v10807_v4  ;;  %v7579_v57 = vsel %vm356_vm0, 1.0, %v13331_v12 }
  0x24   : > { %vm357_vm5 = vmand %vm13426_vm11, %vm341_vm9  ;;  %vm344_vm10 = vcmp.lt.s32.totalorder %v10962_v34, %v10832_v11  ;;  %9986 = vmatpush3.bf16.msra.mxu1 %v11010_v47  ;;  %v11054_v58 = vpack.c.bf16 %v716_v52, %v709_v49  ;;  %v723_v60 = vand.u32 4294901760, %v722_v53  ;;  %v13319_v61 = vand.u32 4294901760, %v11030_v54  ;;  %v287_v53 = vld [vmem:[%s11082_s30] sm:$0xff] }
  0x25   : > { %vm11056_vm14 = vmpackc.low %vm357_vm5, %vm356_vm0  ;;  %v13318_v62 = vand.u32 4294901760, %v11032_v55  ;;  %v730_v63 = vand.u32 4294901760, %v729_v56  ;;  %vm345_vm0 = vcmp.lt.s32.totalorder %v10995_v43, %v10832_v11  ;;  %v7580_v13 = vsel %vm357_vm5, 1.0, %v13331_v12  ;;  %v11145_v56 = vld [vmem:[%s11082_s30 + $0x8] sm:$0xff] }
  0x26   : > { %vm11068_vm9 = vmand %vm325_vm8, %vm342_vm1  ;;  %v11075_v17 = vsub.f32 %v7579_v57, %v7579_v57  ;;  %9774 = vmatpush3.bf16.msk.msra.mxu0 %vm11012_vm4, %v13328_v21  ;;  %9988 = vmatprep.subr.bf16.mxu1 %v11054_v58  ;;  %v736_v27 = vsub.f32 %v11030_v54, %v13319_v61  ;;  %v11104_v31 = vsub.f32 %v7580_v13, %v7580_v13  ;;  %v11107_v33 = vadd.s32 112, %v10799_v1 }
  0x27   : > { %vm11094_vm8 = vmand %vm326_vm3, %vm343_vm2  ;;  %v743_v29 = vsub.f32 %v11032_v55, %v13318_v62  ;;  %9776 = vmatprep.subr.msk.bf16.mxu0 %vm11056_vm14, %v13328_v21  ;;  %v11112_v36 = vpack.c.bf16 %v730_v63, %v723_v60  ;;  %v11124_v41 = vadd.s32 120, %v10799_v1  ;;  %v7581_v44 = vsel %vm11068_vm9, 1.0, %v13331_v12 }
  0x28   : > { %13433 = vst [vmem:[#allocation17_spill] sm:$0xff] %v11107_v33  ;;  %vm11118_vm3 = vmpackc.low %vm11094_vm8, %vm11068_vm9  ;;  %v13317_v40 = vand.u32 4294901760, %v11075_v17  ;;  %9990 = vmatpush3.bf16.msra.mxu1 %v11054_v58  ;;  %v737_v46 = vand.u32 4294901760, %v736_v27  ;;  %v13316_v52 = vand.u32 4294901760, %v11104_v31  ;;  %vm329_vm2 = vcmp.ge.s32.totalorder %v11107_v33, %v10807_v4 }
  0x29   : > { %13436 = vst [vmem:[#allocation18_spill] sm:$0xff] %v11124_v41  ;;  %v744_v49 = vand.u32 4294901760, %v743_v29  ;;  %vm11136_vm1 = vmand %vm327_vm15, %vm344_vm10  ;;  %9992 = vmatprep.subr.bf16.mxu1 %v11112_v36  ;;  %vm330_vm11 = vcmp.ge.s32.totalorder %v11124_v41, %v10807_v4  ;;  %vm346_vm5 = vcmp.lt.s32.totalorder %v11107_v33, %v10832_v11  ;;  %vm347_vm10 = vcmp.lt.s32.totalorder %v11124_v41, %v10832_v11 }
  0x2a   : > { %vm11154_vm15 = vmand %vm328_vm13, %vm345_vm0  ;;  %v750_v60 = vsub.f32 %v11075_v17, %v13317_v40  ;;  %9778 = vmatpush3.bf16.msk.msra.mxu0 %vm11056_vm14, %v13328_v21  ;;  %v757_v0 = vsub.f32 %v11104_v31, %v13316_v52  ;;  %v7582_v13 = vsel %vm11094_vm8, 1.0, %v13331_v12  ;;  %v11178_v27 = vsub.f32 %v7581_v44, %v7581_v44 }
  0x2b   : > { %v11170_v63 = vpack.c.bf16 %v744_v49, %v737_v46  ;;  %9780 = vmatprep.subr.msk.bf16.mxu0 %vm11118_vm3, %v13328_v21  ;;  %vm11186_vm13 = vmand %vm329_vm2, %vm346_vm5  ;;  %v11190_v49 = vsub.f32 %v7582_v13, %v7582_v13  ;;  %v11192_v52 = vand.u32 4294901760, %v287_v53  ;;  %v11195_v24 = vand.u32 4294901760, %v11145_v56 }
  0x2c   : > { %v751_v29 = vand.u32 4294901760, %v750_v60  ;;  %9994 = vmatpush3.bf16.msra.mxu1 %v11112_v36  ;;  %vm11202_vm9 = vmpackc.low %vm11154_vm15, %vm11136_vm1  ;;  %v13443_v44 = vmov 0  ;;  %v758_v60 = vand.u32 4294901760, %v757_v0  ;;  %v13323_v40 = vand.u32 4294901760, %v11178_v27 }
  0x2d   : > { %v13444_v44 = vsel %vm11202_vm9, 4294967295, %v13443_v44  ;;  %v7583_v13 = vsel %vm11136_vm1, 1.0, %v13331_v12  ;;  %v7584_v62 = vsel %vm11154_vm15, 1.0, %v13331_v12  ;;  %9996 = vmatprep.subr.bf16.mxu1 %v11170_v63  ;;  %vm11220_vm0 = vmand %vm330_vm11, %vm347_vm10  ;;  %v13325_v61 = vand.u32 4294901760, %v11190_v49 }
  0x2e   : > { %13445 = vst [vmem:[#allocation19_spill] sm:$0xff] %v13444_v44  ;;  %v11226_v51 = vsub.f32 %v287_v53, %v11192_v52  ;;  %v11230_v57 = vsub.f32 %v11145_v56, %v11195_v24  ;;  %v11232_v50 = vsub.f32 %v7583_v13, %v7583_v13  ;;  %9782 = vmatpush3.bf16.msk.msra.mxu0 %vm11118_vm3, %v13328_v21  ;;  %v7585_v37 = vsel %vm11186_vm13, 1.0, %v13331_v12  ;;  %vm11261_vm8 = vmpackc.low %vm11220_vm0, %vm11186_vm13 }
  0x2f   : > { %v11237_v4 = vpack.c.bf16 %v758_v60, %v751_v29  ;;  %v764_v11 = vsub.f32 %v11178_v27, %v13323_v40  ;;  %v11242_v45 = vsub.f32 %v7584_v62, %v7584_v62  ;;  %9784 = vmatprep.subr.msk.bf16.mxu0 %vm11202_vm9, %v13328_v21  ;;  %v771_v13 = vsub.f32 %v11190_v49, %v13325_v61 }
  0x30   : > { %13448 = vst [vmem:[#allocation20_spill] sm:$0xff] %v11230_v57  ;;  %v13333_v29 = vand.u32 4294901760, %v11226_v51  ;;  %v13334_v60 = vand.u32 4294901760, %v11230_v57  ;;  %9998 = vmatpush3.bf16.msra.mxu1 %v11170_v63  ;;  %v13449_v62 = vmov 0  ;;  %v7586_v26 = vsel %vm11220_vm0, 1.0, %v13331_v12 }
  0x31   : > { %v13450_v62 = vsel %vm11261_vm8, 4294967295, %v13449_v62  ;;  %v765_v32 = vand.u32 4294901760, %v764_v11  ;;  %v11269_v23 = vsub.f32 %v7585_v37, %v7585_v37  ;;  %10000 = vmatprep.subr.bf16.mxu1 %v11237_v4  ;;  %v772_v21 = vand.u32 4294901760, %v771_v13 }
  0x32   : > { %13451 = vst [vmem:[#allocation21_spill] sm:$0xff] %v13450_v62  ;;  %v613_v46 = vsub.f32 %v11226_v51, %v13333_v29  ;;  %v623_v40 = vsub.f32 %v11230_v57, %v13334_v60  ;;  %v13452_v11 = vand.u32 4294901760, %v11232_v50  ;;  %v13453_v41 = vmov 1.0|1.0   ;;  %v289_v60 = vld [vmem:[%s11082_s30 + $0x10] sm:$0xff] }
  0x33   : > { %9786 = vmatpush3.bf16.msk.msra.mxu0 %vm11202_vm9, %v13453_v41  ;;  %v13454_v37 = vand.u32 4294901760, %v11242_v45  ;;  %v13339_v13 = vand.u32 4294901760, %v11269_v23  ;;  %v11288_v12 = vsub.f32 %v7586_v26, %v7586_v26  ;;  %v11290_v29 = vmul.f32 %v287_v53, %v287_v53 }
  0x34   : > { %v778_v61 = vsub.f32 %v11232_v50, %v13452_v11  ;;  %9788 = vmatprep.subr.msk.bf16.mxu0 %vm11261_vm8, %v13453_v41  ;;  %v11296_v11 = vpack.c.bf16 %v772_v21, %v765_v32  ;;  %v614_v33 = vand.u32 4294901760, %v613_v46  ;;  %10002 = vmatpush3.bf16.msra.mxu1 %v11237_v4  ;;  %v624_v21 = vand.u32 4294901760, %v623_v40  ;;  %v11312_v46 = vld [vmem:[%s11082_s30 + $0x28] sm:$0xff] }
  0x35   : > { %v785_v0 = vsub.f32 %v11242_v45, %v13454_v37  ;;  %v792_v26 = vsub.f32 %v11269_v23, %v13339_v13  ;;  %v13343_v53 = vand.u32 4294901760, %v11288_v12  ;;  %v11304_v34 = vand.u32 4294901760, %v11290_v29 }
  0x36   : > { %v779_v43 = vand.u32 4294901760, %v778_v61  ;;  %10004 = vmatprep.subr.bf16.mxu1 %v11296_v11  ;;  %8525 = vmatprep.mubr.f32.mxu0 %v614_v33  ;;  %v11308_v32 = vand.u32 4294901760, %v289_v60  ;;  %v291_v61 = vld [vmem:[%s11082_s30 + $0x20] sm:$0xff]  ;;  %v293_v33 = vld [vmem:[%s11082_s30 + $0x30] sm:$0xff]  ;;  %v11328_v15 = vand.u32 4294901760, %v290_v20 }
  0x37   : > { %v786_v37 = vand.u32 4294901760, %v785_v0  ;;  %9790 = vmatpush3.bf16.msk.msra.mxu0 %vm11261_vm8, %v13453_v41  ;;  %v793_v13 = vand.u32 4294901760, %v792_v26  ;;  %v799_v19 = vsub.f32 %v11288_v12, %v13343_v53  ;;  %8833 = vmatprep.mubr.f32.mxu1 %v11304_v34  ;;  %v11337_v26 = vand.u32 4294901760, %v11312_v46 }
  0x38   : > { %9792 = vmatprep.subr.bf16.mxu0 %v11010_v47  ;;  %v11326_v40 = vsub.f32 %v289_v60, %v11308_v32  ;;  %10006 = vmatpush3.bf16.msra.mxu1 %v11296_v11  ;;  %v11342_v10 = vsub.f32 %v290_v20, %v11328_v15  ;;  %v11344_v9 = vand.u32 4294901760, %v293_v33  ;;  %v11362_v53 = vmul.f32 %v11145_v56, %v11145_v56 }
  0x39   : > { %v11317_v0 = vpack.c.bf16 %v786_v37, %v779_v43  ;;  %v800_v43 = vand.u32 4294901760, %v799_v19  ;;  %v11334_v37 = vand.u32 4294901760, %v291_v61  ;;  %v11354_v7 = vsub.f32 %v11312_v46, %v11337_v26 }
  0x3a   : > { %13455 = vst [vmem:[#allocation22_spill] sm:$0xff] %v11326_v40  ;;  %8526 = vmatmul.mubr.f32.vlgmr.msra.gmra.mrb[0].mxu0 %v624_v21  ;;  %13456 = vst [vmem:[#allocation23_spill] sm:$0xff] %v11342_v10  ;;  %v11357_v21 = vand.u32 4294901760, %v11331_v14  ;;  %v11369_v6 = vsub.f32 %v293_v33, %v11344_v9  ;;  %v11378_v56 = vmul.f32 %v289_v60, %v289_v60  ;;  %v13461_v1 = vand.u32 4294901760, %v11342_v10 }
  0x3b   : > { %10008 = vmatprep.subr.bf16.mxu1 %v11317_v0  ;;  %9794 = vmatpush3.bf16.msra.mxu0 %v11010_v47  ;;  %v11347_v8 = vpack.c.bf16 %v800_v43, %v793_v13  ;;  %v11350_v19 = vsub.f32 %v291_v61, %v11334_v37  ;;  %13457 = vst [vmem:[#allocation24_spill] sm:$0xff] %v11354_v7  ;;  %v13458_v47 = vand.u32 4294901760, %v11326_v40 }
  0x3c   : > { %9796 = vmatprep.subr.bf16.mxu0 %v11054_v58  ;;  %13459 = vst [vmem:[#allocation25_spill] sm:$0xff] %v11369_v6  ;;  %10010 = vmatpush3.bf16.msra.mxu1 %v11317_v0  ;;  %v11376_v2 = vsub.f32 %v11331_v14, %v11357_v21  ;;  %v643_v62 = vsub.f32 %v11342_v10, %v13461_v1  ;;  %v13372_v5 = vand.u32 4294901760, %v11369_v6 }
  0x3d   : > { %v633_v13 = vsub.f32 %v11326_v40, %v13458_v47  ;;  %10012 = vmatprep.subr.bf16.mxu1 %v11347_v8  ;;  %v11383_v47 = vpack.c.bf16 %v10898_v22, %v10881_v18  ;;  %v13462_v3 = vand.u32 4294901760, %v11350_v19  ;;  %v13463_v40 = vand.u32 4294901760, %v11354_v7 }
  0x3e   : > { %13460 = vst [vmem:[#allocation26_spill] sm:$0xff] %v11376_v2  ;;  %v644_v1 = vand.u32 4294901760, %v643_v62  ;;  %v11404_v10 = vmul.f32 %v290_v20, %v290_v20  ;;  %v11410_v57 = vmul.f32 %v291_v61, %v291_v61 }
  0x3f   : > { %v634_v43 = vand.u32 4294901760, %v633_v13  ;;  %9798 = vmatpush3.bf16.msra.mxu0 %v11054_v58  ;;  %v653_v60 = vsub.f32 %v11350_v19, %v13462_v3  ;;  %v663_v44 = vsub.f32 %v11354_v7, %v13463_v40  ;;  %v11399_v13 = vand.u32 4294901760, %v11362_v53 }
  0x40   : > { %9800 = vmatprep.subr.bf16.mxu0 %v11112_v36  ;;  %v673_v58 = vsub.f32 %v11369_v6, %v13372_v5  ;;  %10014 = vmatpush3.bf16.msra.mxu1 %v11347_v8  ;;  %v11408_v40 = vand.u32 4294901760, %v11378_v56  ;;  %v13464_v5 = vand.u32 4294901760, %v11376_v2  ;;  %v11424_v61 = vand.u32 4294901760, %v11404_v10 }
  0x41   : > { %8528 = vmatprep.mubr.f32.mxu0 %v634_v43  ;;  %v654_v3 = vand.u32 4294901760, %v653_v60  ;;  %10016 = vmatprep.subr.bf16.mxu1 %v11383_v47  ;;  %v11415_v43 = vpack.c.bf16 %v10944_v30, %v10928_v28  ;;  %v664_v62 = vand.u32 4294901760, %v663_v44  ;;  %v11428_v6 = vmul.f32 %v11312_v46, %v11312_v46 }
  0x42   : > { %8529 = vmatmul.mubr.f32.gmra.mrb[2].mxu0 %v644_v1  ;;  %v683_v20 = vsub.f32 %v11376_v2, %v13464_v5  ;;  %v674_v60 = vand.u32 4294901760, %v673_v58  ;;  %v11433_v5 = vand.u32 4294901760, %v11410_v57  ;;  %v13465_v44 = vand.u32 4294901760, %v10881_v18 }
  0x43   : > { %9802 = vmatpush3.bf16.msra.mxu0 %v11112_v36  ;;  %8531 = vmatprep.mubr.f32.mxu0 %v654_v3  ;;  %v11435_v36 = vmul.f32 %v293_v33, %v293_v33  ;;  %v13466_v1 = vand.u32 4294901760, %v10898_v22  ;;  %v11446_v46 = vpack.c.bf16 %v10992_v42, %v10973_v39  ;;  %v13467_v2 = vand.u32 4294901760, %v10928_v28 }
  0x44   : > { %8834 = vmatmul.mubr.f32.vlgmr.msra.gmra.mrb[0].mxu1 %v11399_v13  ;;  %9804 = vmatprep.subr.bf16.mxu0 %v11170_v63  ;;  %v684_v3 = vand.u32 4294901760, %v683_v20  ;;  %v13468_v7 = vand.u32 4294901760, %v10944_v30  ;;  %v13469_v18 = vand.u32 4294901760, %v10973_v39  ;;  %v13470_v22 = vand.u32 4294901760, %v10992_v42 }
  0x45   : > { %10018 = vmatpush3.bf16.msra.mxu1 %v11383_v47  ;;  %8836 = vmatprep.mubr.f32.mxu1 %v11408_v40  ;;  %v11441_v58 = vpack.c.bf16 %v13466_v1, %v13465_v44  ;;  %v13471_v1 = vand.u32 4294901760, %v11030_v54  ;;  %v13473_v28 = vand.u32 4294901760, %v11075_v17  ;;  %v13474_v30 = vand.u32 4294901760, %v11104_v31 }
  0x46   : > { %10020 = vmatprep.subr.bf16.mxu1 %v11415_v43  ;;  %8532 = vmatmul.mubr.f32.gmra.mrb[4].mxu0 %v664_v62  ;;  %v11452_v33 = vpack.c.bf16 %v13468_v7, %v13467_v2  ;;  %v11459_v44 = vpack.c.bf16 %v13470_v22, %v13469_v18  ;;  %v13472_v62 = vand.u32 4294901760, %v11032_v55  ;;  %v11470_v2 = vand.u32 4294901760, %v11428_v6 }
  0x47   : > { %9806 = vmatpush3.bf16.msra.mxu0 %v11170_v63  ;;  %8534 = vmatprep.mubr.f32.mxu0 %v674_v60  ;;  %v11474_v7 = vmul.f32 %v11331_v14, %v11331_v14  ;;  %v11480_v39 = vpack.c.bf16 %v13474_v30, %v13473_v28  ;;  %v13475_v42 = vand.u32 4294901760, %v11178_v27  ;;  %v13476_v63 = vand.u32 4294901760, %v11190_v49 }
  0x48   : > { %v11465_v20 = vpack.c.bf16 %v13472_v62, %v13471_v1  ;;  %9808 = vmatprep.subr.bf16.mxu0 %v11237_v4  ;;  %8837 = vmatmul.mubr.f32.gmra.mrb[2].mxu1 %v11424_v61  ;;  %v11491_v18 = vand.u32 4294901760, %v11435_v36  ;;  %v13477_v14 = vand.u32 4294901760, %v11232_v50  ;;  %v13478_v22 = vand.u32 4294901760, %v11242_v45 }
  0x49   : > { %v11486_v60 = vpack.c.bf16 %v13476_v63, %v13475_v42  ;;  %10022 = vmatpush3.bf16.msra.mxu1 %v11415_v43  ;;  %8839 = vmatprep.mubr.f32.mxu1 %v11433_v5  ;;  %v13479_v62 = vand.u32 4294901760, %v11269_v23  ;;  %v13480_v28 = vand.u32 4294901760, %v11288_v12  ;;  %v9835_v42 = vpack.c.bf16 %v11032_v55, %v11030_v54 }
  0x4a   : > { %v11497_v1 = vpack.c.bf16 %v13478_v22, %v13477_v14  ;;  %10024 = vmatprep.subr.bf16.mxu1 %v11446_v46  ;;  %8535 = vmatmul.mubr.f32.gmra.mrb[6].mxu0 %v684_v3  ;;  %v11513_v63 = vand.u32 4294901760, %v11474_v7  ;;  %v11519_v14 = vsub.f32 %v11290_v29, %v11304_v34  ;;  %v9839_v54 = vpack.c.bf16 %v11104_v31, %v11075_v17  ;;  %v13485_v22 = vld [vmem:[#allocation23_spill] sm:$0xff] }
  0x4b   : > { %v11503_v30 = vpack.c.bf16 %v13480_v28, %v13479_v62  ;;  %9810 = vmatpush3.bf16.msra.mxu0 %v11237_v4  ;;  %8569 = vmatprep.mubr.f32.mxu0 %v11192_v52  ;;  %v9843_v55 = vpack.c.bf16 %v11190_v49, %v11178_v27  ;;  %v9847_v17 = vpack.c.bf16 %v11242_v45, %v11232_v50 }
  0x4c   : > { %9812 = vmatprep.subr.bf16.mxu0 %v11296_v11  ;;  %8840 = vmatmul.mubr.f32.gmra.mrb[4].mxu1 %v11470_v2  ;;  %v9851_v31 = vpack.c.bf16 %v11288_v12, %v11269_v23  ;;  %v11551_v12 = vsub.f32 %v11378_v56, %v11408_v40  ;;  %v11562_v23 = vsub.f32 %v11404_v10, %v11424_v61  ;;  %v1562_v27 = vand.u32 4294901760, %v11519_v14 }
  0x4d   : > { %10026 = vmatpush3.bf16.msra.mxu1 %v11446_v46  ;;  %8842 = vmatprep.mubr.f32.mxu1 %v11491_v18  ;;  %v11570_v45 = vsub.f32 %v11410_v57, %v11433_v5  ;;  %v11580_v10 = vsub.f32 %v11428_v6, %v11470_v2  ;;  %v11588_v50 = vsub.f32 %v11435_v36, %v11491_v18 }
  0x4e   : > { %10028 = vmatprep.subr.bf16.mxu1 %v9835_v42  ;;  %v11596_v6 = vsub.f32 %v11474_v7, %v11513_v63  ;;  %v11618_v57 = vsub.f32 %v11519_v14, %v1562_v27  ;;  %v1582_v29 = vand.u32 4294901760, %v11551_v12 }
  0x4f   : > { %9814 = vmatpush3.bf16.msra.mxu0 %v11296_v11  ;;  %v1592_v11 = vand.u32 4294901760, %v11562_v23  ;;  %v1602_v36 = vand.u32 4294901760, %v11570_v45  ;;  %v1622_v28 = vand.u32 4294901760, %v11588_v50 }
  0x50   : > { %9816 = vmatprep.subr.bf16.mxu0 %v11317_v0  ;;  %8843 = vmatmul.mubr.f32.gmra.mrb[6].mxu1 %v11513_v63 }
  0x51   : > { %10030 = vmatpush3.bf16.msra.mxu1 %v9835_v42  ;;  %8877 = vmatprep.mubr.f32.mxu1 %v11519_v14  ;;  %v11657_v3 = vsub.f32 %v11570_v45, %v1602_v36  ;;  %v11679_v14 = vsub.f32 %v11588_v50, %v1622_v28 }
  0x52   : > { %10032 = vmatprep.subr.bf16.mxu1 %v9839_v54 }
  0x53   : > { %9818 = vmatpush3.bf16.msra.mxu0 %v11317_v0  ;;  %v13481_v0 = vld [vmem:[#allocation20_spill] sm:$0xff]  ;;  %v1624_v48 = vand.u32 4294901760, %v11679_v14 }
  0x54   : > { %9820 = vmatprep.subr.bf16.mxu0 %v11347_v8 }
  0x55   : > { %10034 = vmatpush3.bf16.msra.mxu1 %v9839_v54 }
  0x56   : > { %10036 = vmatprep.subr.bf16.mxu1 %v9843_v55 }
  0x57   : > { %9822 = vmatpush3.bf16.msra.mxu0 %v11347_v8  ;;  %v11546_v8 = vsub.f32 %v11362_v53, %v11399_v13  ;;  %v11635_v53 = vsub.f32 %v11551_v12, %v1582_v29 }
  0x58   : > { %9824 = vmatprep.subr.bf16.mxu0 %v11383_v47 }
  0x59   : > { %10038 = vmatpush3.bf16.msra.mxu1 %v9843_v55  ;;  %v1572_v49 = vand.u32 4294901760, %v11546_v8  ;;  %v1584_v16 = vand.u32 4294901760, %v11635_v53 }
  0x5a   : > { %8570 = vmatmul.mubr.f32.vlgmr.msra.gmra.mrb[0].mxu0 %v11195_v24  ;;  %10040 = vmatprep.subr.bf16.mxu1 %v9847_v17 }
  0x5b   : > { %9826 = vmatpush3.bf16.msra.mxu0 %v11383_v47  ;;  %8572 = vmatprep.mubr.f32.mxu0 %v11308_v32  ;;  %v11624_v4 = vsub.f32 %v11546_v8, %v1572_v49  ;;  %v11642_v47 = vsub.f32 %v11562_v23, %v1592_v11 }
  0x5c   : > { %9828 = vmatprep.subr.bf16.mxu0 %v11415_v43 }
  0x5d   : > { %10042 = vmatpush3.bf16.msra.mxu1 %v9847_v17  ;;  %v1594_v25 = vand.u32 4294901760, %v11642_v47 }
  0x5e   : > { %10044 = vmatprep.subr.bf16.mxu1 %v9851_v31  ;;  %8573 = vmatmul.mubr.f32.gmra.mrb[2].mxu0 %v11328_v15 }
  0x5f   : > { %9830 = vmatpush3.bf16.msra.mxu0 %v11415_v43  ;;  %8575 = vmatprep.mubr.f32.mxu0 %v11334_v37  ;;  %v13483_v43 = vld [vmem:[#allocation22_spill] sm:$0xff] }
  0x60   : > { %9832 = vmatprep.subr.bf16.mxu0 %v11446_v46 }
  0x61   : > { %10046 = vmatpush3.bf16.msra.mxu1 %v9851_v31 }
  0x62   : > { %10048 = vmatprep.subr.msk.bf16.mxu1 %vm10876_vm7, %v13453_v41  ;;  %8576 = vmatmul.mubr.f32.gmra.mrb[4].mxu0 %v11337_v26 }
  0x63   : > { %9834 = vmatpush3.bf16.msra.mxu0 %v11446_v46  ;;  %8578 = vmatprep.mubr.f32.mxu0 %v11344_v9  ;;  %v1612_v46 = vand.u32 4294901760, %v11580_v10 }
  0x64   : > { %8878 = vmatmul.mubr.f32.vlgmr.msra.gmra.mrb[0].mxu1 %v11546_v8  ;;  %9836 = vmatprep.subr.bf16.mxu0 %v9835_v42  ;;  %v13489_v8 = vand.u32 4294901760, %v11226_v51 }
  0x65   : > { %10050 = vmatpush3.bf16.msk.msra.mxu1 %vm10876_vm7, %v13453_v41  ;;  %8880 = vmatprep.mubr.f32.mxu1 %v11551_v12  ;;  %v11664_v62 = vsub.f32 %v11580_v10, %v1612_v46  ;;  %v13491_v12 = vand.u32 4294901760, %v13483_v43 }
  0x66   : > { %10052 = vmatprep.subr.msk.bf16.mxu1 %vm10922_vm6, %v13453_v41  ;;  %8579 = vmatmul.mubr.f32.gmra.mrb[6].mxu0 %v11357_v21 }
  0x67   : > { %9838 = vmatpush3.bf16.msra.mxu0 %v9835_v42  ;;  %8613 = vmatprep.mubr.f32.mxu0 %v11226_v51  ;;  %v1632_v42 = vand.u32 4294901760, %v11596_v6  ;;  %v13490_v51 = vand.u32 4294901760, %v13481_v0  ;;  %v1614_v35 = vand.u32 4294901760, %v11664_v62 }
  0x68   : > { %9840 = vmatprep.subr.bf16.mxu0 %v9839_v54  ;;  %8881 = vmatmul.mubr.f32.gmra.mrb[2].mxu1 %v11562_v23  ;;  %v13492_v23 = vand.u32 4294901760, %v13485_v22 }
  0x69   : > { %10054 = vmatpush3.bf16.msk.msra.mxu1 %vm10922_vm6, %v13453_v41  ;;  %8883 = vmatprep.mubr.f32.mxu1 %v11570_v45  ;;  %v13493_v45 = vand.u32 4294901760, %v11350_v19 }
  0x6a   : > { %10056 = vmatprep.subr.msk.bf16.mxu1 %vm10967_vm12, %v13453_v41 }
  0x6b   : > { %9842 = vmatpush3.bf16.msra.mxu0 %v9839_v54  ;;  %v13486_v54 = vld [vmem:[#allocation24_spill] sm:$0xff] }
  0x6c   : > { %9844 = vmatprep.subr.bf16.mxu0 %v9843_v55  ;;  %8884 = vmatmul.mubr.f32.gmra.mrb[4].mxu1 %v11580_v10 }
  0x6d   : > { %10058 = vmatpush3.bf16.msk.msra.mxu1 %vm10967_vm12, %v13453_v41  ;;  %8886 = vmatprep.mubr.f32.mxu1 %v11588_v50 }
  0x6e   : > { %10060 = vmatprep.subr.msk.bf16.mxu1 %vm11012_vm4, %v13453_v41 }
  0x6f   : > { %9846 = vmatpush3.bf16.msra.mxu0 %v9843_v55  ;;  %v11684_v55 = vsub.f32 %v11596_v6, %v1632_v42 }
  0x70   : > { %9848 = vmatprep.subr.bf16.mxu0 %v9847_v17  ;;  %8887 = vmatmul.mubr.f32.gmra.mrb[6].mxu1 %v11596_v6 }
  0x71   : > { %10062 = vmatpush3.bf16.msk.msra.mxu1 %vm11012_vm4, %v13453_v41  ;;  %8921 = vmatprep.mubr.f32.mxu1 %v1562_v27  ;;  %v1634_v59 = vand.u32 4294901760, %v11684_v55 }
  0x72   : > { %10064 = vmatprep.subr.msk.bf16.mxu1 %vm11056_vm14, %v13453_v41 }
  0x73   : > { %9850 = vmatpush3.bf16.msra.mxu0 %v9847_v17  ;;  %v13487_v17 = vld [vmem:[#allocation25_spill] sm:$0xff] }
  0x74   : > { %9852 = vmatprep.subr.bf16.mxu0 %v9851_v31  ;;  %v13495_v10 = vand.u32 4294901760, %v13487_v17 }
  0x75   : > { %10066 = vmatpush3.bf16.msk.msra.mxu1 %vm11056_vm14, %v13453_v41 }
  0x76   : > { %10068 = vmatprep.subr.msk.bf16.mxu1 %vm11118_vm3, %v13453_v41 }
  0x77   : > { %9854 = vmatpush3.bf16.msra.mxu0 %v9851_v31  ;;  %v13488_v31 = vld [vmem:[#allocation26_spill] sm:$0xff] }
  0x78   : > { %9856 = vmatprep.subr.msk.bf16.mxu0 %vm10876_vm7, %v13453_v41 }
  0x79   : > { %10070 = vmatpush3.bf16.msk.msra.mxu1 %vm11118_vm3, %v13453_v41 }
  0x7a   : > { %8614 = vmatmul.mubr.f32.vlgmr.msra.gmra.mrb[0].mxu0 %v13481_v0  ;;  %10072 = vmatprep.subr.msk.bf16.mxu1 %vm11202_vm9, %v13453_v41 }
  0x7b   : > { %9858 = vmatpush3.bf16.msk.msra.mxu0 %vm10876_vm7, %v13453_v41  ;;  %8616 = vmatprep.mubr.f32.mxu0 %v13483_v43 }
  0x7c   : > { %9860 = vmatprep.subr.msk.bf16.mxu0 %vm10922_vm6, %v13453_v41 }
  0x7d   : > { %10074 = vmatpush3.bf16.msk.msra.mxu1 %vm11202_vm9, %v13453_v41 }
  0x7e   : > { %10076 = vmatprep.subr.msk.bf16.mxu1 %vm11261_vm8, %v13453_v41  ;;  %8617 = vmatmul.mubr.f32.gmra.mrb[2].mxu0 %v13485_v22 }
  0x7f   : > { %9862 = vmatpush3.bf16.msk.msra.mxu0 %vm10922_vm6, %v13453_v41  ;;  %8619 = vmatprep.mubr.f32.mxu0 %v11350_v19  ;;  %v13496_v19 = vand.u32 4294901760, %v13488_v31 }
  0x80   : > { %9864 = vmatprep.subr.msk.bf16.mxu0 %vm10967_vm12, %v13453_v41 }
  0x81   : > { %10078 = vmatpush3.bf16.msk.msra.mxu1 %vm11261_vm8, %v13453_v41 }
  0x82   : > { %10080 = vmatprep.subr.bf16.mxu1 %v11441_v58  ;;  %8620 = vmatmul.mubr.f32.gmra.mrb[4].mxu0 %v13486_v54 }
  0x83   : > { %9866 = vmatpush3.bf16.msk.msra.mxu0 %vm10967_vm12, %v13453_v41  ;;  %8622 = vmatprep.mubr.f32.mxu0 %v13487_v17 }
  0x84   : > { %8922 = vmatmul.mubr.f32.vlgmr.msra.gmra.mrb[0].mxu1 %v1572_v49  ;;  %9868 = vmatprep.subr.msk.bf16.mxu0 %vm11012_vm4, %v13453_v41 }
  0x85   : > { %10082 = vmatpush3.bf16.msra.mxu1 %v11441_v58  ;;  %8924 = vmatprep.mubr.f32.mxu1 %v1582_v29 }
  0x86   : > { %10084 = vmatprep.subr.bf16.mxu1 %v11452_v33  ;;  %8623 = vmatmul.mubr.f32.gmra.mrb[6].mxu0 %v13488_v31 }
  0x87   : > { %9870 = vmatpush3.bf16.msk.msra.mxu0 %vm11012_vm4, %v13453_v41  ;;  %8657 = vmatprep.mubr.f32.mxu0 %v13489_v8 }
  0x88   : > { %9872 = vmatprep.subr.msk.bf16.mxu0 %vm11056_vm14, %v13453_v41  ;;  %8925 = vmatmul.mubr.f32.gmra.mrb[2].mxu1 %v1592_v11 }
  0x89   : > { %10086 = vmatpush3.bf16.msra.mxu1 %v11452_v33  ;;  %8927 = vmatprep.mubr.f32.mxu1 %v1602_v36 }
  0x8a   : > { %10088 = vmatprep.subr.bf16.mxu1 %v11459_v44 }
  0x8b   : > { %9874 = vmatpush3.bf16.msk.msra.mxu0 %vm11056_vm14, %v13453_v41 }
  0x8c   : > { %9876 = vmatprep.subr.msk.bf16.mxu0 %vm11118_vm3, %v13453_v41  ;;  %8928 = vmatmul.mubr.f32.gmra.mrb[4].mxu1 %v1612_v46 }
  0x8d   : > { %10090 = vmatpush3.bf16.msra.mxu1 %v11459_v44  ;;  %8930 = vmatprep.mubr.f32.mxu1 %v1622_v28 }
  0x8e   : > { %10092 = vmatprep.subr.bf16.mxu1 %v11465_v20 }
  0x8f   : > { %9878 = vmatpush3.bf16.msk.msra.mxu0 %vm11118_vm3, %v13453_v41 }
  0x90   : > { %9880 = vmatprep.subr.msk.bf16.mxu0 %vm11202_vm9, %v13453_v41  ;;  %8931 = vmatmul.mubr.f32.gmra.mrb[6].mxu1 %v1632_v42 }
  0x91   : > { %10094 = vmatpush3.bf16.msra.mxu1 %v11465_v20  ;;  %8965 = vmatprep.mubr.f32.mxu1 %v11304_v34 }
  0x92   : > { %10096 = vmatprep.subr.bf16.mxu1 %v11480_v39 }
  0x93   : > { %9882 = vmatpush3.bf16.msk.msra.mxu0 %vm11202_vm9, %v13453_v41 }
  0x94   : > { %9884 = vmatprep.subr.msk.bf16.mxu0 %vm11261_vm8, %v13453_v41 }
  0x95   : > { %10098 = vmatpush3.bf16.msra.mxu1 %v11480_v39 }
  0x96   : > { %10100 = vmatprep.subr.bf16.mxu1 %v11486_v60 }
  0x97   : > { %9886 = vmatpush3.bf16.msk.msra.mxu0 %vm11261_vm8, %v13453_v41 }
  0x98   : > { %9888 = vmatprep.subr.bf16.mxu0 %v11441_v58 }
  0x99   : > { %10102 = vmatpush3.bf16.msra.mxu1 %v11486_v60 }
  0x9a   : > { %8658 = vmatmul.mubr.f32.vlgmr.msra.gmra.mrb[0].mxu0 %v13490_v51  ;;  %10104 = vmatprep.subr.bf16.mxu1 %v11497_v1 }
  0x9b   : > { %9890 = vmatpush3.bf16.msra.mxu0 %v11441_v58  ;;  %8660 = vmatprep.mubr.f32.mxu0 %v13491_v12  ;;  %v13494_v58 = vand.u32 4294901760, %v13486_v54 }
  0x9c   : > { %9892 = vmatprep.subr.bf16.mxu0 %v11452_v33 }
  0x9d   : > { %10106 = vmatpush3.bf16.msra.mxu1 %v11497_v1 }
  0x9e   : > { %10108 = vmatprep.subr.bf16.mxu1 %v11503_v30  ;;  %8661 = vmatmul.mubr.f32.gmra.mrb[2].mxu0 %v13492_v23 }
  0x9f   : > { %9894 = vmatpush3.bf16.msra.mxu0 %v11452_v33  ;;  %8663 = vmatprep.mubr.f32.mxu0 %v13493_v45 }
  0xa0   : > { %9896 = vmatprep.subr.bf16.mxu0 %v11459_v44 }
  0xa1   : > { %10110 = vmatpush3.bf16.msra.mxu1 %v11503_v30 }
  0xa2   : > { %10112 = vmatprep.subr.msk.bf16.mxu1 %vm10876_vm7, %v13453_v41  ;;  %8664 = vmatmul.mubr.f32.gmra.mrb[4].mxu0 %v13494_v58 }
  0xa3   : > { %9898 = vmatpush3.bf16.msra.mxu0 %v11459_v44  ;;  %8666 = vmatprep.mubr.f32.mxu0 %v13495_v10 }
  0xa4   : > { %8966 = vmatmul.mubr.f32.vlgmr.msra.gmra.mrb[0].mxu1 %v11399_v13  ;;  %9900 = vmatprep.subr.bf16.mxu0 %v11465_v20 }
  0xa5   : > { %10114 = vmatpush3.bf16.msk.msra.mxu1 %vm10876_vm7, %v13453_v41  ;;  %8968 = vmatprep.mubr.f32.mxu1 %v11408_v40 }
  0xa6   : > { %10116 = vmatprep.subr.msk.bf16.mxu1 %vm10922_vm6, %v13453_v41  ;;  %8667 = vmatmul.mubr.f32.gmra.mrb[6].mxu0 %v13496_v19 }
  0xa7   : > { %9902 = vmatpush3.bf16.msra.mxu0 %v11465_v20  ;;  %8701 = vmatprep.mubr.f32.mxu0 %v11192_v52 }
  0xa8   : > { %9904 = vmatprep.subr.bf16.mxu0 %v11480_v39  ;;  %8969 = vmatmul.mubr.f32.gmra.mrb[2].mxu1 %v11424_v61 }
  0xa9   : > { %10118 = vmatpush3.bf16.msk.msra.mxu1 %vm10922_vm6, %v13453_v41  ;;  %8971 = vmatprep.mubr.f32.mxu1 %v11433_v5 }
  0xaa   : > { %10120 = vmatprep.subr.msk.bf16.mxu1 %vm10967_vm12, %v13453_v41 }
  0xab   : > { %9906 = vmatpush3.bf16.msra.mxu0 %v11480_v39 }
  0xac   : > { %9908 = vmatprep.subr.bf16.mxu0 %v11486_v60  ;;  %8972 = vmatmul.mubr.f32.gmra.mrb[4].mxu1 %v11470_v2 }
  0xad   : > { %10122 = vmatpush3.bf16.msk.msra.mxu1 %vm10967_vm12, %v13453_v41  ;;  %8974 = vmatprep.mubr.f32.mxu1 %v11491_v18 }
  0xae   : > { %10124 = vmatprep.subr.msk.bf16.mxu1 %vm11012_vm4, %v13453_v41 }
  0xaf   : > { %9910 = vmatpush3.bf16.msra.mxu0 %v11486_v60 }
  0xb0   : > { %9912 = vmatprep.subr.bf16.mxu0 %v11497_v1  ;;  %8975 = vmatmul.mubr.f32.gmra.mrb[6].mxu1 %v11513_v63 }
  0xb1   : > { %10126 = vmatpush3.bf16.msk.msra.mxu1 %vm11012_vm4, %v13453_v41  ;;  %9009 = vmatprep.mubr.f32.mxu1 %v11304_v34  ;;  %v1604_v34 = vand.u32 4294901760, %v11657_v3 }
  0xb2   : > { %10128 = vmatprep.subr.msk.bf16.mxu1 %vm11056_vm14, %v13453_v41 }
  0xb3   : > { %9914 = vmatpush3.bf16.msra.mxu0 %v11497_v1 }
  0xb4   : > { %9916 = vmatprep.subr.bf16.mxu0 %v11503_v30 }
  0xb5   : > { %10130 = vmatpush3.bf16.msk.msra.mxu1 %vm11056_vm14, %v13453_v41 }
  0xb6   : > { %10132 = vmatprep.subr.msk.bf16.mxu1 %vm11118_vm3, %v13453_v41 }
  0xb7   : > { %9918 = vmatpush3.bf16.msra.mxu0 %v11503_v30 }
  0xb8   : > { %9920 = vmatprep.subr.msk.bf16.mxu0 %vm10876_vm7, %v13453_v41 }
  0xb9   : > { %10134 = vmatpush3.bf16.msk.msra.mxu1 %vm11118_vm3, %v13453_v41 }
  0xba   : > { %8702 = vmatmul.mubr.f32.vlgmr.msra.gmra.mrb[0].mxu0 %v11195_v24  ;;  %10136 = vmatprep.subr.msk.bf16.mxu1 %vm11202_vm9, %v13453_v41 }
  0xbb   : > { %9922 = vmatpush3.bf16.msk.msra.mxu0 %vm10876_vm7, %v13453_v41  ;;  %8704 = vmatprep.mubr.f32.mxu0 %v11308_v32 }
  0xbc   : > { %9924 = vmatprep.subr.msk.bf16.mxu0 %vm10922_vm6, %v13453_v41 }
  0xbd   : > { %10138 = vmatpush3.bf16.msk.msra.mxu1 %vm11202_vm9, %v13453_v41 }
  0xbe   : > { %10140 = vmatprep.subr.msk.bf16.mxu1 %vm11261_vm8, %v13453_v41  ;;  %8705 = vmatmul.mubr.f32.gmra.mrb[2].mxu0 %v11328_v15 }
  0xbf   : > { %9926 = vmatpush3.bf16.msk.msra.mxu0 %vm10922_vm6, %v13453_v41  ;;  %8707 = vmatprep.mubr.f32.mxu0 %v11334_v37 }
  0xc0   : > { %9928 = vmatprep.subr.msk.bf16.mxu0 %vm10967_vm12, %v13453_v41 }
  0xc1   : > { %10142 = vmatpush3.bf16.msk.msra.mxu1 %vm11261_vm8, %v13453_v41 }
  0xc2   : > { %8708 = vmatmul.mubr.f32.gmra.mrb[4].mxu0 %v11337_v26 }
  0xc3   : > { %9930 = vmatpush3.bf16.msk.msra.mxu0 %vm10967_vm12, %v13453_v41  ;;  %8710 = vmatprep.mubr.f32.mxu0 %v11344_v9 }
  0xc4   : > { %9010 = vmatmul.mubr.f32.vlgmr.msra.gmra.mrb[0].mxu1 %v11399_v13  ;;  %9932 = vmatprep.subr.msk.bf16.mxu0 %vm11012_vm4, %v13453_v41 }
  0xc5   : > { %9012 = vmatprep.mubr.f32.mxu1 %v11408_v40 }
  0xc6   : > { %8711 = vmatmul.mubr.f32.gmra.mrb[6].mxu0 %v11357_v21 }
  0xc7   : > { %9934 = vmatpush3.bf16.msk.msra.mxu0 %vm11012_vm4, %v13453_v41  ;;  %8745 = vmatprep.mubr.f32.mxu0 %v11192_v52  ;;  %v396_v52 = vmul.u32 32, %v13497_v38 }
  0xc8   : > { %9013 = vmatmul.mubr.f32.gmra.mrb[2].mxu1 %v11424_v61  ;;  %9936 = vmatprep.subr.msk.bf16.mxu0 %vm11056_vm14, %v13453_v41 }
  0xc9   : > { %9015 = vmatprep.mubr.f32.mxu1 %v11433_v5 }
  0xcb   : > { %9938 = vmatpush3.bf16.msk.msra.mxu0 %vm11056_vm14, %v13453_v41 }
  0xcc   : > { %9016 = vmatmul.mubr.f32.gmra.mrb[4].mxu1 %v11470_v2  ;;  %9940 = vmatprep.subr.msk.bf16.mxu0 %vm11118_vm3, %v13453_v41 }
  0xcd   : > { %9018 = vmatprep.mubr.f32.mxu1 %v11491_v18 }
  0xcf   : > { %9942 = vmatpush3.bf16.msk.msra.mxu0 %vm11118_vm3, %v13453_v41 }
  0xd0   : > { %9019 = vmatmul.mubr.f32.gmra.mrb[6].mxu1 %v11513_v63  ;;  %9944 = vmatprep.subr.msk.bf16.mxu0 %vm11202_vm9, %v13453_v41 }
  0xd3   : > { %9946 = vmatpush3.bf16.msk.msra.mxu0 %vm11202_vm9, %v13453_v41 }
  0xd4   : > { %9948 = vmatprep.subr.msk.bf16.mxu0 %vm11261_vm8, %v13453_v41 }
  0xd7   : > { %9950 = vmatpush3.bf16.msk.msra.mxu0 %vm11261_vm8, %v13453_v41 }
  0xd8   : > { %9952 = vmatprep.subr.msk.bf16.mxu0 %vm10876_vm7, %v13453_v41 }
  0xda   : > { %8746 = vmatmul.mubr.f32.vlgmr.msra.gmra.mrb[0].mxu0 %v11195_v24  ;;  %v398_v24 = vadd.s32 32, %v396_v52 }
  0xdb   : > { %9954 = vmatpush3.bf16.msk.msra.mxu0 %vm10876_vm7, %v13453_v41  ;;  %8748 = vmatprep.mubr.f32.mxu0 %v11308_v32  ;;  %v13498_v32 = vld [vmem:[#allocation3_spill] sm:$0xff] }
  0xdc   : > { %9956 = vmatprep.subr.msk.bf16.mxu0 %vm10922_vm6, %v13453_v41  ;;  %vm397_vm7 = vcmp.ge.s32.totalorder %v13498_v32, %v396_v52 }
  0xde   : > { %8749 = vmatmul.mubr.f32.gmra.mrb[2].mxu0 %v11328_v15  ;;  %v1564_v15 = vand.u32 4294901760, %v11618_v57 }
  0xdf   : > { %9958 = vmatpush3.bf16.msk.msra.mxu0 %vm10922_vm6, %v13453_v41  ;;  %8751 = vmatprep.mubr.f32.mxu0 %v11334_v37  ;;  %vm399_vm6 = vcmp.lt.s32.totalorder %v13498_v32, %v398_v24  ;;  %v13499_v37 = vmov 0.0  }
  0xe0   : > { %9960 = vmatprep.subr.msk.bf16.mxu0 %vm10967_vm12, %v13453_v41 }
  0xe2   : > { %8752 = vmatmul.mubr.f32.gmra.mrb[4].mxu0 %v11337_v26 }
  0xe3   : > { %9962 = vmatpush3.bf16.msk.msra.mxu0 %vm10967_vm12, %v13453_v41  ;;  %8754 = vmatprep.mubr.f32.mxu0 %v11344_v9  ;;  %v1574_v9 = vand.u32 4294901760, %v11624_v4  ;;  %vm400_vm12 = vmand %vm397_vm7, %vm399_vm6 }
  0xe4   : > { %9964 = vmatprep.subr.msk.bf16.mxu0 %vm11012_vm4, %v13453_v41  ;;  %v11956_v26 = vsel %vm400_vm12, 1.0, %v13499_v37 }
  0xe6   : > { %8755 = vmatmul.mubr.f32.gmra.mrb[6].mxu0 %v11357_v21 }
  0xe7   : > { %9966 = vmatpush3.bf16.msk.msra.mxu0 %vm11012_vm4, %v13453_v41  ;;  %8789 = vmatprep.mubr.f32.mxu0 %v1564_v15  ;;  %vm13380_vm4 = vcmask 1043456  }
  0xe8   : > { %9968 = vmatprep.subr.msk.bf16.mxu0 %vm11056_vm14, %v13453_v41  ;;  %9105 = vmatprep.subr.msk.mxu1 %vm13380_vm4, %v11956_v26  ;;  %v2496_v21 = vsel %vm13380_vm4, %v11956_v26, 0 }
  0xe9   : > { %9106 = vmatpush3.msk.msra.mxu1 %vm13380_vm4, %v11956_v26  ;;  %v11968_v13 = vsub.f32 %v2496_v21, %v2496_v21 }
  0xeb   : > { %9970 = vmatpush3.bf16.msk.msra.mxu0 %vm11056_vm14, %v13453_v41  ;;  %v11971_v40 = vand.u32 4294901760, %v11968_v13  ;;  %vm13379_vm14 = vcmask 31744  }
  0xec   : > { %9972 = vmatprep.subr.msk.bf16.mxu0 %vm11118_vm3, %v13453_v41 }
  0xed   : > { %v2648_v61 = vsub.f32 %v11968_v13, %v11971_v40 }
  0xef   : > { %9974 = vmatpush3.bf16.msk.msra.mxu0 %vm11118_vm3, %v13453_v41  ;;  %v11975_v5 = vand.u32 4294901760, %v2648_v61  ;;  %vm13381_vm3 = vmmov 0  }
  0xf0   : > { %9976 = vmatprep.subr.msk.bf16.mxu0 %vm11202_vm9, %v13453_v41 }
  0xf1   : > { %9119 = vmatprep.subr.mxu1 %v11975_v5 }
  0xf3   : > { %9978 = vmatpush3.bf16.msk.msra.mxu0 %vm11202_vm9, %v13453_v41 }
  0xf4   : > { %9980 = vmatprep.subr.msk.bf16.mxu0 %vm11261_vm8, %v13453_v41 }
  0xf7   : > { %9982 = vmatpush3.bf16.msk.msra.mxu0 %vm11261_vm8, %v13453_v41 }
  0xf8   : > { %9021 = vmatprep.subr.msk.mxu0 %vm13380_vm4, %v11956_v26 }
  0xfa   : > { %8790 = vmatmul.mubr.f32.vlgmr.msra.gmra.mrb[8].mxu0 %v1574_v9 }
  0xfb   : > { %8792 = vmatprep.mubr.f32.mxu0 %v1584_v16  ;;  %9022 = vmatpush3.msk.msra.mxu0 %vm13380_vm4, %v11956_v26 }
  0xfc   : > { %9035 = vmatprep.subr.mxu0 %v11975_v5 }
  0xfe   : > { %8793 = vmatmul.mubr.f32.gmra.mrb[10].mxu0 %v1594_v25 }
  0xff   : > { %8795 = vmatprep.mubr.f32.mxu0 %v1604_v34 }
 0x102   : > { %8796 = vmatmul.mubr.f32.gmra.mrb[12].mxu0 %v1614_v35 }
 0x103   : > { %8798 = vmatprep.mubr.f32.mxu0 %v1624_v48 }
 0x106   : > { %8799 = vmatmul.mubr.f32.gmra.mrb[14].mxu0 %v1634_v59 }
 0x197   : > { %v11979_v33 = vpop.f32.mrb[0].mxu1 }
 0x198   : > { %v11981_v44 = vpop.f32.mrb[1].mxu1 }
 0x19b   : > { %v11983_v20 = vpop.f32.mrb[2].mxu1 }
 0x19c   : > { %v11985_v2 = vpop.f32.mrb[3].mxu1 }
 0x19f   : > { %v11987_v39 = vpop.f32.mrb[4].mxu1 }
 0x1a0   : > { %v11989_v60 = vpop.f32.mrb[5].mxu1 }
 0x1a3   : > { %v11991_v18 = vpop.f32.mrb[6].mxu1 }
 0x1a4   : > { %v11993_v1 = vpop.f32.mrb[7].mxu1 }
 0x1ad   : > { %v8747_v30 = vpop.f32.mrb[0].mxu0 }
 0x1ae   : > { %v11995_v63 = vmul.f32 0.03125, %v8747_v30  ;;  %v1425_v50 = vpop.f32.mrb[1].mxu0 }
 0x1af   : > { %v11997_v6 = vmul.f32 0.03125, %v1425_v50 }
 0x1b0   : > { %v2474_v27 = vsel %vm13379_vm14, %v11995_v63, 0 }
 0x1b1   : > { %v12001_v49 = vand.u32 4294901760, %v2474_v27  ;;  %v2471_v57 = vsel %vm13379_vm14, %v11997_v6, 0  ;;  %v8750_v4 = vpop.f32.mrb[2].mxu0 }
 0x1b2   : > { %v12005_v29 = vand.u32 4294901760, %v2471_v57  ;;  %v12007_v11 = vmul.f32 0.03125, %v8750_v4  ;;  %v1437_v53 = vpop.f32.mrb[3].mxu0 }
 0x1b3   : > { %v12010_v0 = vsub.f32 %v2474_v27, %v12001_v49  ;;  %v12012_v56 = vmul.f32 0.03125, %v1437_v53 }
 0x1b4   : > { %v12015_v47 = vsub.f32 %v2471_v57, %v12005_v29  ;;  %v2480_v43 = vsel %vm13379_vm14, %v12007_v11, 0 }
 0x1b5   : > { %v2576_v36 = vand.u32 4294901760, %v12010_v0  ;;  %v12020_v46 = vand.u32 4294901760, %v2480_v43  ;;  %v2477_v3 = vsel %vm13379_vm14, %v12012_v56, 0  ;;  %v8753_v7 = vpop.f32.mrb[4].mxu0 }
 0x1b6   : > { %v12024_v22 = vand.u32 4294901760, %v2477_v3  ;;  %v12026_v62 = vmul.f32 0.03125, %v8753_v7  ;;  %v1449_v28 = vpop.f32.mrb[5].mxu0  ;;  %v2566_v42 = vand.u32 4294901760, %v12015_v47 }
 0x1b7   : > { %v2577_v14 = vsub.f32 %v12010_v0, %v2576_v36  ;;  %v12033_v54 = vsub.f32 %v2480_v43, %v12020_v46  ;;  %v12035_v55 = vmul.f32 0.03125, %v1449_v28 }
 0x1b8   : > { %v12038_v17 = vsub.f32 %v2477_v3, %v12024_v22  ;;  %v2486_v31 = vsel %vm13379_vm14, %v12026_v62, 0  ;;  %v2567_v8 = vsub.f32 %v12015_v47, %v2566_v42 }
 0x1b9   : > { %v12045_v51 = vand.u32 4294901760, %v2486_v31  ;;  %v2483_v12 = vsel %vm13379_vm14, %v12035_v55, 0  ;;  %v8756_v23 = vpop.f32.mrb[6].mxu0  ;;  %v2578_v9 = vand.u32 4294901760, %v2577_v14  ;;  %v2596_v34 = vand.u32 4294901760, %v12033_v54 }
 0x1ba   : > { %v12049_v45 = vand.u32 4294901760, %v2483_v12  ;;  %v12051_v58 = vmul.f32 0.03125, %v8756_v23  ;;  %v1461_v10 = vpop.f32.mrb[7].mxu0  ;;  %v2568_v19 = vand.u32 4294901760, %v2567_v8  ;;  %v2586_v15 = vand.u32 4294901760, %v12038_v17 }
 0x1bb   : > { %v12055_v16 = vsub.f32 %v2486_v31, %v12045_v51  ;;  %v12057_v25 = vmul.f32 0.03125, %v1461_v10  ;;  %v2597_v21 = vsub.f32 %v12033_v54, %v2596_v34 }
 0x1bc   : > { %v12061_v35 = vsub.f32 %v2483_v12, %v12049_v45  ;;  %v2492_v48 = vsel %vm13379_vm14, %v12051_v58, 0  ;;  %9023 = vmatprep.mubr.f32.mxu0 %v2568_v19  ;;  %v2587_v59 = vsub.f32 %v12038_v17, %v2586_v15 }
 0x1bd   : > { %v12068_v52 = vand.u32 4294901760, %v2492_v48  ;;  %v2489_v24 = vsel %vm13379_vm14, %v12057_v25, 0  ;;  %9024 = vmatmul.mubr.f32.vlgmr.msra.gmra.mrb[16].mxu0 %v2578_v9  ;;  %v2616_v27 = vand.u32 4294901760, %v12055_v16  ;;  %v2598_v4 = vand.u32 4294901760, %v2597_v21 }
 0x1be   : > { %v12075_v61 = vand.u32 4294901760, %v2489_v24  ;;  %v2588_v30 = vand.u32 4294901760, %v2587_v59  ;;  %v2606_v50 = vand.u32 4294901760, %v12061_v35  ;;  %9036 = vmatpush3.msra.mxu0 %v11975_v5 }
 0x1bf   : > { %v12081_v57 = vsub.f32 %v2492_v48, %v12068_v52  ;;  %9049 = vmatprep.subr.mxu0 %v11968_v13  ;;  %v2617_v3 = vsub.f32 %v12055_v16, %v2616_v27 }
 0x1c0   : > { %v12085_v53 = vsub.f32 %v2489_v24, %v12075_v61  ;;  %9026 = vmatprep.mubr.f32.mxu0 %v2588_v30  ;;  %v2607_v43 = vsub.f32 %v12061_v35, %v2606_v50  ;;  %v2438_v24 = vmul.f32 %v11995_v63, %v11995_v63  ;;  %v2437_v30 = vmul.f32 %v11997_v6, %v11997_v6 }
 0x1c1   : > { %9027 = vmatmul.mubr.f32.gmra.mrb[18].mxu0 %v2598_v4  ;;  %v2636_v7 = vand.u32 4294901760, %v12081_v57  ;;  %v2618_v31 = vand.u32 4294901760, %v2617_v3  ;;  %v2440_v63 = vmul.f32 %v12007_v11, %v12007_v11  ;;  %v2439_v6 = vmul.f32 %v12012_v56, %v12012_v56 }
 0x1c2   : > { %v2608_v28 = vand.u32 4294901760, %v2607_v43  ;;  %v2626_v14 = vand.u32 4294901760, %v12085_v53 }
 0x1c3   : > { %v2637_v8 = vsub.f32 %v12081_v57, %v2636_v7 }
 0x1c4   : > { %9029 = vmatprep.mubr.f32.mxu0 %v2608_v28  ;;  %v2627_v12 = vsub.f32 %v12085_v53, %v2626_v14 }
 0x1c5   : > { %9030 = vmatmul.mubr.f32.gmra.mrb[20].mxu0 %v2618_v31  ;;  %v2638_v10 = vand.u32 4294901760, %v2637_v8 }
 0x1c6   : > { %v2628_v23 = vand.u32 4294901760, %v2627_v12 }
 0x1c8   : > { %9032 = vmatprep.mubr.f32.mxu0 %v2628_v23 }
 0x1c9   : > { %9033 = vmatmul.mubr.f32.gmra.mrb[22].mxu0 %v2638_v10 }
 0x1ca   : > { %9037 = vmatprep.mubr.f32.mxu0 %v12005_v29 }
 0x1cd   : > { %v8791_v19 = vpop.f32.mrb[8].mxu0  ;;  %9038 = vmatmul.mubr.f32.vlgmr.msra.gmra.mrb[16].mxu0 %v12001_v49 }
 0x1ce   : > { %v10433_v9 = vadd.f32 %v11979_v33, %v8791_v19  ;;  %v1566_v48 = vpop.f32.mrb[9].mxu0  ;;  %9040 = vmatprep.mubr.f32.mxu0 %v12024_v22  ;;  %9050 = vmatpush3.msra.mxu0 %v11968_v13 }
 0x1cf   : > { %v10434_v59 = vadd.f32 %v11981_v44, %v1566_v48  ;;  %9063 = vmatprep.subr.msk.mxu0 %vm13380_vm4, %v11956_v26 }
 0x1d0   : > { %v2430_v21 = vmul.f32 0.03125, %v10433_v9 }
 0x1d1   : > { %v2429_v4 = vmul.f32 0.03125, %v10434_v59  ;;  %v8794_v43 = vpop.f32.mrb[10].mxu0  ;;  %9041 = vmatmul.mubr.f32.gmra.mrb[18].mxu0 %v12020_v46  ;;  %v2442_v59 = vmul.f32 %v12026_v62, %v12026_v62 }
 0x1d2   : > { %v2446_v33 = vsub.f32 %v2430_v21, %v2438_v24  ;;  %v10435_v3 = vadd.f32 %v11983_v20, %v8794_v43  ;;  %v1586_v28 = vpop.f32.mrb[11].mxu0  ;;  %9043 = vmatprep.mubr.f32.mxu0 %v12049_v45  ;;  %v2441_v21 = vmul.f32 %v12035_v55, %v12035_v55 }
 0x1d3   : > { %v2445_v44 = vsub.f32 %v2429_v4, %v2437_v30  ;;  %v10436_v31 = vadd.f32 %v11985_v2, %v1586_v28  ;;  %v2444_v28 = vmul.f32 %v12051_v58, %v12051_v58 }
 0x1d4   : > { %v2454_v8 = vadd.f32 1e-05, %v2446_v33  ;;  %v2432_v12 = vmul.f32 0.03125, %v10435_v3 }
 0x1d5   : > { %v2453_v23 = vadd.f32 1e-05, %v2445_v44  ;;  %v2431_v10 = vmul.f32 0.03125, %v10436_v31  ;;  %v8797_v19 = vpop.f32.mrb[12].mxu0  ;;  %9044 = vmatmul.mubr.f32.gmra.mrb[20].mxu0 %v12045_v51  ;;  %v2443_v31 = vmul.f32 %v12057_v25, %v12057_v25 }
 0x1d6   : > { %10698 = vrsqrt.f32 %v2454_v8  ;;  %v2448_v20 = vsub.f32 %v2432_v12, %v2440_v63  ;;  %v10437_v9 = vadd.f32 %v11987_v39, %v8797_v19  ;;  %v1606_v48 = vpop.f32.mrb[13].mxu0  ;;  %9046 = vmatprep.mubr.f32.mxu0 %v12075_v61 }
 0x1d7   : > { %10700 = vrsqrt.f32 %v2453_v23  ;;  %v2447_v2 = vsub.f32 %v2431_v10, %v2439_v6  ;;  %v10438_v11 = vadd.f32 %v11989_v60, %v1606_v48 }
 0x1d8   : > { %v2456_v56 = vadd.f32 1e-05, %v2448_v20  ;;  %v2434_v24 = vmul.f32 0.03125, %v10437_v9 }
 0x1d9   : > { %v2455_v30 = vadd.f32 1e-05, %v2447_v2  ;;  %v2433_v4 = vmul.f32 0.03125, %v10438_v11  ;;  %v8800_v43 = vpop.f32.mrb[14].mxu0  ;;  %9047 = vmatmul.mubr.f32.gmra.mrb[22].mxu0 %v12068_v52 }
 0x1da   : > { %10702 = vrsqrt.f32 %v2456_v56  ;;  %v2450_v39 = vsub.f32 %v2434_v24, %v2442_v59  ;;  %v10439_v33 = vadd.f32 %v11991_v18, %v8800_v43  ;;  %v1626_v3 = vpop.f32.mrb[15].mxu0  ;;  %9051 = vmatprep.mubr.f32.mxu0 %v12015_v47 }
 0x1db   : > { %10704 = vrsqrt.f32 %v2455_v30  ;;  %v2449_v60 = vsub.f32 %v2433_v4, %v2441_v21  ;;  %v10440_v62 = vadd.f32 %v11993_v1, %v1626_v3 }
 0x1dc   : > { %v2458_v55 = vadd.f32 1e-05, %v2450_v39  ;;  %v2436_v44 = vmul.f32 0.03125, %v10439_v33 }
 0x1dd   : > { %v2457_v63 = vadd.f32 1e-05, %v2449_v60  ;;  %v2435_v8 = vmul.f32 0.03125, %v10440_v62  ;;  %9052 = vmatmul.mubr.f32.vlgmr.msra.gmra.mrb[16].mxu0 %v12010_v0 }
 0x1de   : > { %10706 = vrsqrt.f32 %v2458_v55  ;;  %v2452_v18 = vsub.f32 %v2436_v44, %v2444_v28  ;;  %9054 = vmatprep.mubr.f32.mxu0 %v12038_v17  ;;  %9064 = vmatpush3.msk.msra.mxu0 %vm13380_vm4, %v11956_v26 }
 0x1df   : > { %10708 = vrsqrt.f32 %v2457_v63  ;;  %v2451_v1 = vsub.f32 %v2435_v8, %v2443_v31  ;;  %9077 = vmatprep.subr.mxu0 %v11971_v40 }
 0x1e0   : > { %v10699_v58 = vpop.eup %10698  ;;  %v2460_v12 = vadd.f32 1e-05, %v2452_v18 }
 0x1e1   : > { %v10701_v6 = vpop.eup %10700  ;;  %v3249_v25 = vsel %vm13379_vm14, %v10699_v58, 0  ;;  %v2459_v23 = vadd.f32 1e-05, %v2451_v1  ;;  %9055 = vmatmul.mubr.f32.gmra.mrb[18].mxu0 %v12033_v54 }
 0x1e2   : > { %v12144_v10 = vand.u32 4294901760, %v3249_v25  ;;  %10710 = vrsqrt.f32 %v2460_v12  ;;  %9057 = vmatprep.mubr.f32.mxu0 %v12061_v35  ;;  %v3246_v19 = vsel %vm13379_vm14, %v10701_v6, 0 }
 0x1e3   : > { %10712 = vrsqrt.f32 %v2459_v23  ;;  %v12148_v20 = vand.u32 4294901760, %v3246_v19 }
 0x1e4   : > { %v10703_v9 = vpop.eup %10702  ;;  %v12151_v48 = vsub.f32 %v3249_v25, %v12144_v10 }
 0x1e5   : > { %v10705_v2 = vpop.eup %10704  ;;  %9058 = vmatmul.mubr.f32.gmra.mrb[20].mxu0 %v12055_v16  ;;  %v12155_v11 = vsub.f32 %v3246_v19, %v12148_v20  ;;  %v3255_v59 = vsel %vm13379_vm14, %v10703_v9, 0  ;;  %v403_v16 = vand.u32 31, %v13497_v38 }
 0x1e6   : > { %9060 = vmatprep.mubr.f32.mxu0 %v12085_v53  ;;  %v3347_v56 = vand.u32 4294901760, %v12151_v48  ;;  %v3252_v24 = vsel %vm13379_vm14, %v10705_v2, 0  ;;  %v12161_v21 = vand.u32 4294901760, %v3255_v59  ;;  %v13502_v53 = vld [vmem:[#allocation6_spill] sm:$0xff] }
 0x1e7   : > { %v3337_v30 = vand.u32 4294901760, %v12155_v11  ;;  %v12164_v4 = vand.u32 4294901760, %v3252_v24  ;;  %vm12346_vm1 = vcmp.eq.s32.totalorder %v403_v16, %v13498_v32 }
 0x1e8   : > { %v10707_v43 = vpop.eup %10706  ;;  %v3348_v39 = vsub.f32 %v12151_v48, %v3347_v56  ;;  %v12170_v33 = vsub.f32 %v3255_v59, %v12161_v21 }
 0x1e9   : > { %v10709_v3 = vpop.eup %10708  ;;  %9061 = vmatmul.mubr.f32.gmra.mrb[22].mxu0 %v12081_v57  ;;  %v3338_v60 = vsub.f32 %v12155_v11, %v3337_v30  ;;  %v12177_v62 = vsub.f32 %v3252_v24, %v12164_v4  ;;  %v3261_v28 = vsel %vm13379_vm14, %v10707_v43, 0 }
 0x1ea   : > { %9065 = vmatprep.mubr.f32.mxu0 %v2566_v42  ;;  %v3367_v55 = vand.u32 4294901760, %v12170_v33  ;;  %v3258_v44 = vsel %vm13379_vm14, %v10709_v3, 0  ;;  %v12184_v31 = vand.u32 4294901760, %v3261_v28  ;;  %v3349_v58 = vand.u32 4294901760, %v3348_v39 }
 0x1eb   : > { %v3339_v63 = vand.u32 4294901760, %v3338_v60  ;;  %v3357_v8 = vand.u32 4294901760, %v12177_v62  ;;  %v12187_v18 = vand.u32 4294901760, %v3258_v44 }
 0x1ec   : > { %v10711_v1 = vpop.eup %10710  ;;  %v3368_v12 = vsub.f32 %v12170_v33, %v3367_v55  ;;  %v12193_v47 = vsub.f32 %v3261_v28, %v12184_v31 }
 0x1ed   : > { %v10713_v42 = vpop.eup %10712  ;;  %9066 = vmatmul.mubr.f32.vlgmr.msra.gmra.mrb[16].mxu0 %v2576_v36  ;;  %9107 = vmatprep.mubr.f32.mxu1 %v3339_v63  ;;  %v3358_v6 = vsub.f32 %v12177_v62, %v3357_v8  ;;  %v12201_v25 = vsub.f32 %v3258_v44, %v12187_v18  ;;  %v3267_v23 = vsel %vm13379_vm14, %v10711_v1, 0  ;;  %v13521_v44 = vld [vmem:[#allocation9_spill] sm:$0xff]  ;;  %v13522_v63 = vld [vmem:[#allocation10_spill] sm:$0xff]  ;;  %v13523_v1 = vmov 0 }
 0x1ee   : > { %9068 = vmatprep.mubr.f32.mxu0 %v2586_v15  ;;  %9108 = vmatmul.mubr.f32.vlgmr.msra.gmra.mrb[8].mxu1 %v3349_v58  ;;  %v3387_v19 = vand.u32 4294901760, %v12193_v47  ;;  %v3264_v9 = vsel %vm13379_vm14, %v10713_v42, 0  ;;  %v12208_v0 = vand.u32 4294901760, %v3267_v23  ;;  %v3369_v24 = vand.u32 4294901760, %v3368_v12 }
 0x1ef   : > { %v3359_v36 = vand.u32 4294901760, %v3358_v6  ;;  %v3377_v2 = vand.u32 4294901760, %v12201_v25  ;;  %9120 = vmatpush3.msra.mxu1 %v11975_v5  ;;  %v12212_v59 = vand.u32 4294901760, %v3264_v9  ;;  %9078 = vmatpush3.msra.mxu0 %v11971_v40  ;;  %v13527_v12 = vmov 0  ;;  %v13530_v6 = vld [vmem:[#allocation12_spill] sm:$0xff] }
 0x1f0   : > { %v3388_v17 = vsub.f32 %v12193_v47, %v3387_v19  ;;  %v12219_v15 = vsub.f32 %v3267_v23, %v12208_v0  ;;  %9133 = vmatprep.subr.mxu1 %v11968_v13  ;;  %9091 = vmatprep.subr.msk.mxu0 %vm13380_vm4, %v11956_v26 }
 0x1f1   : > { %9069 = vmatmul.mubr.f32.gmra.mrb[18].mxu0 %v2596_v34  ;;  %9110 = vmatprep.mubr.f32.mxu1 %v3359_v36  ;;  %v3378_v5 = vsub.f32 %v12201_v25, %v3377_v2  ;;  %v12230_v43 = vsub.f32 %v3264_v9, %v12212_v59  ;;  %v13537_v36 = vld [vmem:[#allocation13_spill] sm:$0xff] }
 0x1f2   : > { %9071 = vmatprep.mubr.f32.mxu0 %v2606_v50  ;;  %9111 = vmatmul.mubr.f32.gmra.mrb[10].mxu1 %v3369_v24  ;;  %v3407_v39 = vand.u32 4294901760, %v12219_v15  ;;  %v3389_v28 = vand.u32 4294901760, %v3388_v17  ;;  %v5233_v17 = vld [vmem:[%s13311_s3 + $0x10] sm:$0xff] }
 0x1f3   : > { %v3379_v3 = vand.u32 4294901760, %v3378_v5  ;;  %v3397_v60 = vand.u32 4294901760, %v12230_v43 }
 0x1f4   : > { %v3408_v54 = vsub.f32 %v12219_v15, %v3407_v39 }
 0x1f5   : > { %9072 = vmatmul.mubr.f32.gmra.mrb[20].mxu0 %v2616_v27  ;;  %9113 = vmatprep.mubr.f32.mxu1 %v3379_v3  ;;  %v3398_v34 = vsub.f32 %v12230_v43, %v3397_v60  ;;  %v13501_v27 = vld [vmem:[#allocation5_spill] sm:$0xff]  ;;  %v10722_v3 = vld [vmem:[%s11082_s30 + $0x8] sm:$0xff] }
 0x1f6   : > { %9074 = vmatprep.mubr.f32.mxu0 %v2626_v14  ;;  %9114 = vmatmul.mubr.f32.gmra.mrb[12].mxu1 %v3389_v28  ;;  %v3409_v50 = vand.u32 4294901760, %v3408_v54  ;;  %v405_v57 = vand.u32 31, %v13501_v27  ;;  %v13503_v14 = vld [vmem:[#allocation7_spill] sm:$0xff]  ;;  %v10723_v54 = vld [vmem:[%s11082_s30] sm:$0xff] }
 0x1f7   : > { %v3399_v35 = vand.u32 4294901760, %v3398_v34 }
 0x1f8   : > { %vm12356_vm15 = vcmp.eq.s32.totalorder %v405_v57, %v13498_v32 }
 0x1f9   : > { %9075 = vmatmul.mubr.f32.gmra.mrb[22].mxu0 %v2636_v7  ;;  %9116 = vmatprep.mubr.f32.mxu1 %v3399_v35  ;;  %v406_v7 = vand.u32 31, %v13502_v53 }
 0x1fa   : > { %9079 = vmatprep.mubr.f32.mxu0 %v12005_v29  ;;  %9117 = vmatmul.mubr.f32.gmra.mrb[14].mxu1 %v3409_v50 }
 0x1fb   : > { %9121 = vmatprep.mubr.f32.mxu1 %v12148_v20  ;;  %vm12361_vm11 = vcmp.eq.s32.totalorder %v406_v7, %v13498_v32 }
 0x1fc   : > { %vm12381_vm10 = vmpackc.low %vm12361_vm11, %vm12356_vm15 }
 0x1fd   : > { %9080 = vmatmul.mubr.f32.vlgmr.msra.gmra.mrb[16].mxu0 %v12001_v49 }
 0x1fe   : > { %9082 = vmatprep.mubr.f32.mxu0 %v12024_v22  ;;  %9122 = vmatmul.mubr.f32.vlgmr.msra.gmra.mrb[8].mxu1 %v12144_v10 }
 0x1ff   : > { %9124 = vmatprep.mubr.f32.mxu1 %v12164_v4  ;;  %9134 = vmatpush3.msra.mxu1 %v11968_v13 }
 0x200   : > { %9092 = vmatpush3.msk.msra.mxu0 %vm13380_vm4, %v11956_v26  ;;  %9147 = vmatprep.subr.msk.mxu1 %vm13380_vm4, %v11956_v26 }
 0x201   : > { %9083 = vmatmul.mubr.f32.gmra.mrb[18].mxu0 %v12020_v46 }
 0x202   : > { %9085 = vmatprep.mubr.f32.mxu0 %v12049_v45  ;;  %9125 = vmatmul.mubr.f32.gmra.mrb[10].mxu1 %v12161_v21 }
 0x203   : > { %9127 = vmatprep.mubr.f32.mxu1 %v12187_v18 }
 0x205   : > { %9086 = vmatmul.mubr.f32.gmra.mrb[20].mxu0 %v12045_v51 }
 0x206   : > { %9088 = vmatprep.mubr.f32.mxu0 %v12075_v61  ;;  %9128 = vmatmul.mubr.f32.gmra.mrb[12].mxu1 %v12184_v31 }
 0x207   : > { %9130 = vmatprep.mubr.f32.mxu1 %v12212_v59 }
 0x209   : > { %9089 = vmatmul.mubr.f32.gmra.mrb[22].mxu0 %v12068_v52 }
 0x20a   : > { %9093 = vmatprep.mubr.f32.mxu0 %v12005_v29  ;;  %9131 = vmatmul.mubr.f32.gmra.mrb[14].mxu1 %v12208_v0 }
 0x20b   : > { %9135 = vmatprep.mubr.f32.mxu1 %v12155_v11  ;;  %v7591_v11 = vsel %vm12361_vm11, 1.0, %v13499_v37 }
 0x20d   : > { %9094 = vmatmul.mubr.f32.vlgmr.msra.gmra.mrb[16].mxu0 %v12001_v49 }
 0x20e   : > { %9096 = vmatprep.mubr.f32.mxu0 %v12024_v22  ;;  %9136 = vmatmul.mubr.f32.vlgmr.msra.gmra.mrb[8].mxu1 %v12151_v48 }
 0x20f   : > { %9138 = vmatprep.mubr.f32.mxu1 %v12177_v62  ;;  %9148 = vmatpush3.msk.msra.mxu1 %vm13380_vm4, %v11956_v26 }
 0x210   : > { %9161 = vmatprep.subr.mxu1 %v11971_v40 }
 0x211   : > { %9097 = vmatmul.mubr.f32.gmra.mrb[18].mxu0 %v12020_v46 }
 0x212   : > { %9099 = vmatprep.mubr.f32.mxu0 %v12049_v45  ;;  %9139 = vmatmul.mubr.f32.gmra.mrb[10].mxu1 %v12170_v33  ;;  %v13515_v33 = vmov 0 }
 0x213   : > { %9141 = vmatprep.mubr.f32.mxu1 %v12201_v25  ;;  %v13516_v33 = vsel %vm12381_vm10, 4294967295, %v13515_v33  ;;  %v412_v25 = vand.u32 31, %v13530_v6 }
 0x215   : > { %9100 = vmatmul.mubr.f32.gmra.mrb[20].mxu0 %v12045_v51  ;;  %vm12440_vm14 = vcmp.eq.s32.totalorder %v412_v25, %v13498_v32 }
 0x216   : > { %9102 = vmatprep.mubr.f32.mxu0 %v12075_v61  ;;  %9142 = vmatmul.mubr.f32.gmra.mrb[12].mxu1 %v12193_v47  ;;  %v13529_v47 = vld [vmem:[#allocation11_spill] sm:$0xff] }
 0x217   : > { %9144 = vmatprep.mubr.f32.mxu1 %v12230_v43  ;;  %v411_v42 = vand.u32 31, %v13529_v47 }
 0x219   : > { %9103 = vmatmul.mubr.f32.gmra.mrb[22].mxu0 %v12068_v52  ;;  %v13500_v52 = vld [vmem:[#allocation4_spill] sm:$0xff]  ;;  %vm12435_vm12 = vcmp.eq.s32.totalorder %v411_v42, %v13498_v32 }
 0x21a   : > { %9145 = vmatmul.mubr.f32.gmra.mrb[14].mxu1 %v12219_v15  ;;  %9205 = vmatprep.mubr.msk.f32.mxu0 %vm13381_vm3, %v13499_v37  ;;  %v404_v61 = vand.u32 31, %v13500_v52 }
 0x21b   : > { %9149 = vmatprep.mubr.f32.mxu1 %v3337_v30  ;;  %v13559_v30 = vld [vmem:[#allocation17_spill] sm:$0xff] }
 0x21c   : > { %vm12351_vm2 = vcmp.eq.s32.totalorder %v404_v61, %v13498_v32 }
 0x21d   : > { %vm12369_vm5 = vmpackc.low %vm12351_vm2, %vm12346_vm1 }
 0x21e   : > { %9150 = vmatmul.mubr.f32.vlgmr.msra.gmra.mrb[8].mxu1 %v3347_v56 }
 0x21f   : > { %9152 = vmatprep.mubr.f32.mxu1 %v3357_v8  ;;  %9162 = vmatpush3.msra.mxu1 %v11971_v40  ;;  %v410_v8 = vand.u32 31, %v13522_v63 }
 0x220   : > { %9175 = vmatprep.subr.msk.mxu1 %vm13380_vm4, %v11956_v26 }
 0x221   : > { %vm12416_vm7 = vcmp.eq.s32.totalorder %v410_v8, %v13498_v32 }
 0x222   : > { %9153 = vmatmul.mubr.f32.gmra.mrb[10].mxu1 %v3367_v55  ;;  %v13528_v12 = vsel %vm12416_vm7, 4294967295, %v13527_v12 }
 0x223   : > { %9155 = vmatprep.mubr.f32.mxu1 %v3377_v2  ;;  %v413_v2 = vand.u32 31, %v13537_v36 }
 0x226   : > { %9156 = vmatmul.mubr.f32.gmra.mrb[12].mxu1 %v3387_v19  ;;  %v13531_v19 = vmov 0 }
 0x227   : > { %9158 = vmatprep.mubr.f32.mxu1 %v3397_v60 }
 0x22a   : > { %9159 = vmatmul.mubr.f32.gmra.mrb[14].mxu1 %v3407_v39  ;;  %v5234_v39 = vld [vmem:[%s13311_s3 + $0x18] sm:$0xff] }
 0x22b   : > { %9163 = vmatprep.mubr.f32.mxu1 %v12148_v20 }
 0x22e   : > { %9164 = vmatmul.mubr.f32.vlgmr.msra.gmra.mrb[8].mxu1 %v12144_v10 }
 0x22f   : > { %9166 = vmatprep.mubr.f32.mxu1 %v12164_v4  ;;  %9176 = vmatpush3.msk.msra.mxu1 %vm13380_vm4, %v11956_v26  ;;  %v13392_v26 = vmov 0.0|0.0  }
 0x230   : > { %10143 = vmatprep.subr.bf16.mxu0 %v13392_v26  ;;  %10215 = vmatprep.subr.bf16.mxu1 %v13392_v26 }
 0x232   : > { %9167 = vmatmul.mubr.f32.gmra.mrb[10].mxu1 %v12161_v21 }
 0x233   : > { %9169 = vmatprep.mubr.f32.mxu1 %v12187_v18 }
 0x236   : > { %9170 = vmatmul.mubr.f32.gmra.mrb[12].mxu1 %v12184_v31 }
 0x237   : > { %9172 = vmatprep.mubr.f32.mxu1 %v12212_v59 }
 0x23a   : > { %9173 = vmatmul.mubr.f32.gmra.mrb[14].mxu1 %v12208_v0 }
 0x23b   : > { %9177 = vmatprep.mubr.f32.mxu1 %v12148_v20  ;;  %v13504_v20 = vld [vmem:[#allocation8_spill] sm:$0xff] }
 0x23c   : > { %v408_v48 = vand.u32 31, %v13504_v20  ;;  %v13547_v20 = vmov 0.0|0.0  }
 0x23e   : > { %9178 = vmatmul.mubr.f32.vlgmr.msra.gmra.mrb[8].mxu1 %v12144_v10  ;;  %v407_v10 = vand.u32 31, %v13503_v14  ;;  %vm12391_vm9 = vcmp.eq.s32.totalorder %v408_v48, %v13498_v32  ;;  %v10725_v48 = vld [vmem:[%s11082_s30 + $0x10] sm:$0xff] }
 0x23f   : > { %9180 = vmatprep.mubr.f32.mxu1 %v12164_v4  ;;  %v13513_v4 = vmov 0  ;;  %10217 = vmatpush3.bf16.msk.msra.mxu1 %vm12369_vm5, %v13453_v41 }
 0x240   : > { %v13514_v4 = vsel %vm12369_vm5, 4294967295, %v13513_v4  ;;  %10218 = vmatprep.subr.bf16.mxu1 %v13392_v26  ;;  %vm12386_vm13 = vcmp.eq.s32.totalorder %v407_v10, %v13498_v32  ;;  %vm12461_vm5 = vcmp.eq.s32.totalorder %v413_v2, %v13498_v32 }
 0x241   : > { %vm12406_vm0 = vmpackc.low %vm12391_vm9, %vm12386_vm13 }
 0x242   : > { %9181 = vmatmul.mubr.f32.gmra.mrb[10].mxu1 %v12161_v21  ;;  %v13524_v1 = vsel %vm12406_vm0, 4294967295, %v13523_v1 }
 0x243   : > { %9183 = vmatprep.mubr.f32.mxu1 %v12187_v18  ;;  %v480_v18 = vmul.u32 16, %v13497_v38  ;;  %10220 = vmatpush3.bf16.msk.msra.mxu1 %vm12381_vm10, %v13453_v41 }
 0x244   : > { %10221 = vmatprep.subr.bf16.mxu1 %v13392_v26 }
 0x245   : > { %v482_v23 = vadd.s32 16, %v480_v18  ;;  %vm481_vm4 = vcmp.ge.s32.totalorder %v13498_v32, %v480_v18 }
 0x246   : > { %9184 = vmatmul.mubr.f32.gmra.mrb[12].mxu1 %v12184_v31  ;;  %v409_v31 = vand.u32 31, %v13521_v44 }
 0x247   : > { %9186 = vmatprep.mubr.f32.mxu1 %v12212_v59  ;;  %10223 = vmatpush3.bf16.msk.msra.mxu1 %vm12406_vm0, %v13453_v41  ;;  %v13538_v59 = vld [vmem:[#allocation14_spill] sm:$0xff]  ;;  %vm12456_vm0 = vmpackc.low %vm12440_vm14, %vm12435_vm12 }
 0x248   : > { %vm12411_vm8 = vcmp.eq.s32.totalorder %v409_v31, %v13498_v32  ;;  %10224 = vmatprep.subr.bf16.mxu1 %v13392_v26  ;;  %v414_v24 = vand.u32 31, %v13538_v59  ;;  %v10727_v59 = vld [vmem:[%s11082_s30 + $0x20] sm:$0xff] }
 0x249   : > { %vm12430_vm6 = vmpackc.low %vm12416_vm7, %vm12411_vm8 }
 0x24a   : > { %9187 = vmatmul.mubr.f32.gmra.mrb[14].mxu1 %v12208_v0  ;;  %v13532_v19 = vsel %vm12430_vm6, 4294967295, %v13531_v19  ;;  %vm12466_vm7 = vcmp.eq.s32.totalorder %v414_v24, %v13498_v32 }
 0x24b   : > { %9335 = vmatprep.mubr.msk.f32.mxu1 %vm13381_vm3, %v13499_v37  ;;  %vm483_vm3 = vcmp.lt.s32.totalorder %v13498_v32, %v482_v23  ;;  %10226 = vmatpush3.bf16.msk.msra.mxu1 %vm12430_vm6, %v13453_v41  ;;  %vm4032_vm6 = vcmask 523264  }
 0x24c   : > { %10227 = vmatprep.subr.bf16.mxu1 %v13392_v26  ;;  %vm484_vm10 = vmand %vm481_vm4, %vm483_vm3  ;;  %vm13548_vm3 = vmmov 0  }
 0x24d   : > { %v12474_v43 = vsel %vm484_vm10, 1.0, %v13499_v37  ;;  %vm12481_vm4 = vmpackc.low %vm12466_vm7, %vm12461_vm5 }
 0x24e   : > { %v4034_v28 = vsel %vm4032_vm6, %v12474_v43, 0 }
 0x24f   : > { %10229 = vmatpush3.bf16.msk.msra.mxu1 %vm12456_vm0, %v13453_v41  ;;  %v12495_v57 = vsub.f32 %v4034_v28, %v4034_v28 }
 0x250   : > { %10230 = vmatprep.subr.bf16.mxu1 %v13392_v26 }
 0x251   : > { %v13394_v36 = vand.u32 4294901760, %v12495_v57 }
 0x253   : > { %10232 = vmatpush3.bf16.msk.msra.mxu1 %vm12481_vm4, %v13453_v41 }
 0x254   : > { %10233 = vmatprep.subr.bf16.mxu1 %v13392_v26 }
 0x2e0   : > { %v12323_v13 = vpop.f32.mrb[16].mxu0 }
 0x2e1   : > { %v12325_v40 = vpop.f32.mrb[17].mxu0  ;;  %v4017_v60 = vsub.f32 %v10722_v3, %v12323_v13  ;;  %v10724_v13 = vld [vmem:[%s11082_s30 + $0x18] sm:$0xff] }
 0x2e2   : > { %v4016_v34 = vsub.f32 %v10723_v54, %v12325_v40 }
 0x2e4   : > { %v12327_v49 = vpop.f32.mrb[18].mxu0 }
 0x2e5   : > { %v12329_v29 = vpop.f32.mrb[19].mxu0  ;;  %v4019_v7 = vsub.f32 %v10724_v13, %v12327_v49  ;;  %v10726_v49 = vld [vmem:[%s11082_s30 + $0x28] sm:$0xff] }
 0x2e6   : > { %v4018_v31 = vsub.f32 %v10725_v48, %v12329_v29 }
 0x2e8   : > { %v12331_v46 = vpop.f32.mrb[20].mxu0 }
 0x2e9   : > { %v12333_v22 = vpop.f32.mrb[21].mxu0  ;;  %v4021_v2 = vsub.f32 %v10726_v49, %v12331_v46 }
 0x2ea   : > { %v4020_v29 = vsub.f32 %v10727_v59, %v12333_v22 }
 0x2ec   : > { %v12335_v51 = vpop.f32.mrb[22].mxu0 }
 0x2ed   : > { %v12337_v45 = vpop.f32.mrb[23].mxu0 }
 0x311   : > { %v9179_v35 = vpop.f32.mrb[8].mxu1 }
 0x312   : > { %v4025_v50 = vmul.f32 %v9179_v35, %v4017_v60  ;;  %v3970_v16 = vpop.f32.mrb[9].mxu1  ;;  %v10728_v60 = vld [vmem:[%s11082_s30 + $0x38] sm:$0xff] }
 0x313   : > { %v4024_v61 = vmul.f32 %v4016_v34, %v3970_v16  ;;  %v4023_v28 = vsub.f32 %v10728_v60, %v12335_v51  ;;  %v10729_v16 = vld [vmem:[%s11082_s30 + $0x30] sm:$0xff] }
 0x314   : > { %v4040_v10 = vand.u32 4294901760, %v4025_v50  ;;  %v4022_v46 = vsub.f32 %v10729_v16, %v12337_v45 }
 0x315   : > { %v4037_v8 = vand.u32 4294901760, %v4024_v61  ;;  %v9182_v40 = vpop.f32.mrb[10].mxu1 }
 0x316   : > { %v12501_v18 = vsub.f32 %v4025_v50, %v4040_v10  ;;  %v4027_v47 = vmul.f32 %v9182_v40, %v4019_v7  ;;  %v3982_v42 = vpop.f32.mrb[11].mxu1 }
 0x317   : > { %v12503_v6 = vpack.c.bf16 %v4040_v10, %v4037_v8  ;;  %v12505_v25 = vsub.f32 %v4024_v61, %v4037_v8  ;;  %v4026_v23 = vmul.f32 %v4018_v31, %v3982_v42 }
 0x318   : > { %v4129_v24 = vand.u32 4294901760, %v12501_v18  ;;  %v4046_v3 = vand.u32 4294901760, %v4027_v47 }
 0x319   : > { %v4122_v54 = vand.u32 4294901760, %v12505_v25  ;;  %v4043_v35 = vand.u32 4294901760, %v4026_v23  ;;  %v9185_v50 = vpop.f32.mrb[12].mxu1  ;;  %10145 = vmatpush3.bf16.msra.mxu0 %v12503_v6 }
 0x31a   : > { %v4130_v22 = vsub.f32 %v12501_v18, %v4129_v24  ;;  %v12522_v61 = vsub.f32 %v4027_v47, %v4046_v3  ;;  %v4029_v13 = vmul.f32 %v9185_v50, %v4021_v2  ;;  %v3994_v7 = vpop.f32.mrb[13].mxu1  ;;  %10146 = vmatprep.subr.bf16.mxu0 %v13392_v26 }
 0x31b   : > { %v4123_v51 = vsub.f32 %v12505_v25, %v4122_v54  ;;  %v12526_v10 = vpack.c.bf16 %v4046_v3, %v4043_v35  ;;  %v12528_v48 = vsub.f32 %v4026_v23, %v4043_v35  ;;  %v4028_v31 = vmul.f32 %v4020_v29, %v3994_v7 }
 0x31c   : > { %v4131_v8 = vand.u32 4294901760, %v4130_v22  ;;  %v4143_v40 = vand.u32 4294901760, %v12522_v61  ;;  %v4052_v42 = vand.u32 4294901760, %v4029_v13  ;;  %v12531_v45 = vpack.c.bf16 %v4129_v24, %v4122_v54 }
 0x31d   : > { %v4124_v49 = vand.u32 4294901760, %v4123_v51  ;;  %v4136_v47 = vand.u32 4294901760, %v12528_v48  ;;  %v10171_v2 = vpack.c.bf16 %v12522_v61, %v12528_v48  ;;  %v4049_v59 = vand.u32 4294901760, %v4028_v31  ;;  %v9188_v60 = vpop.f32.mrb[14].mxu1  ;;  %10148 = vmatpush3.bf16.msra.mxu0 %v12526_v10 }
 0x31e   : > { %v4144_v23 = vsub.f32 %v12522_v61, %v4143_v40  ;;  %v4156_v3 = vsub.f32 %v4029_v13, %v4052_v42  ;;  %v4031_v29 = vmul.f32 %v9188_v60, %v4023_v28  ;;  %v4006_v35 = vpop.f32.mrb[15].mxu1  ;;  %10149 = vmatprep.subr.bf16.mxu0 %v13392_v26  ;;  %v4112_v24 = vsub.f32 %v12495_v57, %v13394_v36 }
 0x31f   : > { %v4137_v54 = vsub.f32 %v12528_v48, %v4136_v47  ;;  %v12543_v50 = vpack.c.bf16 %v4052_v42, %v4049_v59  ;;  %v4149_v16 = vsub.f32 %v4028_v31, %v4049_v59  ;;  %v4030_v22 = vmul.f32 %v4022_v46, %v4006_v35 }
 0x320   : > { %v4145_v7 = vand.u32 4294901760, %v4144_v23  ;;  %v4157_v51 = vand.u32 4294901760, %v4156_v3  ;;  %v4058_v34 = vand.u32 4294901760, %v4031_v29  ;;  %v10156_v63 = vpack.c.bf16 %v4131_v8, %v4124_v49 }
 0x321   : > { %v4138_v61 = vand.u32 4294901760, %v4137_v54  ;;  %v4150_v13 = vand.u32 4294901760, %v4149_v16  ;;  %v10174_v28 = vpack.c.bf16 %v4156_v3, %v4149_v16  ;;  %v4055_v60 = vand.u32 4294901760, %v4030_v22  ;;  %10151 = vmatpush3.bf16.msra.mxu0 %v12543_v50 }
 0x322   : > { %v4158_v26 = vsub.f32 %v4156_v3, %v4157_v51  ;;  %v4170_v44 = vsub.f32 %v4031_v29, %v4058_v34  ;;  %10152 = vmatprep.subr.bf16.mxu0 %v13547_v20  ;;  %v10195_v36 = vpack.c.bf16 %v4143_v40, %v4136_v47  ;;  %v4113_v35 = vand.u32 4294901760, %v4112_v24  ;;  %v13560_v24 = vld [vmem:[#allocation18_spill] sm:$0xff] }
 0x323   : > { %v4151_v48 = vsub.f32 %v4149_v16, %v4150_v13  ;;  %v12547_v42 = vpack.c.bf16 %v4058_v34, %v4055_v60  ;;  %v4163_v31 = vsub.f32 %v4030_v22, %v4055_v60  ;;  %v10159_v46 = vpack.c.bf16 %v4145_v7, %v4138_v61 }
 0x324   : > { %v4159_v59 = vand.u32 4294901760, %v4158_v26  ;;  %v4171_v23 = vand.u32 4294901760, %v4170_v44  ;;  %v10198_v8 = vpack.c.bf16 %v4157_v51, %v4150_v13  ;;  %v12649_v51 = vsub.f32 %v7591_v11, %v7591_v11 }
 0x325   : > { %v4152_v49 = vand.u32 4294901760, %v4151_v48  ;;  %v4164_v54 = vand.u32 4294901760, %v4163_v31  ;;  %v10177_v14 = vpack.c.bf16 %v4170_v44, %v4163_v31  ;;  %10154 = vmatpush3.bf16.msra.mxu0 %v12547_v42  ;;  %v7592_v61 = vsel %vm12386_vm13, 1.0, %v13499_v37 }
 0x326   : > { %v4172_v53 = vsub.f32 %v4170_v44, %v4171_v23  ;;  %10155 = vmatprep.subr.bf16.mxu0 %v13547_v20  ;;  %v7588_v44 = vsel %vm12346_vm1, 1.0, %v13499_v37  ;;  %v7593_v13 = vsel %vm12391_vm9, 1.0, %v13499_v37  ;;  %v7594_v48 = vsel %vm12411_vm8, 1.0, %v13499_v37 }
 0x327   : > { %v4165_v3 = vsub.f32 %v4163_v31, %v4164_v54  ;;  %v10162_v29 = vpack.c.bf16 %v4159_v59, %v4152_v49  ;;  %v10201_v40 = vpack.c.bf16 %v4171_v23, %v4164_v54  ;;  %v12685_v31 = vsub.f32 %v7592_v61, %v7592_v61 }
 0x328   : > { %v4173_v47 = vand.u32 4294901760, %v4172_v53  ;;  %9206 = vmatmul.mubr.f32.vlgmr.msra.gmra.mrb[24].mxu0 %v4113_v35  ;;  %v13549_v53 = vpack.c.bf16 %v12501_v18, %v12505_v25  ;;  %vm13567_vm9 = vnez %v13528_v12  ;;  %v12698_v49 = vsub.f32 %v7594_v48, %v7594_v48 }
 0x329   : > { %v4166_v34 = vand.u32 4294901760, %v4165_v3  ;;  %10157 = vmatpush3.bf16.msra.mxu0 %v10156_v63  ;;  %9224 = vmatprep.mubr.msk.f32.mxu0 %vm13548_vm3, %v13499_v37  ;;  %v7589_v63 = vsel %vm12351_vm2, 1.0, %v13499_v37  ;;  %v7595_v59 = vsel %vm13567_vm9, 1.0, %v13499_v37  ;;  %vm13570_vm8 = vnez %v13524_v1 }
 0x32a   : > { %10158 = vmatprep.subr.bf16.mxu0 %v13547_v20  ;;  %v12612_v18 = vsub.f32 %v7589_v63, %v7589_v63  ;;  %v12700_v54 = vsub.f32 %v7595_v59, %v7595_v59 }
 0x32b   : > { %v10165_v26 = vpack.c.bf16 %v4173_v47, %v4166_v34  ;;  %v7597_v47 = vsel %vm12440_vm14, 1.0, %v13499_v37  ;;  %v4695_v34 = vand.u32 4294901760, %v12685_v31  ;;  %vm13568_vm14 = vnez %v13514_v4  ;;  %v5231_v4 = vld [vmem:[%s13311_s3] sm:$0xff] }
 0x32c   : > { %v4674_v22 = vand.u32 4294901760, %v12612_v18  ;;  %v4716_v11 = vand.u32 4294901760, %v12700_v54  ;;  %v5247_v1 = vand.u32 4294901760, %v5231_v4 }
 0x32d   : > { %10160 = vmatpush3.bf16.msra.mxu0 %v10159_v46  ;;  %v12687_v46 = vsub.f32 %v7593_v13, %v7593_v13  ;;  %v4696_v63 = vsub.f32 %v12685_v31, %v4695_v34 }
 0x32e   : > { %10161 = vmatprep.subr.bf16.mxu0 %v13547_v20  ;;  %v4675_v55 = vsub.f32 %v12612_v18, %v4674_v22 }
 0x32f   : > { %v4697_v15 = vand.u32 4294901760, %v4696_v63 }
 0x330   : > { %v4676_v23 = vand.u32 4294901760, %v4675_v55 }
 0x331   : > { %10163 = vmatpush3.bf16.msra.mxu0 %v10162_v29 }
 0x332   : > { %10164 = vmatprep.subr.bf16.mxu0 %v13547_v20 }
 0x335   : > { %10166 = vmatpush3.bf16.msra.mxu0 %v10165_v26  ;;  %v4702_v26 = vand.u32 4294901760, %v12687_v46 }
 0x336   : > { %10167 = vmatprep.subr.bf16.mxu0 %v13547_v20 }
 0x337   : > { %v4703_v9 = vsub.f32 %v12687_v46, %v4702_v26 }
 0x338   : > { %9225 = vmatmul.mubr.msk.f32.vlgmr.msra.gmra.mrb[24].mxu0 %vm4032_vm6, %v12474_v43 }
 0x339   : > { %10169 = vmatpush3.bf16.msra.mxu0 %v13549_v53  ;;  %9243 = vmatprep.mubr.msk.f32.mxu0 %vm13548_vm3, %v13499_v37 }
 0x33a   : > { %10170 = vmatprep.subr.bf16.mxu0 %v13547_v20 }
 0x33d   : > { %10172 = vmatpush3.bf16.msra.mxu0 %v10171_v2  ;;  %v417_v2 = vand.u32 31, %v13559_v30 }
 0x33e   : > { %10173 = vmatprep.subr.bf16.mxu0 %v13547_v20 }
 0x341   : > { %10175 = vmatpush3.bf16.msra.mxu0 %v10174_v28 }
 0x342   : > { %10176 = vmatprep.subr.bf16.mxu0 %v13547_v20 }
 0x345   : > { %10178 = vmatpush3.bf16.msra.mxu0 %v10177_v14  ;;  %v13550_v14 = vand.u32 4294901760, %v12495_v57 }
 0x346   : > { %10179 = vmatprep.subr.bf16.mxu0 %v13547_v20 }
 0x348   : > { %9244 = vmatmul.mubr.f32.vlgmr.msra.gmra.mrb[24].mxu0 %v12495_v57  ;;  %v12610_v57 = vsub.f32 %v7588_v44, %v7588_v44  ;;  %v7598_v44 = vsel %vm12461_vm5, 1.0, %v13499_v37  ;;  %vm13569_vm5 = vnez %v13516_v33  ;;  %v5232_v33 = vld [vmem:[%s13311_s3 + $0x8] sm:$0xff] }
 0x349   : > { %10181 = vmatpush3.bf16.msra.mxu0 %v12503_v6  ;;  %9262 = vmatprep.mubr.msk.f32.mxu0 %vm13548_vm3, %v13499_v37  ;;  %v12746_v5 = vsub.f32 %v7598_v44, %v7598_v44 }
 0x34a   : > { %10182 = vmatprep.subr.bf16.mxu0 %v13547_v20  ;;  %v4667_v16 = vand.u32 4294901760, %v12610_v57 }
 0x34c   : > { %v4668_v62 = vsub.f32 %v12610_v57, %v4667_v16 }
 0x34d   : > { %10184 = vmatpush3.bf16.msra.mxu0 %v12526_v10 }
 0x34e   : > { %10185 = vmatprep.subr.bf16.mxu0 %v13547_v20  ;;  %v4669_v58 = vand.u32 4294901760, %v4668_v62 }
 0x350   : > { %v12702_v3 = vpack.c.bf16 %v4676_v23, %v4669_v58 }
 0x351   : > { %10187 = vmatpush3.bf16.msra.mxu0 %v12543_v50 }
 0x352   : > { %10188 = vmatprep.subr.bf16.mxu0 %v13547_v20 }
 0x355   : > { %10190 = vmatpush3.bf16.msra.mxu0 %v12547_v42 }
 0x356   : > { %10191 = vmatprep.subr.bf16.mxu0 %v13547_v20 }
 0x358   : > { %9263 = vmatmul.mubr.f32.vlgmr.msra.gmra.mrb[24].mxu0 %v13550_v14 }
 0x359   : > { %10193 = vmatpush3.bf16.msra.mxu0 %v12531_v45  ;;  %9281 = vmatprep.mubr.msk.f32.mxu0 %vm13548_vm3, %v13499_v37 }
 0x35a   : > { %10194 = vmatprep.subr.bf16.mxu0 %v13547_v20 }
 0x35d   : > { %10196 = vmatpush3.bf16.msra.mxu0 %v10195_v36  ;;  %v13552_v36 = vld [vmem:[#allocation16_spill] sm:$0xff] }
 0x35e   : > { %10197 = vmatprep.subr.bf16.mxu0 %v13547_v20 }
 0x361   : > { %10199 = vmatpush3.bf16.msra.mxu0 %v10198_v8  ;;  %v4688_v8 = vand.u32 4294901760, %v12649_v51 }
 0x362   : > { %10200 = vmatprep.subr.bf16.mxu0 %v13547_v20 }
 0x363   : > { %v4689_v29 = vsub.f32 %v12649_v51, %v4688_v8 }
 0x365   : > { %10202 = vmatpush3.bf16.msra.mxu0 %v10201_v40  ;;  %v7596_v40 = vsel %vm12435_vm12, 1.0, %v13499_v37  ;;  %v4690_v14 = vand.u32 4294901760, %v4689_v29 }
 0x366   : > { %10203 = vmatprep.subr.bf16.mxu0 %v13547_v20  ;;  %v12727_v0 = vsub.f32 %v7596_v40, %v7596_v40 }
 0x368   : > { %9282 = vmatmul.mubr.msk.f32.vlgmr.msra.gmra.mrb[24].mxu0 %vm4032_vm6, %v12474_v43  ;;  %v4723_v48 = vand.u32 4294901760, %v12727_v0 }
 0x369   : > { %10205 = vmatpush3.bf16.msra.mxu0 %v12503_v6  ;;  %9300 = vmatprep.mubr.msk.f32.mxu0 %vm13548_vm3, %v13499_v37  ;;  %v13551_v6 = vld [vmem:[#allocation15_spill] sm:$0xff] }
 0x36a   : > { %10206 = vmatprep.subr.bf16.mxu0 %v13547_v20  ;;  %v415_v25 = vand.u32 31, %v13551_v6  ;;  %v12729_v6 = vsub.f32 %v7597_v47, %v7597_v47  ;;  %v4724_v23 = vsub.f32 %v12727_v0, %v4723_v48 }
 0x36c   : > { %vm12623_vm1 = vcmp.eq.s32.totalorder %v415_v25, %v13498_v32  ;;  %v7599_v25 = vsel %vm12466_vm7, 1.0, %v13499_v37  ;;  %v4730_v59 = vand.u32 4294901760, %v12729_v6  ;;  %v4725_v47 = vand.u32 4294901760, %v4724_v23 }
 0x36d   : > { %10208 = vmatpush3.bf16.msra.mxu0 %v12526_v10  ;;  %v416_v10 = vand.u32 31, %v13552_v36  ;;  %v7600_v61 = vsel %vm12623_vm1, 1.0, %v13499_v37  ;;  %vm13571_vm7 = vnez %v13532_v19  ;;  %v5250_v19 = vand.u32 4294901760, %v5232_v33 }
 0x36e   : > { %10209 = vmatprep.subr.bf16.mxu0 %v13547_v20  ;;  %v4731_v56 = vsub.f32 %v12729_v6, %v4730_v59 }
 0x36f   : > { %vm12628_vm2 = vcmp.eq.s32.totalorder %v416_v10, %v13498_v32  ;;  %v4704_v10 = vand.u32 4294901760, %v4703_v9  ;;  %v12968_v21 = vpack.c.bf16 %v5250_v19, %v5247_v1 }
 0x370   : > { %vm12636_vm10 = vmpackc.low %vm12628_vm2, %vm12623_vm1  ;;  %v7601_v13 = vsel %vm12628_vm2, 1.0, %v13499_v37 }
 0x371   : > { %10211 = vmatpush3.bf16.msra.mxu0 %v12543_v50  ;;  %10235 = vmatpush3.bf16.msk.msra.mxu1 %vm12636_vm10, %v13453_v41  ;;  %v418_v50 = vand.u32 31, %v13560_v24  ;;  %v12738_v30 = vpack.c.bf16 %v4704_v10, %v4697_v15  ;;  %v4717_v24 = vsub.f32 %v12700_v54, %v4716_v11  ;;  %v12766_v29 = vsub.f32 %v7601_v13, %v7601_v13 }
 0x372   : > { %10212 = vmatprep.subr.bf16.mxu0 %v13547_v20  ;;  %10236 = vmatprep.subr.bf16.mxu1 %v13547_v20 }
 0x373   : > { %vm12664_vm11 = vcmp.eq.s32.totalorder %v418_v50, %v13498_v32  ;;  %v12748_v50 = vsub.f32 %v7599_v25, %v7599_v25  ;;  %v4718_v55 = vand.u32 4294901760, %v4717_v24  ;;  %v13397_v24 = vand.u32 4294901760, %v12766_v29 }
 0x374   : > { %v7603_v40 = vsel %vm12664_vm11, 1.0, %v13499_v37 }
 0x375   : > { %10214 = vmatpush3.bf16.msra.mxu0 %v12547_v42  ;;  %v13399_v44 = vand.u32 4294901760, %v12748_v50  ;;  %v12784_v15 = vsub.f32 %v7603_v40, %v7603_v40  ;;  %v5327_v42 = vsub.f32 %v5231_v4, %v5247_v1 }
 0x376   : > { %10359 = vmatprep.subr.bf16.mxu0 %v13547_v20 }
 0x377   : > { %v4745_v28 = vsub.f32 %v12748_v50, %v13399_v44 }
 0x378   : > { %9301 = vmatmul.mubr.msk.f32.vlgmr.msra.gmra.mrb[24].mxu0 %vm4032_vm6, %v12474_v43  ;;  %v7590_v43 = vsel %vm12356_vm15, 1.0, %v13499_v37  ;;  %vm12659_vm15 = vcmp.eq.s32.totalorder %v417_v2, %v13498_v32  ;;  %vm13578_vm6 = vcmask 1043456  }
 0x379   : > { %9521 = vmatprep.mubr.msk.f32.mxu0 %vm13548_vm3, %v13499_v37  ;;  %v12647_v7 = vsub.f32 %v7590_v43, %v7590_v43  ;;  %vm12681_vm13 = vmpackc.low %vm12664_vm11, %vm12659_vm15  ;;  %v4709_v43 = vand.u32 4294901760, %v12698_v49  ;;  %v7602_v45 = vsel %vm12659_vm15, 1.0, %v13499_v37  ;;  %v4746_v10 = vand.u32 4294901760, %v4745_v28  ;;  %10361 = vmatpush3.bf16.msra.mxu0 %v12968_v21 }
 0x37a   : > { %10238 = vmatpush3.bf16.msk.msra.mxu1 %vm12681_vm13, %v13453_v41  ;;  %v12782_v25 = vsub.f32 %v7602_v45, %v7602_v45  ;;  %v13395_v45 = vand.u32 4294901760, %v12784_v15  ;;  %10362 = vmatprep.subr.bf16.mxu0 %v13547_v20 }
 0x37b   : > { %10239 = vmatprep.subr.bf16.mxu1 %v13547_v20  ;;  %v4681_v35 = vand.u32 4294901760, %v12647_v7  ;;  %v4710_v2 = vsub.f32 %v12698_v49, %v4709_v43 }
 0x37d   : > { %v4682_v12 = vsub.f32 %v12647_v7, %v4681_v35  ;;  %v4711_v62 = vand.u32 4294901760, %v4710_v2 }
 0x37f   : > { %v4683_v53 = vand.u32 4294901760, %v4682_v12  ;;  %v10249_v58 = vpack.c.bf16 %v4718_v55, %v4711_v62  ;;  %v12764_v12 = vsub.f32 %v7600_v61, %v7600_v61  ;;  %v4759_v62 = vsub.f32 %v12766_v29, %v13397_v24 }
 0x381   : > { %v12734_v36 = vpack.c.bf16 %v4690_v14, %v4683_v53  ;;  %v4732_v53 = vand.u32 4294901760, %v4731_v56  ;;  %v13400_v14 = vand.u32 4294901760, %v12746_v5  ;;  %v13398_v2 = vand.u32 4294901760, %v12764_v12 }
 0x382   : > { %v4760_v23 = vand.u32 4294901760, %v4759_v62  ;;  %v13396_v56 = vand.u32 4294901760, %v12782_v25  ;;  %v10270_v62 = vpack.c.bf16 %v12687_v46, %v12685_v31  ;;  %v13574_v31 = vand.u32 4294901760, %v12764_v12 }
 0x383   : > { %v10252_v63 = vpack.c.bf16 %v4732_v53, %v4725_v47  ;;  %v4738_v9 = vsub.f32 %v12746_v5, %v13400_v14  ;;  %v4752_v13 = vsub.f32 %v12764_v12, %v13398_v2  ;;  %v4773_v53 = vsub.f32 %v12784_v15, %v13395_v45 }
 0x384   : > { %v4766_v47 = vsub.f32 %v12782_v25, %v13396_v56  ;;  %v13575_v46 = vand.u32 4294901760, %v12766_v29 }
 0x385   : > { %v4739_v60 = vand.u32 4294901760, %v4738_v9  ;;  %v4753_v55 = vand.u32 4294901760, %v4752_v13  ;;  %v4774_v28 = vand.u32 4294901760, %v4773_v53  ;;  %v10267_v13 = vpack.c.bf16 %v12649_v51, %v12647_v7 }
 0x386   : > { %v4767_v9 = vand.u32 4294901760, %v4766_v47  ;;  %v10279_v47 = vpack.c.bf16 %v12748_v50, %v12746_v5  ;;  %v10282_v53 = vpack.c.bf16 %v12766_v29, %v12764_v12  ;;  %v13573_v7 = vand.u32 4294901760, %v12748_v50 }
 0x387   : > { %v10255_v61 = vpack.c.bf16 %v4746_v10, %v4739_v60  ;;  %v10258_v40 = vpack.c.bf16 %v4760_v23, %v4753_v55  ;;  %v10264_v10 = vpack.c.bf16 %v12612_v18, %v12610_v57  ;;  %v10273_v55 = vpack.c.bf16 %v12700_v54, %v12698_v49 }
 0x388   : > { %v10261_v60 = vpack.c.bf16 %v4774_v28, %v4767_v9  ;;  %v10276_v23 = vpack.c.bf16 %v12729_v6, %v12727_v0  ;;  %v10285_v9 = vpack.c.bf16 %v12784_v15, %v12782_v25  ;;  %v10318_v57 = vpack.c.bf16 %v4702_v26, %v4695_v34 }
 0x389   : > { %v10321_v18 = vpack.c.bf16 %v4716_v11, %v4709_v43  ;;  %v13577_v49 = vand.u32 4294901760, %v12784_v15  ;;  %v5334_v34 = vsub.f32 %v5232_v33, %v5250_v19  ;;  %v5253_v26 = vand.u32 4294901760, %v5233_v17 }
 0x38a   : > { %v5256_v0 = vand.u32 4294901760, %v5234_v39  ;;  %v5328_v43 = vand.u32 4294901760, %v5327_v42 }
 0x38b   : > { %v5341_v6 = vsub.f32 %v5233_v17, %v5253_v26  ;;  %v5335_v11 = vand.u32 4294901760, %v5334_v34 }
 0x38c   : > { %v5329_v50 = vsub.f32 %v5327_v42, %v5328_v43 }
 0x38d   : > { %v5342_v12 = vand.u32 4294901760, %v5341_v6 }
 0x44b   : > { %v4569_v28 = vpop.f32.mrb[24].mxu0 }
 0x44c   : > { %v12818_v45 = vand.u32 4294901760, %v4569_v28  ;;  %v9302_v56 = vpop.f32.mrb[25].mxu0 }
 0x44d   : > { %v10384_v56 = vpack.c.bf16 %v5335_v11, %v5328_v43 }
 0x44e   : > { %v4655_v24 = vsub.f32 %v4569_v28, %v12818_v45 }
 0x450   : > { %v4656_v2 = vand.u32 4294901760, %v4655_v24 }
 0x452   : > { %v4657_v44 = vsub.f32 %v4655_v24, %v4656_v2 }
 0x454   : > { %v4658_v14 = vand.u32 4294901760, %v4657_v44  ;;  %v5343_v44 = vsub.f32 %v5341_v6, %v5342_v12 }
 0x456   : > { %9336 = vmatmul.mubr.f32.vlgmr.msra.gmra.mrb[16].mxu1 %v4658_v14 }
 0x457   : > { %10241 = vmatpush3.bf16.msra.mxu1 %v12702_v3  ;;  %9370 = vmatprep.mubr.msk.f32.mxu1 %vm13548_vm3, %v13499_v37  ;;  %v10312_v3 = vpack.c.bf16 %v4674_v22, %v4667_v16  ;;  %v10324_v16 = vpack.c.bf16 %v4730_v59, %v4723_v48  ;;  %v13572_v22 = vand.u32 4294901760, %v12746_v5  ;;  %v5348_v5 = vsub.f32 %v5234_v39, %v5256_v0 }
 0x458   : > { %10242 = vmatprep.subr.bf16.mxu1 %v13547_v20  ;;  %v5336_v48 = vsub.f32 %v5334_v34, %v5335_v11  ;;  %v5330_v59 = vand.u32 4294901760, %v5329_v50 }
 0x459   : > { %v10327_v51 = vpack.c.bf16 %v13573_v7, %v13572_v22  ;;  %v5349_v29 = vand.u32 4294901760, %v5348_v5  ;;  %v7772_v22 = vld [vmem:[%s13312_s4] ss:$0 sm:$0xff] }
 0x45b   : > { %10244 = vmatpush3.bf16.msra.mxu1 %v12734_v36  ;;  %v10315_v36 = vpack.c.bf16 %v4688_v8, %v4681_v35  ;;  %v10330_v35 = vpack.c.bf16 %v13575_v46, %v13574_v31  ;;  %v13576_v8 = vand.u32 4294901760, %v12782_v25  ;;  %v5344_v25 = vand.u32 4294901760, %v5343_v44 }
 0x45c   : > { %10245 = vmatprep.subr.bf16.mxu1 %v13547_v20 }
 0x45d   : > { %v10333_v54 = vpack.c.bf16 %v13577_v49, %v13576_v8 }
 0x45f   : > { %10247 = vmatpush3.bf16.msra.mxu1 %v12738_v30  ;;  %v10363_v30 = vpack.c.bf16 %v5256_v0, %v5253_v26 }
 0x460   : > { %10248 = vmatprep.subr.bf16.mxu1 %v13547_v20 }
 0x461   : > { %10364 = vmatpush3.bf16.msra.mxu0 %v10363_v30 }
 0x462   : > { %10365 = vmatprep.subr.bf16.mxu0 %v13547_v20 }
 0x463   : > { %10250 = vmatpush3.bf16.msra.mxu1 %v10249_v58  ;;  %v5337_v58 = vand.u32 4294901760, %v5336_v48 }
 0x464   : > { %10251 = vmatprep.subr.bf16.mxu1 %v13547_v20 }
 0x465   : > { %v10366_v14 = vpack.c.bf16 %v5337_v58, %v5330_v59 }
 0x467   : > { %10253 = vmatpush3.bf16.msra.mxu1 %v10252_v63  ;;  %v5350_v63 = vsub.f32 %v5348_v5, %v5349_v29 }
 0x468   : > { %10254 = vmatprep.subr.bf16.mxu1 %v13547_v20 }
 0x469   : > { %v5351_v15 = vand.u32 4294901760, %v5350_v63 }
 0x46b   : > { %10256 = vmatpush3.bf16.msra.mxu1 %v10255_v61  ;;  %v10375_v61 = vpack.c.bf16 %v5348_v5, %v5341_v6  ;;  %v10750_v5 = vmov 1.0  }
 0x46c   : > { %10257 = vmatprep.subr.bf16.mxu1 %v13547_v20 }
 0x46f   : > { %10259 = vmatpush3.bf16.msra.mxu1 %v10258_v40 }
 0x470   : > { %10260 = vmatprep.subr.bf16.mxu1 %v13547_v20 }
 0x473   : > { %10262 = vmatpush3.bf16.msra.mxu1 %v10261_v60  ;;  %v7770_v60 = vld [vmem:[%s13309_s1] ss:$0 sm:$0xff] }
 0x474   : > { %10263 = vmatprep.subr.bf16.mxu1 %v13547_v20 }
 0x476   : > { %9371 = vmatmul.mubr.f32.vlgmr.msra.gmra.mrb[16].mxu1 %v12818_v45 }
 0x477   : > { %10265 = vmatpush3.bf16.msra.mxu1 %v10264_v10  ;;  %9405 = vmatprep.mubr.msk.f32.mxu1 %vm13548_vm3, %v13499_v37 }
 0x478   : > { %10266 = vmatprep.subr.bf16.mxu1 %v13547_v20 }
 0x47b   : > { %10268 = vmatpush3.bf16.msra.mxu1 %v10267_v13 }
 0x47c   : > { %10269 = vmatprep.subr.bf16.mxu1 %v13547_v20 }
 0x47f   : > { %10271 = vmatpush3.bf16.msra.mxu1 %v10270_v62  ;;  %v7771_v62 = vld [vmem:[%s13310_s2] ss:$0 sm:$0xff] }
 0x480   : > { %10272 = vmatprep.subr.bf16.mxu1 %v13547_v20 }
 0x483   : > { %10274 = vmatpush3.bf16.msra.mxu1 %v10273_v55 }
 0x484   : > { %10275 = vmatprep.subr.bf16.mxu1 %v13547_v20 }
 0x487   : > { %10277 = vmatpush3.bf16.msra.mxu1 %v10276_v23 }
 0x488   : > { %10278 = vmatprep.subr.bf16.mxu1 %v13547_v20 }
 0x48b   : > { %10280 = vmatpush3.bf16.msra.mxu1 %v10279_v47 }
 0x48c   : > { %10281 = vmatprep.subr.bf16.mxu1 %v13547_v20 }
 0x48f   : > { %10283 = vmatpush3.bf16.msra.mxu1 %v10282_v53 }
 0x490   : > { %10284 = vmatprep.subr.bf16.mxu1 %v13547_v20 }
 0x493   : > { %10286 = vmatpush3.bf16.msra.mxu1 %v10285_v9 }
 0x494   : > { %10287 = vmatprep.subr.bf16.mxu1 %v13547_v20 }
 0x496   : > { %9406 = vmatmul.mubr.f32.vlgmr.msra.gmra.mrb[16].mxu1 %v4655_v24  ;;  %v10372_v24 = vpack.c.bf16 %v5334_v34, %v5327_v42 }
 0x497   : > { %10289 = vmatpush3.bf16.msk.msra.mxu1 %vm13568_vm14, %v13453_v41  ;;  %9440 = vmatprep.mubr.msk.f32.mxu1 %vm13548_vm3, %v13499_v37 }
 0x498   : > { %10290 = vmatprep.subr.bf16.mxu1 %v13547_v20 }
 0x49b   : > { %10292 = vmatpush3.bf16.msk.msra.mxu1 %vm13569_vm5, %v13453_v41 }
 0x49c   : > { %10293 = vmatprep.subr.bf16.mxu1 %v13547_v20 }
 0x49f   : > { %10295 = vmatpush3.bf16.msk.msra.mxu1 %vm13570_vm8, %v13453_v41 }
 0x4a0   : > { %10296 = vmatprep.subr.bf16.mxu1 %v13547_v20 }
 0x4a3   : > { %10298 = vmatpush3.bf16.msk.msra.mxu1 %vm13571_vm7, %v13453_v41 }
 0x4a4   : > { %10299 = vmatprep.subr.bf16.mxu1 %v13547_v20 }
 0x4a7   : > { %10301 = vmatpush3.bf16.msk.msra.mxu1 %vm12456_vm0, %v13453_v41 }
 0x4a8   : > { %10302 = vmatprep.subr.bf16.mxu1 %v13547_v20 }
 0x4ab   : > { %10304 = vmatpush3.bf16.msk.msra.mxu1 %vm12481_vm4, %v13453_v41 }
 0x4ac   : > { %10305 = vmatprep.subr.bf16.mxu1 %v13547_v20 }
 0x4af   : > { %10307 = vmatpush3.bf16.msk.msra.mxu1 %vm12636_vm10, %v13453_v41 }
 0x4b0   : > { %10308 = vmatprep.subr.bf16.mxu1 %v13547_v20 }
 0x4b3   : > { %10310 = vmatpush3.bf16.msk.msra.mxu1 %vm12681_vm13, %v13453_v41 }
 0x4b4   : > { %10311 = vmatprep.subr.bf16.mxu1 %v13547_v20 }
 0x4b6   : > { %9441 = vmatmul.mubr.f32.vlgmr.msra.gmra.mrb[16].mxu1 %v4656_v2  ;;  %v10369_v2 = vpack.c.bf16 %v5351_v15, %v5344_v25 }
 0x4b7   : > { %10313 = vmatpush3.bf16.msra.mxu1 %v10312_v3  ;;  %9475 = vmatprep.mubr.msk.f32.mxu1 %vm13548_vm3, %v13499_v37 }
 0x4b8   : > { %10314 = vmatprep.subr.bf16.mxu1 %v13547_v20 }
 0x4bb   : > { %10316 = vmatpush3.bf16.msra.mxu1 %v10315_v36 }
 0x4bc   : > { %10317 = vmatprep.subr.bf16.mxu1 %v13547_v20 }
 0x4bf   : > { %10319 = vmatpush3.bf16.msra.mxu1 %v10318_v57  ;;  %v5758_v57 = vld [vmem:[%s13313_s5] sm:$0xf] }
 0x4c0   : > { %10320 = vmatprep.subr.bf16.mxu1 %v13547_v20 }
 0x4c3   : > { %10322 = vmatpush3.bf16.msra.mxu1 %v10321_v18  ;;  %v5770_v18 = vsel %vm13578_vm6, %v5758_v57, 0 }
 0x4c4   : > { %10323 = vmatprep.subr.bf16.mxu1 %v13547_v20 }
 0x4c7   : > { %10325 = vmatpush3.bf16.msra.mxu1 %v10324_v16  ;;  %v5773_v16 = vand.u32 4294901760, %v5770_v18 }
 0x4c8   : > { %10326 = vmatprep.subr.bf16.mxu1 %v13547_v20 }
 0x4cb   : > { %10328 = vmatpush3.bf16.msra.mxu1 %v10327_v51 }
 0x4cc   : > { %10329 = vmatprep.subr.bf16.mxu1 %v13547_v20 }
 0x4cf   : > { %10331 = vmatpush3.bf16.msra.mxu1 %v10330_v35 }
 0x4d0   : > { %10332 = vmatprep.subr.bf16.mxu1 %v13547_v20 }
 0x4d3   : > { %10334 = vmatpush3.bf16.msra.mxu1 %v10333_v54 }
 0x4d4   : > { %10335 = vmatprep.subr.bf16.mxu1 %v13547_v20 }
 0x4d6   : > { %9476 = vmatmul.mubr.f32.vlgmr.msra.gmra.mrb[16].mxu1 %v12818_v45 }
 0x4d7   : > { %10337 = vmatpush3.bf16.msk.msra.mxu1 %vm13568_vm14, %v13453_v41  ;;  %9510 = vmatprep.mubr.msk.f32.mxu1 %vm13548_vm3, %v13499_v37 }
 0x4d8   : > { %10338 = vmatprep.subr.bf16.mxu1 %v13547_v20 }
 0x4db   : > { %10340 = vmatpush3.bf16.msk.msra.mxu1 %vm13569_vm5, %v13453_v41 }
 0x4dc   : > { %10341 = vmatprep.subr.bf16.mxu1 %v13547_v20 }
 0x4df   : > { %10343 = vmatpush3.bf16.msk.msra.mxu1 %vm13570_vm8, %v13453_v41 }
 0x4e0   : > { %10344 = vmatprep.subr.bf16.mxu1 %v13547_v20 }
 0x4e3   : > { %10346 = vmatpush3.bf16.msk.msra.mxu1 %vm13571_vm7, %v13453_v41 }
 0x4e4   : > { %10347 = vmatprep.subr.bf16.mxu1 %v13547_v20 }
 0x4e7   : > { %10349 = vmatpush3.bf16.msk.msra.mxu1 %vm12456_vm0, %v13453_v41  ;;  %vm5242_vm0 = vcmask 261120  }
 0x4e8   : > { %10350 = vmatprep.subr.bf16.mxu1 %v13547_v20 }
 0x4eb   : > { %10352 = vmatpush3.bf16.msk.msra.mxu1 %vm12481_vm4, %v13453_v41  ;;  %vm13579_vm4 = vcmask 31744  }
 0x4ec   : > { %10353 = vmatprep.subr.bf16.mxu1 %v13547_v20 }
 0x4ef   : > { %10355 = vmatpush3.bf16.msk.msra.mxu1 %vm12636_vm10, %v13453_v41 }
 0x4f0   : > { %10356 = vmatprep.subr.bf16.mxu1 %v13547_v20 }
 0x4f3   : > { %10358 = vmatpush3.bf16.msk.msra.mxu1 %vm12681_vm13, %v13453_v41 }
 0x4f6   : > { %9511 = vmatmul.mubr.f32.vlgmr.msra.gmra.mrb[16].mxu1 %v12818_v45  ;;  %v10387_v45 = vpack.c.bf16 %v5349_v29, %v5342_v12  ;;  %v5850_v12 = vsub.f32 %v5770_v18, %v5773_v16 }
 0x4f8   : > { %v5851_v44 = vand.u32 4294901760, %v5850_v12 }
 0x4fa   : > { %v5852_v15 = vsub.f32 %v5850_v12, %v5851_v44 }
 0x5c9   : > { %v5210_v40 = vpop.f32.mrb[16].mxu1 }
 0x5ca   : > { %v5215_v10 = vmul.f32 0.015625, %v5210_v40  ;;  %v9512_v13 = vpop.f32.mrb[17].mxu1 }
 0x5cc   : > { %v5222_v55 = vmul.f32 %v7770_v60, %v5215_v10  ;;  %v13582_v60 = vld [vmem:[#allocation6_spill] sm:$0xff] }
 0x5ce   : > { %v5230_v23 = vadd.f32 %v7771_v62, %v5222_v55 }
 0x5d0   : > { %v5244_v47 = vsel %vm5242_vm0, %v5230_v23, 0 }
 0x5d1   : > { %v5315_v53 = vand.u32 4294901760, %v5244_v47 }
 0x5d3   : > { %v5316_v9 = vsub.f32 %v5244_v47, %v5315_v53 }
 0x5d5   : > { %v5317_v28 = vand.u32 4294901760, %v5316_v9 }
 0x5d7   : > { %v5318_v3 = vsub.f32 %v5316_v9, %v5317_v28 }
 0x5d9   : > { %v5319_v36 = vand.u32 4294901760, %v5318_v3 }
 0x5db   : > { %9522 = vmatmul.mubr.f32.vlgmr.msra.gmra.mrb[26].mxu0 %v5319_v36 }
 0x5dc   : > { %10367 = vmatpush3.bf16.msra.mxu0 %v10366_v14  ;;  %9532 = vmatprep.mubr.msk.f32.mxu0 %vm13548_vm3, %v13499_v37 }
 0x5dd   : > { %10368 = vmatprep.subr.bf16.mxu0 %v13547_v20 }
 0x5e0   : > { %10370 = vmatpush3.bf16.msra.mxu0 %v10369_v2 }
 0x5e1   : > { %10371 = vmatprep.subr.bf16.mxu0 %v13547_v20 }
 0x5e3   : > { %9533 = vmatmul.mubr.f32.vlgmr.msra.gmra.mrb[26].mxu0 %v5315_v53 }
 0x5e4   : > { %10373 = vmatpush3.bf16.msra.mxu0 %v10372_v24  ;;  %9543 = vmatprep.mubr.msk.f32.mxu0 %vm13548_vm3, %v13499_v37 }
 0x5e5   : > { %10374 = vmatprep.subr.bf16.mxu0 %v13547_v20 }
 0x5e8   : > { %10376 = vmatpush3.bf16.msra.mxu0 %v10375_v61  ;;  %v5853_v61 = vand.u32 4294901760, %v5852_v15  ;;  %v13594_v15 = vld [vmem:[#allocation9_spill] sm:$0xff] }
 0x5e9   : > { %10377 = vmatprep.subr.bf16.mxu0 %v13547_v20 }
 0x5eb   : > { %9544 = vmatmul.mubr.f32.vlgmr.msra.gmra.mrb[26].mxu0 %v5316_v9 }
 0x5ec   : > { %10379 = vmatpush3.bf16.msra.mxu0 %v12968_v21  ;;  %9554 = vmatprep.mubr.msk.f32.mxu0 %vm13548_vm3, %v13499_v37 }
 0x5ed   : > { %10380 = vmatprep.subr.bf16.mxu0 %v13547_v20 }
 0x5f0   : > { %10382 = vmatpush3.bf16.msra.mxu0 %v10363_v30 }
 0x5f1   : > { %10383 = vmatprep.subr.bf16.mxu0 %v13547_v20 }
 0x5f3   : > { %9555 = vmatmul.mubr.f32.vlgmr.msra.gmra.mrb[26].mxu0 %v5317_v28 }
 0x5f4   : > { %10385 = vmatpush3.bf16.msra.mxu0 %v10384_v56  ;;  %9565 = vmatprep.mubr.msk.f32.mxu0 %vm13548_vm3, %v13499_v37 }
 0x5f5   : > { %10386 = vmatprep.subr.bf16.mxu0 %v13547_v20 }
 0x5f8   : > { %10388 = vmatpush3.bf16.msra.mxu0 %v10387_v45  ;;  %v467_v45 = vand.u32 31, %v13498_v32 }
 0x5f9   : > { %10389 = vmatprep.subr.bf16.mxu0 %v13547_v20 }
 0x5fa   : > { %vm468_vm1 = vcmp.eq.s32.totalorder %v467_v45, %v13497_v38  ;;  %vm469_vm2 = vcmp.eq.s32.totalorder %v467_v45, %v13500_v52  ;;  %vm470_vm15 = vcmp.eq.s32.totalorder %v467_v45, %v13501_v27  ;;  %vm471_vm11 = vcmp.eq.s32.totalorder %v467_v45, %v13582_v60 }
 0x5fb   : > { %9566 = vmatmul.mubr.f32.vlgmr.msra.gmra.mrb[26].mxu0 %v5315_v53  ;;  %vm13033_vm10 = vmpackc.low %vm469_vm2, %vm468_vm1  ;;  %v7604_v13 = vsel %vm468_vm1, 1.0, %v13499_v37  ;;  %v7605_v62 = vsel %vm469_vm2, 1.0, %v13499_v37  ;;  %v7606_v47 = vsel %vm470_vm15, 1.0, %v13499_v37 }
 0x5fc   : > { %10391 = vmatpush3.bf16.msra.mxu0 %v12968_v21  ;;  %9576 = vmatprep.mubr.msk.f32.mxu0 %vm13548_vm3, %v13499_v37  ;;  %vm13043_vm13 = vmpackc.low %vm471_vm11, %vm470_vm15  ;;  %v6308_v55 = vsub.f32 %v7604_v13, %v7604_v13  ;;  %v6315_v23 = vsub.f32 %v7605_v62, %v7605_v62  ;;  %v6322_v9 = vsub.f32 %v7606_v47, %v7606_v47 }
 0x5fd   : > { %10392 = vmatprep.subr.bf16.mxu0 %v13547_v20 }
 0x5fe   : > { %v6309_v3 = vand.u32 4294901760, %v6308_v55  ;;  %v6316_v36 = vand.u32 4294901760, %v6315_v23 }
 0x600   : > { %10394 = vmatpush3.bf16.msra.mxu0 %v10363_v30  ;;  %v6310_v57 = vsub.f32 %v6308_v55, %v6309_v3  ;;  %v6317_v18 = vsub.f32 %v6315_v23, %v6316_v36 }
 0x601   : > { %9579 = vmatprep.subr.mxu0 %v13499_v37 }
 0x603   : > { %9577 = vmatmul.mubr.f32.vlgmr.msra.gmra.mrb[26].mxu0 %v5315_v53  ;;  %v7607_v53 = vsel %vm471_vm11, 1.0, %v13499_v37 }
 0x604   : > { %9581 = vmatprep.mubr.msk.f32.mxu0 %vm13548_vm3, %v13499_v37  ;;  %9580 = vmatpush3.msra.mxu0 %v5773_v16  ;;  %v6329_v28 = vsub.f32 %v7607_v53, %v7607_v53 }
 0x605   : > { %9584 = vmatprep.subr.mxu0 %v13499_v37 }
 0x6d6   : > { %v5727_v7 = vpop.f32.mrb[26].mxu0 }
 0x6d7   : > { %v10441_v51 = vadd.f32 %v7772_v22, %v5727_v7  ;;  %v9578_v31 = vpop.f32.mrb[27].mxu0  ;;  %v6318_v22 = vand.u32 4294901760, %v6317_v18  ;;  %v6323_v7 = vand.u32 4294901760, %v6322_v9 }
 0x6d9   : > { %v5732_v46 = vmul.f32 0.70710677, %v10441_v51  ;;  %v5731_v59 = vmul.f32 0.5, %v10441_v51  ;;  %v6330_v51 = vand.u32 4294901760, %v6329_v28 }
 0x6db   : > { %v5735_v35 = vand.u32 2147483647, %v5732_v46  ;;  %vm5733_vm12 = vcmp.lt.f32.partialorder %v5732_v46, 0.0  ;;  %v6324_v46 = vsub.f32 %v6322_v9, %v6323_v7 }
 0x6dc   : > { %v5734_v50 = vsel %vm5733_vm12, -1.0, %v10750_v5 }
 0x6dd   : > { %v5736_v8 = vmul.f32 0.3275911, %v5735_v35  ;;  %v5749_v54 = vsub.f32 0.0, %v5735_v35 }
 0x6df   : > { %v5737_v49 = vadd.f32 1.0, %v5736_v8  ;;  %v5750_v33 = vmul.f32 %v5749_v54, %v5735_v35  ;;  %v6331_v35 = vsub.f32 %v6329_v28, %v6330_v51  ;;  %v6325_v8 = vand.u32 4294901760, %v6324_v46 }
 0x6e1   : > { %10714 = vrcp.f32 %v5737_v49  ;;  %v5751_v17 = vmul.f32 1.442695, %v5750_v33  ;;  %v6332_v49 = vand.u32 4294901760, %v6331_v35  ;;  %v10411_v33 = vpack.c.bf16 %v6329_v28, %v6322_v9 }
 0x6e3   : > { %10716 = vpow2.f32 %v5751_v17  ;;  %v10405_v54 = vpack.c.bf16 %v6332_v49, %v6325_v8  ;;  %v7773_v17 = vld [vmem:[%s13314_s6] ss:$0 sm:$0xff] }
 0x6eb   : > { %v10715_v4 = vpop.eup %10714 }
 0x6ec   : > { %v5740_v1 = vmul.f32 1.0614054, %v10715_v4 }
 0x6ed   : > { %v10717_v43 = vpop.eup %10716 }
 0x6ee   : > { %v5741_v19 = vadd.f32 -1.4531521, %v5740_v1  ;;  %v10420_v1 = vpack.c.bf16 %v6316_v36, %v6309_v3 }
 0x6f0   : > { %v5742_v39 = vmul.f32 %v10715_v4, %v5741_v19  ;;  %v10423_v19 = vpack.c.bf16 %v6330_v51, %v6323_v7 }
 0x6f2   : > { %v5743_v21 = vadd.f32 1.4214138, %v5742_v39 }
 0x6f4   : > { %v5744_v42 = vmul.f32 %v10715_v4, %v5743_v21 }
 0x6f6   : > { %v5745_v34 = vadd.f32 -0.28449672, %v5744_v42 }
 0x6f8   : > { %v5746_v26 = vmul.f32 %v10715_v4, %v5745_v34 }
 0x6fa   : > { %v5747_v0 = vadd.f32 0.2548296, %v5746_v26 }
 0x6fc   : > { %v5748_v6 = vmul.f32 %v10715_v4, %v5747_v0  ;;  %v10408_v4 = vpack.c.bf16 %v6315_v23, %v6308_v55 }
 0x6fe   : > { %v5753_v11 = vmul.f32 %v10717_v43, %v5748_v6 }
 0x700   : > { %v5754_v30 = vsub.f32 1.0, %v5753_v11 }
 0x702   : > { %v5755_v48 = vmul.f32 %v5754_v30, %v5734_v50 }
 0x704   : > { %v5756_v58 = vadd.f32 1.0, %v5755_v48 }
 0x706   : > { %v5757_v29 = vmul.f32 %v5756_v58, %v5731_v59  ;;  %v487_v59 = vmul.u32 16, %v13498_v32 }
 0x708   : > { %v5767_v14 = vsel %vm13579_vm4, %v5757_v29, 0  ;;  %v496_v58 = vadd.s32 16, %v487_v59  ;;  %vm490_vm9 = vcmp.ge.s32.totalorder %v13501_v27, %v487_v59  ;;  %vm491_vm8 = vcmp.ge.s32.totalorder %v13582_v60, %v487_v59  ;;  %v13588_v29 = vld [vmem:[#allocation7_spill] sm:$0xff] }
 0x709   : > { %v5838_v63 = vand.u32 4294901760, %v5767_v14  ;;  %vm492_vm6 = vcmp.ge.s32.totalorder %v13588_v29, %v487_v59  ;;  %vm494_vm15 = vcmp.ge.s32.totalorder %v13594_v15, %v487_v59 }
 0x70a   : > { %vm499_vm14 = vcmp.lt.s32.totalorder %v13501_v27, %v496_v58  ;;  %vm500_vm7 = vcmp.lt.s32.totalorder %v13582_v60, %v496_v58  ;;  %vm501_vm12 = vcmp.lt.s32.totalorder %v13588_v29, %v496_v58  ;;  %vm503_vm11 = vcmp.lt.s32.totalorder %v13594_v15, %v496_v58 }
 0x70b   : > { %v5839_v25 = vsub.f32 %v5767_v14, %v5838_v63  ;;  %vm507_vm5 = vmand %vm490_vm9, %vm499_vm14  ;;  %v13591_v14 = vld [vmem:[#allocation8_spill] sm:$0xff] }
 0x70c   : > { %vm493_vm1 = vcmp.ge.s32.totalorder %v13591_v14, %v487_v59  ;;  %vm502_vm2 = vcmp.lt.s32.totalorder %v13591_v14, %v496_v58  ;;  %vm13125_vm9 = vmand %vm494_vm15, %vm503_vm11 }
 0x70d   : > { %v5840_v2 = vand.u32 4294901760, %v5839_v25  ;;  %v13173_v9 = vsel %vm13125_vm9, 1.0, %v13499_v37  ;;  %vm13607_vm9 = vcmask 1043456  }
 0x70f   : > { %v5841_v24 = vsub.f32 %v5839_v25, %v5840_v2 }
 0x711   : > { %v5842_v56 = vand.u32 4294901760, %v5841_v24 }
 0x713   : > { %9582 = vmatmul.mubr.f32.vlgmr.msra.gmra.mrb[28].mxu0 %v5842_v56 }
 0x714   : > { %9585 = vmatpush3.msra.mxu0 %v5853_v61  ;;  %9586 = vmatprep.mubr.msk.f32.mxu0 %vm13548_vm3, %v13499_v37 }
 0x715   : > { %9589 = vmatprep.subr.mxu0 %v13499_v37 }
 0x71b   : > { %9587 = vmatmul.mubr.f32.vlgmr.msra.gmra.mrb[28].mxu0 %v5838_v63 }
 0x71c   : > { %9590 = vmatpush3.msra.mxu0 %v5850_v12  ;;  %9591 = vmatprep.mubr.msk.f32.mxu0 %vm13548_vm3, %v13499_v37  ;;  %v13096_v12 = vsel %vm507_vm5, 1.0, %v13499_v37 }
 0x71d   : > { %9594 = vmatprep.subr.mxu0 %v13499_v37 }
 0x723   : > { %9592 = vmatmul.mubr.f32.vlgmr.msra.gmra.mrb[28].mxu0 %v5839_v25 }
 0x724   : > { %9595 = vmatpush3.msra.mxu0 %v5773_v16  ;;  %9596 = vmatprep.mubr.msk.f32.mxu0 %vm13548_vm3, %v13499_v37 }
 0x725   : > { %9599 = vmatprep.subr.mxu0 %v13499_v37 }
 0x72b   : > { %9597 = vmatmul.mubr.f32.vlgmr.msra.gmra.mrb[28].mxu0 %v5840_v2  ;;  %v13595_v2 = vld [vmem:[#allocation10_spill] sm:$0xff] }
 0x72c   : > { %9600 = vmatpush3.msra.mxu0 %v5851_v44  ;;  %9601 = vmatprep.mubr.msk.f32.mxu0 %vm13548_vm3, %v13499_v37  ;;  %vm504_vm14 = vcmp.lt.s32.totalorder %v13595_v2, %v496_v58 }
 0x72d   : > { %9604 = vmatprep.subr.mxu0 %v13499_v37 }
 0x733   : > { %9602 = vmatmul.mubr.f32.vlgmr.msra.gmra.mrb[28].mxu0 %v5838_v63 }
 0x734   : > { %9605 = vmatpush3.msra.mxu0 %v5773_v16  ;;  %9606 = vmatprep.mubr.msk.f32.mxu0 %vm13548_vm3, %v13499_v37  ;;  %v6311_v16 = vand.u32 4294901760, %v6310_v57 }
 0x735   : > { %10395 = vmatprep.subr.bf16.mxu0 %v13547_v20 }
 0x736   : > { %v10402_v31 = vpack.c.bf16 %v6318_v22, %v6311_v16 }
 0x73b   : > { %9607 = vmatmul.mubr.f32.vlgmr.msra.gmra.mrb[28].mxu0 %v5838_v63 }
 0x73c   : > { %9617 = vmatprep.mubr.msk.f32.mxu0 %vm13548_vm3, %v13499_v37  ;;  %10397 = vmatpush3.bf16.msk.msra.mxu0 %vm13033_vm10, %v13453_v41 }
 0x73d   : > { %10398 = vmatprep.subr.bf16.mxu0 %v13547_v20 }
 0x740   : > { %10400 = vmatpush3.bf16.msk.msra.mxu0 %vm13043_vm13, %v13453_v41 }
 0x741   : > { %10401 = vmatprep.subr.bf16.mxu0 %v13547_v20 }
 0x80e   : > { %v6214_v39 = vpop.f32.mrb[28].mxu0 }
 0x80f   : > { %v10442_v21 = vadd.f32 %v7773_v17, %v6214_v39  ;;  %v9608_v42 = vpop.f32.mrb[29].mxu0 }
 0x811   : > { %v7774_v34 = vmul.f32 -1.442695, %v10442_v21 }
 0x813   : > { %10718 = vpow2.f32 %v7774_v34 }
 0x81d   : > { %v10719_v26 = vpop.eup %10718 }
 0x81e   : > { %v6221_v0 = vadd.f32 1.0, %v10719_v26 }
 0x820   : > { %10720 = vrcp.f32 %v6221_v0 }
 0x82a   : > { %v10721_v6 = vpop.eup %10720 }
 0x82b   : > { %v6225_v43 = vsel %vm5242_vm0, %v10721_v6, 0  ;;  %vm13587_vm0 = vmmov %vm13579_vm4 }
 0x82c   : > { %v6296_v11 = vand.u32 4294901760, %v6225_v43  ;;  %vm13108_vm4 = vmand %vm492_vm6, %vm501_vm12  ;;  %vm489_vm6 = vcmp.ge.s32.totalorder %v13500_v52, %v487_v59  ;;  %vm498_vm12 = vcmp.lt.s32.totalorder %v13500_v52, %v496_v58 }
 0x82d   : > { %v13157_v62 = vsel %vm13108_vm4, 1.0, %v13499_v37 }
 0x82e   : > { %v6297_v30 = vsub.f32 %v6225_v43, %v6296_v11 }
 0x830   : > { %v6298_v5 = vand.u32 4294901760, %v6297_v30 }
 0x832   : > { %v6299_v50 = vsub.f32 %v6297_v30, %v6298_v5 }
 0x834   : > { %v6300_v48 = vand.u32 4294901760, %v6299_v50 }
 0x836   : > { %9618 = vmatmul.mubr.f32.vlgmr.msra.gmra.mrb[30].mxu0 %v6300_v48 }
 0x837   : > { %10403 = vmatpush3.bf16.msra.mxu0 %v10402_v31  ;;  %9628 = vmatprep.mubr.msk.f32.mxu0 %vm13548_vm3, %v13499_v37 }
 0x838   : > { %10404 = vmatprep.subr.bf16.mxu0 %v13547_v20 }
 0x83b   : > { %10406 = vmatpush3.bf16.msra.mxu0 %v10405_v54 }
 0x83c   : > { %10407 = vmatprep.subr.bf16.mxu0 %v13547_v20 }
 0x83e   : > { %9629 = vmatmul.mubr.f32.vlgmr.msra.gmra.mrb[30].mxu0 %v6296_v11 }
 0x83f   : > { %10409 = vmatpush3.bf16.msra.mxu0 %v10408_v4  ;;  %9639 = vmatprep.mubr.msk.f32.mxu0 %vm13548_vm3, %v13499_v37 }
 0x840   : > { %10410 = vmatprep.subr.bf16.mxu0 %v13547_v20 }
 0x843   : > { %10412 = vmatpush3.bf16.msra.mxu0 %v10411_v33 }
 0x844   : > { %10413 = vmatprep.subr.bf16.mxu0 %v13547_v20 }
 0x846   : > { %9640 = vmatmul.mubr.f32.vlgmr.msra.gmra.mrb[30].mxu0 %v6297_v30 }
 0x847   : > { %10415 = vmatpush3.bf16.msk.msra.mxu0 %vm13033_vm10, %v13453_v41  ;;  %9650 = vmatprep.mubr.msk.f32.mxu0 %vm13548_vm3, %v13499_v37 }
 0x848   : > { %10416 = vmatprep.subr.bf16.mxu0 %v13547_v20 }
 0x84b   : > { %10418 = vmatpush3.bf16.msk.msra.mxu0 %vm13043_vm13, %v13453_v41 }
 0x84c   : > { %10419 = vmatprep.subr.bf16.mxu0 %v13547_v20 }
 0x84e   : > { %9651 = vmatmul.mubr.f32.vlgmr.msra.gmra.mrb[30].mxu0 %v6298_v5 }
 0x84f   : > { %10421 = vmatpush3.bf16.msra.mxu0 %v10420_v1  ;;  %9661 = vmatprep.mubr.msk.f32.mxu0 %vm13548_vm3, %v13499_v37 }
 0x850   : > { %10422 = vmatprep.subr.bf16.mxu0 %v13547_v20 }
 0x853   : > { %10424 = vmatpush3.bf16.msra.mxu0 %v10423_v19 }
 0x854   : > { %10425 = vmatprep.subr.bf16.mxu0 %v13547_v20 }
 0x856   : > { %9662 = vmatmul.mubr.f32.vlgmr.msra.gmra.mrb[30].mxu0 %v6296_v11 }
 0x857   : > { %10427 = vmatpush3.bf16.msk.msra.mxu0 %vm13033_vm10, %v13453_v41  ;;  %9672 = vmatprep.mubr.msk.f32.mxu0 %vm13548_vm3, %v13499_v37  ;;  %vm13098_vm3 = vmand %vm491_vm8, %vm500_vm7  ;;  %vm488_vm8 = vcmp.ge.s32.totalorder %v13497_v38, %v487_v59  ;;  %vm497_vm7 = vcmp.lt.s32.totalorder %v13497_v38, %v496_v58 }
 0x858   : > { %10428 = vmatprep.subr.bf16.mxu0 %v13547_v20  ;;  %vm13115_vm10 = vmand %vm493_vm1, %vm502_vm2  ;;  %vm13600_vm2 = vcmask 31744   ;;  %v13152_v52 = vsel %vm13098_vm3, 1.0, %v13499_v37 }
 0x859   : > { %vm506_vm1 = vmand %vm489_vm6, %vm498_vm12  ;;  %v13166_v47 = vsel %vm13115_vm10, 1.0, %v13499_v37 }
 0x85a   : > { %vm13601_vm15 = vmmov %vm13600_vm2  ;;  %v13176_v28 = vsel %vm506_vm1, 1.0, %v13499_v37 }
 0x85b   : > { %10430 = vmatpush3.bf16.msk.msra.mxu0 %vm13043_vm13, %v13453_v41  ;;  %v6719_v41 = vsel %vm13587_vm0, %v13096_v12, 0  ;;  %vm495_vm13 = vcmp.ge.s32.totalorder %v13595_v2, %v487_v59  ;;  %vm505_vm0 = vmand %vm488_vm8, %vm497_vm7  ;;  %v6722_v55 = vsel %vm13601_vm15, %v13152_v52, 0 }
 0x85c   : > { %v13104_v32 = vsub.f32 %v6719_v41, %v6719_v41  ;;  %vm13130_vm5 = vmand %vm495_vm13, %vm504_vm14  ;;  %v13139_v45 = vsel %vm505_vm0, 1.0, %v13499_v37  ;;  %v13168_v53 = vsub.f32 %v6722_v55, %v6722_v55 }
 0x85d   : > { %v6713_v40 = vsel %vm13600_vm2, %v13139_v45, 0  ;;  %vm13602_vm11 = vmmov %vm13600_vm2  ;;  %v13189_v16 = vsel %vm13130_vm5, 1.0, %v13499_v37 }
 0x85e   : > { %9673 = vmatmul.mubr.f32.vlgmr.msra.gmra.mrb[30].mxu0 %v6296_v11  ;;  %v6827_v44 = vand.u32 4294901760, %v13104_v32  ;;  %v13143_v60 = vsub.f32 %v6713_v40, %v6713_v40  ;;  %v6725_v23 = vsel %vm13602_vm11, %v13157_v62, 0  ;;  %vm13603_vm3 = vmmov %vm13600_vm2  ;;  %v6837_v22 = vand.u32 4294901760, %v13168_v53 }
 0x85f   : > { %v13178_v3 = vsub.f32 %v6725_v23, %v6725_v23  ;;  %v6728_v36 = vsel %vm13603_vm3, %v13166_v47, 0  ;;  %vm13604_vm4 = vmmov %vm13600_vm2  ;;  %v10736_v23 = vld [vmem:[%s11082_s30 + $0x38] sm:$0xff] }
 0x860   : > { %v6828_v25 = vsub.f32 %v13104_v32, %v6827_v44  ;;  %v6807_v10 = vand.u32 4294901760, %v13143_v60  ;;  %v6716_v57 = vsel %vm13604_vm4, %v13176_v28, 0  ;;  %vm13605_vm10 = vmmov %vm13600_vm2  ;;  %v13192_v7 = vsub.f32 %v6728_v36, %v6728_v36 }
 0x861   : > { %v6731_v18 = vsel %vm13605_vm10, %v13173_v9, 0  ;;  %v13194_v51 = vsub.f32 %v6716_v57, %v6716_v57  ;;  %v6847_v31 = vand.u32 4294901760, %v13178_v3  ;;  %vm13606_vm13 = vmmov %vm13600_vm2  ;;  %v6838_v37 = vsub.f32 %v13168_v53, %v6837_v22 }
 0x862   : > { %v6829_v24 = vand.u32 4294901760, %v6828_v25  ;;  %v6808_v38 = vsub.f32 %v13143_v60, %v6807_v10  ;;  %v13197_v46 = vsub.f32 %v6731_v18, %v6731_v18  ;;  %v6734_v35 = vsel %vm13606_vm13, %v13189_v16, 0  ;;  %vm13608_vm14 = vmmov %vm13600_vm2  ;;  %v10731_v25 = vld [vmem:[%s11082_s30] sm:$0xff] }
 0x863   : > { %v6817_v8 = vand.u32 4294901760, %v13194_v51  ;;  %v6857_v49 = vand.u32 4294901760, %v13192_v7  ;;  %v13206_v54 = vsub.f32 %v6734_v35, %v6734_v35  ;;  %v6848_v33 = vsub.f32 %v13178_v3, %v6847_v31  ;;  %vm13609_vm5 = vmmov %vm13600_vm2 }
 0x864   : > { %9680 = vmatprep.mubr.f32.mxu1 %v6829_v24  ;;  %v6809_v13 = vand.u32 4294901760, %v6808_v38  ;;  %v6867_v1 = vand.u32 4294901760, %v13197_v46  ;;  %v6839_v21 = vand.u32 4294901760, %v6838_v37  ;;  %vm13610_vm8 = vmmov %vm13600_vm2  ;;  %v10732_v24 = vld [vmem:[%s11082_s30 + $0x18] sm:$0xff] }
 0x865   : > { %v6818_v4 = vsub.f32 %v13194_v51, %v6817_v8  ;;  %v6858_v34 = vsub.f32 %v13192_v7, %v6857_v49  ;;  %v6877_v26 = vand.u32 4294901760, %v13206_v54  ;;  %v6849_v6 = vand.u32 4294901760, %v6848_v33  ;;  %vm13611_vm7 = vmmov %vm13600_vm2 }
 0x866   : > { %9677 = vmatprep.mubr.f32.mxu0 %v6809_v13  ;;  %v6868_v43 = vsub.f32 %v13197_v46, %v6867_v1  ;;  %vm13612_vm0 = vmmov %vm13600_vm2 }
 0x867   : > { %v6819_v0 = vand.u32 4294901760, %v6818_v4  ;;  %v6859_v30 = vand.u32 4294901760, %v6858_v34  ;;  %v6878_v50 = vsub.f32 %v13206_v54, %v6877_v26  ;;  %vm13613_vm6 = vmmov %vm13612_vm0 }
 0x868   : > { %v6869_v48 = vand.u32 4294901760, %v6868_v43  ;;  %vm13614_vm12 = vmmov %vm13612_vm0 }
 0x869   : > { %v6879_v20 = vand.u32 4294901760, %v6878_v50  ;;  %vm13615_vm1 = vmmov %vm13612_vm0 }
 0x86a   : > { %vm13616_vm2 = vmmov %vm13612_vm0 }
 0x86b   : > { %vm13617_vm15 = vmmov %vm13612_vm0 }
 0x86c   : > { %vm13618_vm11 = vmmov %vm13612_vm0 }
 0x86d   : > { %vm13619_vm3 = vmmov %vm13612_vm0 }
 0x86e   : > { %vm13620_vm4 = vmmov %vm13612_vm0 }
 0x86f   : > { %vm13621_vm10 = vmmov %vm13612_vm0 }
 0x870   : > { %vm13622_vm13 = vmmov %vm13612_vm0 }
 0x931   : > { %v6708_v19 = vpop.f32.mrb[30].mxu0 }
 0x932   : > { %v6737_v17 = vsel %vm13607_vm9, %v6708_v19, 0  ;;  %v9674_v39 = vpop.f32.mrb[31].mxu0  ;;  %vm13623_vm9 = vmmov %vm13612_vm0 }
 0x933   : > { %v6740_v42 = vand.u32 4294901760, %v6737_v17 }
 0x935   : > { %v6887_v11 = vsub.f32 %v6737_v17, %v6740_v42  ;;  %9675 = vmatprep.subr.mxu0 %v6740_v42  ;;  %10431 = vmatprep.subr.mxu1 %v6740_v42 }
 0x936   : > { %9676 = vmatpush3.msra.mxu0 %v6740_v42  ;;  %10432 = vmatpush3.msra.mxu1 %v6740_v42 }
 0x937   : > { %9681 = vmatmul.mubr.f32.vlgmr.msra.gmra.mrb[18].mxu1 %v6839_v21  ;;  %v6888_v5 = vand.u32 4294901760, %v6887_v11  ;;  %9678 = vmatmul.mubr.f32.vlgmr.msra.gmra.mrb[32].mxu0 %v6819_v0 }
 0x938   : > { %9683 = vmatprep.mubr.f32.mxu1 %v6849_v6 }
 0x939   : > { %v6889_v59 = vsub.f32 %v6887_v11, %v6888_v5 }
 0x93b   : > { %9684 = vmatmul.mubr.f32.gmra.mrb[20].mxu1 %v6859_v30  ;;  %v6890_v58 = vand.u32 4294901760, %v6889_v59 }
 0x93c   : > { %9686 = vmatprep.mubr.f32.mxu1 %v6869_v48 }
 0x93d   : > { %9689 = vmatprep.subr.mxu1 %v6890_v58 }
 0x93e   : > { %9690 = vmatpush3.msra.mxu1 %v6890_v58 }
 0x93f   : > { %9687 = vmatmul.mubr.f32.gmra.mrb[22].mxu1 %v6879_v20  ;;  %9703 = vmatprep.subr.mxu1 %v6887_v11 }
 0x940   : > { %9691 = vmatprep.mubr.msk.f32.mxu1 %vm13608_vm14, %v13139_v45  ;;  %vm13624_vm14 = vmmov %vm13612_vm0 }
 0x943   : > { %9692 = vmatmul.mubr.msk.f32.vlgmr.msra.gmra.mrb[24].mxu1 %vm13609_vm5, %v13176_v28  ;;  %vm13625_vm5 = vmmov %vm13612_vm0 }
 0x944   : > { %9704 = vmatpush3.msra.mxu1 %v6887_v11  ;;  %9694 = vmatprep.mubr.msk.f32.mxu1 %vm13610_vm8, %v13096_v12  ;;  %vm13626_vm8 = vmmov %vm13612_vm0 }
 0x945   : > { %9717 = vmatprep.subr.mxu1 %v6740_v42 }
 0x947   : > { %9695 = vmatmul.mubr.msk.f32.gmra.mrb[18].mxu1 %vm13611_vm7, %v13152_v52  ;;  %vm13627_vm7 = vmmov %vm13612_vm0 }
 0x948   : > { %9697 = vmatprep.mubr.msk.f32.mxu1 %vm13612_vm0, %v13157_v62 }
 0x94b   : > { %9698 = vmatmul.mubr.msk.f32.gmra.mrb[20].mxu1 %vm13613_vm6, %v13166_v47  ;;  %vm13628_vm6 = vmmov %vm13612_vm0 }
 0x94c   : > { %9700 = vmatprep.mubr.msk.f32.mxu1 %vm13614_vm12, %v13173_v9  ;;  %vm13629_vm12 = vmmov %vm13612_vm0 }
 0x94f   : > { %9701 = vmatmul.mubr.msk.f32.gmra.mrb[22].mxu1 %vm13615_vm1, %v13189_v16  ;;  %vm13630_vm1 = vmmov %vm13612_vm0 }
 0x950   : > { %9705 = vmatprep.mubr.f32.mxu1 %v13143_v60 }
 0x953   : > { %9706 = vmatmul.mubr.f32.vlgmr.msra.gmra.mrb[24].mxu1 %v13194_v51 }
 0x954   : > { %9718 = vmatpush3.msra.mxu1 %v6740_v42  ;;  %9708 = vmatprep.mubr.f32.mxu1 %v13104_v32 }
 0x955   : > { %9731 = vmatprep.subr.mxu1 %v6888_v5 }
 0x957   : > { %9709 = vmatmul.mubr.f32.gmra.mrb[18].mxu1 %v13168_v53 }
 0x958   : > { %9711 = vmatprep.mubr.f32.mxu1 %v13178_v3 }
 0x95b   : > { %9712 = vmatmul.mubr.f32.gmra.mrb[20].mxu1 %v13192_v7 }
 0x95c   : > { %9714 = vmatprep.mubr.f32.mxu1 %v13197_v46 }
 0x95f   : > { %9715 = vmatmul.mubr.f32.gmra.mrb[22].mxu1 %v13206_v54 }
 0x960   : > { %9719 = vmatprep.mubr.f32.mxu1 %v6807_v10  ;;  %v10734_v10 = vld [vmem:[%s11082_s30 + $0x28] sm:$0xff] }
 0x963   : > { %9720 = vmatmul.mubr.f32.vlgmr.msra.gmra.mrb[24].mxu1 %v6817_v8 }
 0x964   : > { %9732 = vmatpush3.msra.mxu1 %v6888_v5  ;;  %9722 = vmatprep.mubr.f32.mxu1 %v6827_v44  ;;  %v10730_v44 = vld [vmem:[%s11082_s30 + $0x8] sm:$0xff] }
 0x965   : > { %9745 = vmatprep.subr.mxu1 %v6740_v42 }
 0x967   : > { %9723 = vmatmul.mubr.f32.gmra.mrb[18].mxu1 %v6837_v22 }
 0x968   : > { %9725 = vmatprep.mubr.f32.mxu1 %v6847_v31 }
 0x96b   : > { %9726 = vmatmul.mubr.f32.gmra.mrb[20].mxu1 %v6857_v49 }
 0x96c   : > { %9728 = vmatprep.mubr.f32.mxu1 %v6867_v1 }
 0x96f   : > { %9729 = vmatmul.mubr.f32.gmra.mrb[22].mxu1 %v6877_v26 }
 0x970   : > { %9733 = vmatprep.mubr.msk.f32.mxu1 %vm13616_vm2, %v13139_v45 }
 0x973   : > { %9734 = vmatmul.mubr.msk.f32.vlgmr.msra.gmra.mrb[24].mxu1 %vm13617_vm15, %v13176_v28 }
 0x974   : > { %9746 = vmatpush3.msra.mxu1 %v6740_v42  ;;  %9736 = vmatprep.mubr.msk.f32.mxu1 %vm13618_vm11, %v13096_v12 }
 0x977   : > { %9737 = vmatmul.mubr.msk.f32.gmra.mrb[18].mxu1 %vm13619_vm3, %v13152_v52 }
 0x978   : > { %9739 = vmatprep.mubr.msk.f32.mxu1 %vm13620_vm4, %v13157_v62 }
 0x97b   : > { %9740 = vmatmul.mubr.msk.f32.gmra.mrb[20].mxu1 %vm13621_vm10, %v13166_v47 }
 0x97c   : > { %9742 = vmatprep.mubr.msk.f32.mxu1 %vm13622_vm13, %v13173_v9 }
 0x97f   : > { %9743 = vmatmul.mubr.msk.f32.gmra.mrb[22].mxu1 %vm13623_vm9, %v13189_v16 }
 0x980   : > { %9747 = vmatprep.mubr.msk.f32.mxu1 %vm13624_vm14, %v13139_v45  ;;  %v10733_v45 = vld [vmem:[%s11082_s30 + $0x10] sm:$0xff] }
 0x983   : > { %9748 = vmatmul.mubr.msk.f32.vlgmr.msra.gmra.mrb[24].mxu1 %vm13625_vm5, %v13176_v28 }
 0x984   : > { %9750 = vmatprep.mubr.msk.f32.mxu1 %vm13626_vm8, %v13096_v12 }
 0x987   : > { %9751 = vmatmul.mubr.msk.f32.gmra.mrb[18].mxu1 %vm13627_vm7, %v13152_v52  ;;  %v10735_v52 = vld [vmem:[%s11082_s30 + $0x20] sm:$0xff] }
 0x988   : > { %9753 = vmatprep.mubr.msk.f32.mxu1 %vm13612_vm0, %v13157_v62 }
 0x98b   : > { %9754 = vmatmul.mubr.msk.f32.gmra.mrb[20].mxu1 %vm13628_vm6, %v13166_v47 }
 0x98c   : > { %9756 = vmatprep.mubr.msk.f32.mxu1 %vm13629_vm12, %v13173_v9  ;;  %v10737_v9 = vld [vmem:[%s11082_s30 + $0x30] sm:$0xff] }
 0x98f   : > { %9757 = vmatmul.mubr.msk.f32.gmra.mrb[22].mxu1 %vm13630_vm1, %v13189_v16 }
 0xa0a   : > { %v9679_v41 = vpop.f32.mrb[32].mxu0 }
 0xa0b   : > { %v6811_v32 = vpop.f32.mrb[33].mxu0 }
 0xa56   : > { %v9749_v12 = vpop.f32.mrb[24].mxu1 }
 0xa57   : > { %v10443_v29 = vadd.f32 %v9749_v12, %v9679_v41  ;;  %v7440_v27 = vpop.f32.mrb[25].mxu1 }
 0xa58   : > { %v10444_v14 = vadd.f32 %v7440_v27, %v6811_v32 }
 0xa59   : > { %v7487_v63 = vmul.f32 %v10730_v44, %v10443_v29 }
 0xa5a   : > { %v7486_v15 = vmul.f32 %v10731_v25, %v10444_v14  ;;  %v9752_v2 = vpop.f32.mrb[18].mxu1 }
 0xa5b   : > { %7495 = vst [vmem:[%s13287_s9 + $0x8] sm:$0xff] %v7487_v63  ;;  %v7489_v61 = vmul.f32 %v10732_v24, %v9752_v2  ;;  %v7452_v56 = vpop.f32.mrb[19].mxu1 }
 0xa5c   : > { %7494 = vst [vmem:[%s13287_s9] sm:$0xff] %v7486_v15  ;;  %v7488_v40 = vmul.f32 %v10733_v45, %v7452_v56 }
 0xa5d   : > { %7497 = vst [vmem:[%s13287_s9 + $0x18] sm:$0xff] %v7489_v61 }
 0xa5e   : > { %7496 = vst [vmem:[%s13287_s9 + $0x10] sm:$0xff] %v7488_v40  ;;  %v9755_v60 = vpop.f32.mrb[20].mxu1 }
 0xa5f   : > { %v7491_v38 = vmul.f32 %v10734_v10, %v9755_v60  ;;  %v7464_v13 = vpop.f32.mrb[21].mxu1 }
 0xa60   : > { %v7490_v62 = vmul.f32 %v10735_v52, %v7464_v13 }
 0xa61   : > { %7499 = vst [vmem:[%s13287_s9 + $0x28] sm:$0xff] %v7491_v38 }
 0xa62   : > { %7498 = vst [vmem:[%s13287_s9 + $0x20] sm:$0xff] %v7490_v62  ;;  %v9758_v55 = vpop.f32.mrb[22].mxu1 }
 0xa63   : > { %v7493_v47 = vmul.f32 %v10736_v23, %v9758_v55  ;;  %v7476_v53 = vpop.f32.mrb[23].mxu1 }
 0xa64   : > { %v7492_v28 = vmul.f32 %v10737_v9, %v7476_v53 }
 0xa65   : > { %7501 = vst [vmem:[%s13287_s9 + $0x38] sm:$0xff] %v7493_v47 }
 0xa66   : > { %7500 = vst [vmem:[%s13287_s9 + $0x30] sm:$0xff] %v7492_v28 }
 0xa67 PF: > { %s17_s24 = sadd.s32 1, %s10744_s24  }
 0xa68   : > { %p14_p4 = scmp.ge.s32.totalorder %s17_s24, 4  }
 0xa6a   :  { %16 = sbr.rel (!%p14_p4) target bundleno = 1 (0x1), region = 78 }

</bundles_post_ra>
